<compile_context>
chip_gen: v7x
topology: tpu7x:2x2x1
jax: 0.10.0
libtpu: 0.0.40
codegen_flags: <defaults>
</compile_context>

<pallas_src>
import numpy as np
import jax
import jax.numpy as jnp
from jax.experimental import pallas as pl
from jax.experimental.pallas import tpu as pltpu

BN_EPS = 1e-5
LATENT_DIM = 32
NEG_BIG = -1e30  # stands in for PyTorch's -inf MaxPool padding


# --------------------------------------------------------------------------------------
# Network shape bookkeeping + constant selection matrices (built once, on device)
# --------------------------------------------------------------------------------------
def _net_dims(L0, latent_dim):
    enc, L = [], L0
    for cin, cout in [(1, 128), (128, 128), (128, latent_dim)]:
        enc.append((cin, cout, L))
        L = L // 2 + 1                      # Conv(same) then MaxPool1d(2, padding=1)
    dec = []
    for cin, cout, act in [(latent_dim, 128, True), (128, 128, True), (128, 1, False)]:
        dec.append((cin, cout, L, act))
        L = 2 * L                           # ConvTranspose1d(k3, s2, p1, output_padding=1)
    return enc, dec, L


def _pool_select(L):
    """(L+1, Lo+2) 0/1 matrix: stride-2 select of the pairwise-max sequence, emitted
    with one zero column of padding on each side (ready for the next layer's k=3
    'same' conv / transposed-conv shifted reads)."""
    Lo = L // 2 + 1
    S = np.zeros((L + 1, Lo + 2), np.float32)
    for i in range(Lo):
        S[2 * i, i + 1] = 1.0
    return jnp.asarray(S)


def _interleave_select(L, pad):
    """0/1 matrices scattering the even/odd ConvTranspose phases into the length-2L
    output (optionally with one zero padding column on each side)."""
    W = 2 * L + (2 if pad else 0)
    off = 1 if pad else 0
    PE = np.zeros((L, W), np.float32)
    PO = np.zeros((L, W), np.float32)
    for m in range(L):
        PE[m, 2 * m + off] = 1.0
        PO[m, 2 * m + 1 + off] = 1.0
    return jnp.asarray(PE), jnp.asarray(PO)


# --------------------------------------------------------------------------------------
# Fused kernel: one grid step = one sample, all 6 layers
# --------------------------------------------------------------------------------------
def make_fused_kernel(enc_cfg, dec_cfg):
    def kernel(*refs):
        x_ref, o_ref = refs[0], refs[-1]
        prefs = refs[1:-1]
        cursor = [0]

        def take(k):
            out = prefs[cursor[0]:cursor[0] + k]
            cursor[0] += k
            return out

        f32 = jnp.float32
        # hp: current activation, channels-first (C, L+2), zero padded on both ends
        hp = x_ref[0]                                          # (1, L0+2), lane-dense

        # ------------------------------ encoder ------------------------------
        for (cin, cout, L) in enc_cfg:
            w_ref, b_ref, sc_ref, sh_ref, s_ref = take(5)
            if cin == 1:
                # rank-1 "conv": broadcast outer products on the VPU (no K=1 matmul)
                y = (w_ref[0] * hp[:, 0:L]
                     + w_ref[1] * hp[:, 1:L + 1]
                     + w_ref[2] * hp[:, 2:L + 2])
            else:
                y = jnp.dot(w_ref[0], hp[:, 0:L], preferred_element_type=f32)
                y = y + jnp.dot(w_ref[1], hp[:, 1:L + 1], preferred_element_type=f32)
                y = y + jnp.dot(w_ref[2], hp[:, 2:L + 2], preferred_element_type=f32)
            y = jnp.maximum(y + b_ref[...], 0.0)               # conv bias + ReLU
            y = y * sc_ref[...] + sh_ref[...]                  # BatchNorm1d (inference affine)
            # MaxPool1d(kernel=2, stride=2, padding=1): pairwise max on the VPU, then
            # a single 0/1 matmul does the stride-2 select + zero re-pad for next layer.
            neg = jnp.full((cout, 1), NEG_BIG, f32)
            yext = jnp.concatenate([neg, y, neg], axis=1)             # (cout, L+2)
            ymax = jnp.maximum(yext[:, 0:L + 1], yext[:, 1:L + 2])    # (cout, L+1)
            hp = jnp.dot(ymax, s_ref[...], preferred_element_type=f32)  # (cout, Lo+2)

        # ------------------------------ decoder ------------------------------
        for (cin, cout, L, act) in dec_cfg:
            if act:
                w_ref, b_ref, sc_ref, sh_ref, pe_ref, po_ref = take(6)
            else:
                w_ref, b_ref, pe_ref, po_ref = take(4)
            h = hp[:, 1:L + 1]           # (cin, L)
            h_next = hp[:, 2:L + 2]      # x[m+1]; trailing zero supplied by the padding
            # ConvTranspose1d(k=3, s=2, p=1, output_padding=1):
            #   out[2m] = W1^T x[m]          out[2m+1] = W0^T x[m+1] + W2^T x[m]
            even = jnp.dot(w_ref[1], h, preferred_element_type=f32) + b_ref[...]
            odd = (jnp.dot(w_ref[0], h_next, preferred_element_type=f32)
                   + jnp.dot(w_ref[2], h, preferred_element_type=f32) + b_ref[...])
            if act:                      # ReLU then BatchNorm; per-channel, so done pre-interleave
                even = jnp.maximum(even, 0.0) * sc_ref[...] + sh_ref[...]
                odd = jnp.maximum(odd, 0.0) * sc_ref[...] + sh_ref[...]
            # interleave even/odd phases along the length (lane) axis
            hp = (jnp.dot(even, pe_ref[...], preferred_element_type=f32)
                  + jnp.dot(odd, po_ref[...], preferred_element_type=f32))

        o_ref[0] = hp                    # (1, L_out): lane-dense final row

    return kernel


# --------------------------------------------------------------------------------------
# Wrapper
# --------------------------------------------------------------------------------------
def make_autoencoder(L0, latent_dim=LATENT_DIM):
    enc_cfg, dec_cfg, L_out = _net_dims(L0, latent_dim)
    kernel = make_fused_kernel(enc_cfg, dec_cfg)

    def forward(x, flat_params):
        N = x.shape[0]
        # zero "same"-padding for the first conv, presented lane-dense: (N, 1, L0+2)
        xp = jnp.pad(x.astype(jnp.float32), ((0, 0), (1, 1)))[:, None, :]
        in_specs = [pl.BlockSpec((1, 1, L0 + 2), lambda n: (n, 0, 0))]
        for a in flat_params:
            in_specs.append(pl.BlockSpec(a.shape, lambda n, nd=a.ndim: (0,) * nd))
        out = pl.pallas_call(
            kernel,
            out_shape=jax.ShapeDtypeStruct((N, 1, L_out), jnp.float32),
            grid_spec=pltpu.PrefetchScalarGridSpec(
                num_scalar_prefetch=0,
                grid=(N,),
                in_specs=in_specs,
                out_specs=pl.BlockSpec((1, 1, L_out), lambda n: (n, 0, 0)),
            ),
            compiler_params=pltpu.CompilerParams(
                dimension_semantics=("parallel",)),   # independent batch -> both v7x cores
        )(xp, *flat_params)
        return out[:, 0, :]

    return jax.jit(forward), L_out


# --------------------------------------------------------------------------------------
# Deterministic synthetic parameters (shapes from Autoencoder.__init__)
# --------------------------------------------------------------------------------------
def _layer_params(key, cin, cout):
    kw, kb, kg, kbe, km, kv = jax.random.split(key, 6)
    w = jax.random.normal(kw, (3, cout, cin), jnp.float32) * (1.0 / np.sqrt(3 * cin))
    b = 0.05 * jax.random.normal(kb, (cout, 1), jnp.float32)
    gamma = 1.0 + 0.1 * jax.random.normal(kg, (cout, 1), jnp.float32)
    beta = 0.1 * jax.random.normal(kbe, (cout, 1), jnp.float32)
    rmean = 0.05 * jax.random.normal(km, (cout, 1), jnp.float32)
    rvar = 1.0 + 0.1 * jax.random.uniform(kv, (cout, 1), jnp.float32)
    scale = gamma / jnp.sqrt(rvar + BN_EPS)
    shift = beta - rmean * scale
    return w, b, scale, shift


def init_params(key, L0, latent_dim=LATENT_DIM):
    enc_cfg, dec_cfg, _ = _net_dims(L0, latent_dim)
    flat = []
    for (cin, cout, L) in enc_cfg:
        key, sub = jax.random.split(key)
        w, b, scale, shift = _layer_params(sub, cin, cout)
        flat += [w, b, scale, shift, _pool_select(L)]
    for li, (cin, cout, L, act) in enumerate(dec_cfg):
        key, sub = jax.random.split(key)
        w, b, scale, shift = _layer_params(sub, cin, cout)
        PE, PO = _interleave_select(L, pad=(li != len(dec_cfg) - 1))
        if act:
            flat += [w, b, scale, shift, PE, PO]
        else:
            flat += [w, b, PE, PO]
    return tuple(flat)


if __name__ == "__main__":
    N, L = 2, 128
    x = jax.random.normal(jax.random.PRNGKey(0), (N, L), jnp.float32)
    params = init_params(jax.random.PRNGKey(42), L)
    fwd, L_out = make_autoencoder(L)

    out = jax.block_until_ready(fwd(x, params))

    # length trace: 128 -> 65 -> 33 -> 17 (encoder) -> 34 -> 68 -> 136 (decoder)
    assert out.shape == (N, L_out) == (N, 136), out.shape
    assert out.dtype == jnp.float32
    assert bool(jnp.all(jnp.isfinite(out)))
    print("KERNEL_OK")
</pallas_src>

<mosaic_0001>
module attributes {stable_mosaic.version = 11 : i64} {
  func.func @kernel(%arg0: i32, %arg1: memref<1x1x130xf32, #tpu.memory_space<vmem>>, %arg2: memref<3x128x1xf32, #tpu.memory_space<vmem>>, %arg3: memref<128x1xf32, #tpu.memory_space<vmem>>, %arg4: memref<128x1xf32, #tpu.memory_space<vmem>>, %arg5: memref<128x1xf32, #tpu.memory_space<vmem>>, %arg6: memref<129x67xf32, #tpu.memory_space<vmem>>, %arg7: memref<3x128x128xf32, #tpu.memory_space<vmem>>, %arg8: memref<128x1xf32, #tpu.memory_space<vmem>>, %arg9: memref<128x1xf32, #tpu.memory_space<vmem>>, %arg10: memref<128x1xf32, #tpu.memory_space<vmem>>, %arg11: memref<66x35xf32, #tpu.memory_space<vmem>>, %arg12: memref<3x32x128xf32, #tpu.memory_space<vmem>>, %arg13: memref<32x1xf32, #tpu.memory_space<vmem>>, %arg14: memref<32x1xf32, #tpu.memory_space<vmem>>, %arg15: memref<32x1xf32, #tpu.memory_space<vmem>>, %arg16: memref<34x19xf32, #tpu.memory_space<vmem>>, %arg17: memref<3x128x32xf32, #tpu.memory_space<vmem>>, %arg18: memref<128x1xf32, #tpu.memory_space<vmem>>, %arg19: memref<128x1xf32, #tpu.memory_space<vmem>>, %arg20: memref<128x1xf32, #tpu.memory_space<vmem>>, %arg21: memref<17x36xf32, #tpu.memory_space<vmem>>, %arg22: memref<17x36xf32, #tpu.memory_space<vmem>>, %arg23: memref<3x128x128xf32, #tpu.memory_space<vmem>>, %arg24: memref<128x1xf32, #tpu.memory_space<vmem>>, %arg25: memref<128x1xf32, #tpu.memory_space<vmem>>, %arg26: memref<128x1xf32, #tpu.memory_space<vmem>>, %arg27: memref<34x70xf32, #tpu.memory_space<vmem>>, %arg28: memref<34x70xf32, #tpu.memory_space<vmem>>, %arg29: memref<3x1x128xf32, #tpu.memory_space<vmem>>, %arg30: memref<1x1xf32, #tpu.memory_space<vmem>>, %arg31: memref<68x136xf32, #tpu.memory_space<vmem>>, %arg32: memref<68x136xf32, #tpu.memory_space<vmem>>, %arg33: memref<1x1x136xf32, #tpu.memory_space<vmem>>) attributes {dimension_semantics = [#tpu.dimension_semantics<parallel>], iteration_bounds = array<i64: 2>, scalar_prefetch = 0 : i64, scratch_operands = 0 : i64, tpu.core_type = #tpu.core_type<tc>, window_params = [{transform_indices = @transform_0, window_bounds = array<i64: 1, 1, 130>}, {pipeline_mode = #tpu.pipeline_mode<synchronous>, transform_indices = @transform_1, window_bounds = array<i64: 3, 128, 1>}, {pipeline_mode = #tpu.pipeline_mode<synchronous>, transform_indices = @transform_2, window_bounds = array<i64: 128, 1>}, {pipeline_mode = #tpu.pipeline_mode<synchronous>, transform_indices = @transform_3, window_bounds = array<i64: 128, 1>}, {pipeline_mode = #tpu.pipeline_mode<synchronous>, transform_indices = @transform_4, window_bounds = array<i64: 128, 1>}, {pipeline_mode = #tpu.pipeline_mode<synchronous>, transform_indices = @transform_5, window_bounds = array<i64: 129, 67>}, {pipeline_mode = #tpu.pipeline_mode<synchronous>, transform_indices = @transform_6, window_bounds = array<i64: 3, 128, 128>}, {pipeline_mode = #tpu.pipeline_mode<synchronous>, transform_indices = @transform_7, window_bounds = array<i64: 128, 1>}, {pipeline_mode = #tpu.pipeline_mode<synchronous>, transform_indices = @transform_8, window_bounds = array<i64: 128, 1>}, {pipeline_mode = #tpu.pipeline_mode<synchronous>, transform_indices = @transform_9, window_bounds = array<i64: 128, 1>}, {pipeline_mode = #tpu.pipeline_mode<synchronous>, transform_indices = @transform_10, window_bounds = array<i64: 66, 35>}, {pipeline_mode = #tpu.pipeline_mode<synchronous>, transform_indices = @transform_11, window_bounds = array<i64: 3, 32, 128>}, {pipeline_mode = #tpu.pipeline_mode<synchronous>, transform_indices = @transform_12, window_bounds = array<i64: 32, 1>}, {pipeline_mode = #tpu.pipeline_mode<synchronous>, transform_indices = @transform_13, window_bounds = array<i64: 32, 1>}, {pipeline_mode = #tpu.pipeline_mode<synchronous>, transform_indices = @transform_14, window_bounds = array<i64: 32, 1>}, {pipeline_mode = #tpu.pipeline_mode<synchronous>, transform_indices = @transform_15, window_bounds = array<i64: 34, 19>}, {pipeline_mode = #tpu.pipeline_mode<synchronous>, transform_indices = @transform_16, window_bounds = array<i64: 3, 128, 32>}, {pipeline_mode = #tpu.pipeline_mode<synchronous>, transform_indices = @transform_17, window_bounds = array<i64: 128, 1>}, {pipeline_mode = #tpu.pipeline_mode<synchronous>, transform_indices = @transform_18, window_bounds = array<i64: 128, 1>}, {pipeline_mode = #tpu.pipeline_mode<synchronous>, transform_indices = @transform_19, window_bounds = array<i64: 128, 1>}, {pipeline_mode = #tpu.pipeline_mode<synchronous>, transform_indices = @transform_20, window_bounds = array<i64: 17, 36>}, {pipeline_mode = #tpu.pipeline_mode<synchronous>, transform_indices = @transform_21, window_bounds = array<i64: 17, 36>}, {pipeline_mode = #tpu.pipeline_mode<synchronous>, transform_indices = @transform_22, window_bounds = array<i64: 3, 128, 128>}, {pipeline_mode = #tpu.pipeline_mode<synchronous>, transform_indices = @transform_23, window_bounds = array<i64: 128, 1>}, {pipeline_mode = #tpu.pipeline_mode<synchronous>, transform_indices = @transform_24, window_bounds = array<i64: 128, 1>}, {pipeline_mode = #tpu.pipeline_mode<synchronous>, transform_indices = @transform_25, window_bounds = array<i64: 128, 1>}, {pipeline_mode = #tpu.pipeline_mode<synchronous>, transform_indices = @transform_26, window_bounds = array<i64: 34, 70>}, {pipeline_mode = #tpu.pipeline_mode<synchronous>, transform_indices = @transform_27, window_bounds = array<i64: 34, 70>}, {pipeline_mode = #tpu.pipeline_mode<synchronous>, transform_indices = @transform_28, window_bounds = array<i64: 3, 1, 128>}, {pipeline_mode = #tpu.pipeline_mode<synchronous>, transform_indices = @transform_29, window_bounds = array<i64: 1, 1>}, {pipeline_mode = #tpu.pipeline_mode<synchronous>, transform_indices = @transform_30, window_bounds = array<i64: 68, 136>}, {pipeline_mode = #tpu.pipeline_mode<synchronous>, transform_indices = @transform_31, window_bounds = array<i64: 68, 136>}, {transform_indices = @transform_32, window_bounds = array<i64: 1, 1, 136>}]} {
    %c0 = arith.constant 0 : index
    %c0_0 = arith.constant 0 : index
    %c0_1 = arith.constant 0 : index
    %0 = vector.load %arg1[%c0, %c0_0, %c0_1] : memref<1x1x130xf32, #tpu.memory_space<vmem>>, vector<1x1x130xf32>
    %1 = vector.shape_cast %0 : vector<1x1x130xf32> to vector<1x130xf32>
    %c0_2 = arith.constant 0 : index
    %c0_3 = arith.constant 0 : index
    %c0_4 = arith.constant 0 : index
    %2 = vector.load %arg2[%c0_2, %c0_3, %c0_4] : memref<3x128x1xf32, #tpu.memory_space<vmem>>, vector<1x128x1xf32>
    %3 = vector.shape_cast %2 : vector<1x128x1xf32> to vector<128x1xf32>
    %4 = vector.extract_strided_slice %1 {offsets = [0, 0], sizes = [1, 128], strides = [1, 1]} : vector<1x130xf32> to vector<1x128xf32>
    %5 = vector.broadcast %3 : vector<128x1xf32> to vector<128x128xf32>
    %6 = vector.broadcast %4 : vector<1x128xf32> to vector<128x128xf32>
    %7 = arith.mulf %5, %6 : vector<128x128xf32>
    %c1 = arith.constant 1 : index
    %c0_5 = arith.constant 0 : index
    %c0_6 = arith.constant 0 : index
    %8 = vector.load %arg2[%c1, %c0_5, %c0_6] : memref<3x128x1xf32, #tpu.memory_space<vmem>>, vector<1x128x1xf32>
    %9 = vector.shape_cast %8 : vector<1x128x1xf32> to vector<128x1xf32>
    %10 = vector.extract_strided_slice %1 {offsets = [0, 1], sizes = [1, 128], strides = [1, 1]} : vector<1x130xf32> to vector<1x128xf32>
    %11 = vector.broadcast %9 : vector<128x1xf32> to vector<128x128xf32>
    %12 = vector.broadcast %10 : vector<1x128xf32> to vector<128x128xf32>
    %13 = arith.mulf %11, %12 : vector<128x128xf32>
    %14 = arith.addf %7, %13 : vector<128x128xf32>
    %c2 = arith.constant 2 : index
    %c0_7 = arith.constant 0 : index
    %c0_8 = arith.constant 0 : index
    %15 = vector.load %arg2[%c2, %c0_7, %c0_8] : memref<3x128x1xf32, #tpu.memory_space<vmem>>, vector<1x128x1xf32>
    %16 = vector.shape_cast %15 : vector<1x128x1xf32> to vector<128x1xf32>
    %17 = vector.extract_strided_slice %1 {offsets = [0, 2], sizes = [1, 128], strides = [1, 1]} : vector<1x130xf32> to vector<1x128xf32>
    %18 = vector.broadcast %16 : vector<128x1xf32> to vector<128x128xf32>
    %19 = vector.broadcast %17 : vector<1x128xf32> to vector<128x128xf32>
    %20 = arith.mulf %18, %19 : vector<128x128xf32>
    %21 = arith.addf %14, %20 : vector<128x128xf32>
    %c0_9 = arith.constant 0 : index
    %c0_10 = arith.constant 0 : index
    %22 = vector.load %arg3[%c0_9, %c0_10] : memref<128x1xf32, #tpu.memory_space<vmem>>, vector<128x1xf32>
    %23 = vector.broadcast %22 : vector<128x1xf32> to vector<128x128xf32>
    %24 = arith.addf %21, %23 : vector<128x128xf32>
    %cst = arith.constant 0.000000e+00 : f32
    %25 = vector.broadcast %cst : f32 to vector<128x128xf32>
    %26 = arith.maximumf %24, %25 : vector<128x128xf32>
    %c0_11 = arith.constant 0 : index
    %c0_12 = arith.constant 0 : index
    %27 = vector.load %arg4[%c0_11, %c0_12] : memref<128x1xf32, #tpu.memory_space<vmem>>, vector<128x1xf32>
    %28 = vector.broadcast %27 : vector<128x1xf32> to vector<128x128xf32>
    %29 = arith.mulf %26, %28 : vector<128x128xf32>
    %c0_13 = arith.constant 0 : index
    %c0_14 = arith.constant 0 : index
    %30 = vector.load %arg5[%c0_13, %c0_14] : memref<128x1xf32, #tpu.memory_space<vmem>>, vector<128x1xf32>
    %31 = vector.broadcast %30 : vector<128x1xf32> to vector<128x128xf32>
    %32 = arith.addf %29, %31 : vector<128x128xf32>
    %cst_15 = arith.constant -1.000000e+30 : f32
    %33 = vector.broadcast %cst_15 : f32 to vector<128x1xf32>
    %34 = tpu.concatenate %33, %32, %33 in 1 : vector<128x1xf32>, vector<128x128xf32>, vector<128x1xf32> -> vector<128x130xf32>
    %35 = vector.extract_strided_slice %34 {offsets = [0, 0], sizes = [128, 129], strides = [1, 1]} : vector<128x130xf32> to vector<128x129xf32>
    %36 = vector.extract_strided_slice %34 {offsets = [0, 1], sizes = [128, 129], strides = [1, 1]} : vector<128x130xf32> to vector<128x129xf32>
    %37 = arith.maximumf %35, %36 : vector<128x129xf32>
    %c0_16 = arith.constant 0 : index
    %c0_17 = arith.constant 0 : index
    %38 = vector.load %arg6[%c0_16, %c0_17] : memref<129x67xf32, #tpu.memory_space<vmem>>, vector<129x67xf32>
    %cst_18 = arith.constant dense<0.000000e+00> : vector<128x67xf32>
    %39 = tpu.matmul %37, %38, %cst_18 {dimension_numbers = #tpu.dot_dimension_numbers<[1], [0], [0], [1], [0, 0, 1, 1], [], []>} : vector<128x129xf32>, vector<129x67xf32>, vector<128x67xf32> -> vector<128x67xf32>
    %c0_19 = arith.constant 0 : index
    %c0_20 = arith.constant 0 : index
    %c0_21 = arith.constant 0 : index
    %40 = vector.load %arg7[%c0_19, %c0_20, %c0_21] : memref<3x128x128xf32, #tpu.memory_space<vmem>>, vector<1x128x128xf32>
    %41 = vector.shape_cast %40 : vector<1x128x128xf32> to vector<128x128xf32>
    %42 = vector.extract_strided_slice %39 {offsets = [0, 0], sizes = [128, 65], strides = [1, 1]} : vector<128x67xf32> to vector<128x65xf32>
    %cst_22 = arith.constant dense<0.000000e+00> : vector<128x65xf32>
    %43 = tpu.matmul %41, %42, %cst_22 {dimension_numbers = #tpu.dot_dimension_numbers<[1], [0], [0], [1], [0, 0, 1, 1], [], []>} : vector<128x128xf32>, vector<128x65xf32>, vector<128x65xf32> -> vector<128x65xf32>
    %c1_23 = arith.constant 1 : index
    %c0_24 = arith.constant 0 : index
    %c0_25 = arith.constant 0 : index
    %44 = vector.load %arg7[%c1_23, %c0_24, %c0_25] : memref<3x128x128xf32, #tpu.memory_space<vmem>>, vector<1x128x128xf32>
    %45 = vector.shape_cast %44 : vector<1x128x128xf32> to vector<128x128xf32>
    %46 = vector.extract_strided_slice %39 {offsets = [0, 1], sizes = [128, 65], strides = [1, 1]} : vector<128x67xf32> to vector<128x65xf32>
    %cst_26 = arith.constant dense<0.000000e+00> : vector<128x65xf32>
    %47 = tpu.matmul %45, %46, %cst_26 {dimension_numbers = #tpu.dot_dimension_numbers<[1], [0], [0], [1], [0, 0, 1, 1], [], []>} : vector<128x128xf32>, vector<128x65xf32>, vector<128x65xf32> -> vector<128x65xf32>
    %48 = arith.addf %43, %47 : vector<128x65xf32>
    %c2_27 = arith.constant 2 : index
    %c0_28 = arith.constant 0 : index
    %c0_29 = arith.constant 0 : index
    %49 = vector.load %arg7[%c2_27, %c0_28, %c0_29] : memref<3x128x128xf32, #tpu.memory_space<vmem>>, vector<1x128x128xf32>
    %50 = vector.shape_cast %49 : vector<1x128x128xf32> to vector<128x128xf32>
    %51 = vector.extract_strided_slice %39 {offsets = [0, 2], sizes = [128, 65], strides = [1, 1]} : vector<128x67xf32> to vector<128x65xf32>
    %cst_30 = arith.constant dense<0.000000e+00> : vector<128x65xf32>
    %52 = tpu.matmul %50, %51, %cst_30 {dimension_numbers = #tpu.dot_dimension_numbers<[1], [0], [0], [1], [0, 0, 1, 1], [], []>} : vector<128x128xf32>, vector<128x65xf32>, vector<128x65xf32> -> vector<128x65xf32>
    %53 = arith.addf %48, %52 : vector<128x65xf32>
    %c0_31 = arith.constant 0 : index
    %c0_32 = arith.constant 0 : index
    %54 = vector.load %arg8[%c0_31, %c0_32] : memref<128x1xf32, #tpu.memory_space<vmem>>, vector<128x1xf32>
    %55 = vector.broadcast %54 : vector<128x1xf32> to vector<128x65xf32>
    %56 = arith.addf %53, %55 : vector<128x65xf32>
    %cst_33 = arith.constant 0.000000e+00 : f32
    %57 = vector.broadcast %cst_33 : f32 to vector<128x65xf32>
    %58 = arith.maximumf %56, %57 : vector<128x65xf32>
    %c0_34 = arith.constant 0 : index
    %c0_35 = arith.constant 0 : index
    %59 = vector.load %arg9[%c0_34, %c0_35] : memref<128x1xf32, #tpu.memory_space<vmem>>, vector<128x1xf32>
    %60 = vector.broadcast %59 : vector<128x1xf32> to vector<128x65xf32>
    %61 = arith.mulf %58, %60 : vector<128x65xf32>
    %c0_36 = arith.constant 0 : index
    %c0_37 = arith.constant 0 : index
    %62 = vector.load %arg10[%c0_36, %c0_37] : memref<128x1xf32, #tpu.memory_space<vmem>>, vector<128x1xf32>
    %63 = vector.broadcast %62 : vector<128x1xf32> to vector<128x65xf32>
    %64 = arith.addf %61, %63 : vector<128x65xf32>
    %cst_38 = arith.constant -1.000000e+30 : f32
    %65 = vector.broadcast %cst_38 : f32 to vector<128x1xf32>
    %66 = tpu.concatenate %65, %64, %65 in 1 : vector<128x1xf32>, vector<128x65xf32>, vector<128x1xf32> -> vector<128x67xf32>
    %67 = vector.extract_strided_slice %66 {offsets = [0, 0], sizes = [128, 66], strides = [1, 1]} : vector<128x67xf32> to vector<128x66xf32>
    %68 = vector.extract_strided_slice %66 {offsets = [0, 1], sizes = [128, 66], strides = [1, 1]} : vector<128x67xf32> to vector<128x66xf32>
    %69 = arith.maximumf %67, %68 : vector<128x66xf32>
    %c0_39 = arith.constant 0 : index
    %c0_40 = arith.constant 0 : index
    %70 = vector.load %arg11[%c0_39, %c0_40] : memref<66x35xf32, #tpu.memory_space<vmem>>, vector<66x35xf32>
    %cst_41 = arith.constant dense<0.000000e+00> : vector<128x35xf32>
    %71 = tpu.matmul %69, %70, %cst_41 {dimension_numbers = #tpu.dot_dimension_numbers<[1], [0], [0], [1], [0, 0, 1, 1], [], []>} : vector<128x66xf32>, vector<66x35xf32>, vector<128x35xf32> -> vector<128x35xf32>
    %c0_42 = arith.constant 0 : index
    %c0_43 = arith.constant 0 : index
    %c0_44 = arith.constant 0 : index
    %72 = vector.load %arg12[%c0_42, %c0_43, %c0_44] : memref<3x32x128xf32, #tpu.memory_space<vmem>>, vector<1x32x128xf32>
    %73 = vector.shape_cast %72 : vector<1x32x128xf32> to vector<32x128xf32>
    %74 = vector.extract_strided_slice %71 {offsets = [0, 0], sizes = [128, 33], strides = [1, 1]} : vector<128x35xf32> to vector<128x33xf32>
    %cst_45 = arith.constant dense<0.000000e+00> : vector<32x33xf32>
    %75 = tpu.matmul %73, %74, %cst_45 {dimension_numbers = #tpu.dot_dimension_numbers<[1], [0], [0], [1], [0, 0, 1, 1], [], []>} : vector<32x128xf32>, vector<128x33xf32>, vector<32x33xf32> -> vector<32x33xf32>
    %c1_46 = arith.constant 1 : index
    %c0_47 = arith.constant 0 : index
    %c0_48 = arith.constant 0 : index
    %76 = vector.load %arg12[%c1_46, %c0_47, %c0_48] : memref<3x32x128xf32, #tpu.memory_space<vmem>>, vector<1x32x128xf32>
    %77 = vector.shape_cast %76 : vector<1x32x128xf32> to vector<32x128xf32>
    %78 = vector.extract_strided_slice %71 {offsets = [0, 1], sizes = [128, 33], strides = [1, 1]} : vector<128x35xf32> to vector<128x33xf32>
    %cst_49 = arith.constant dense<0.000000e+00> : vector<32x33xf32>
    %79 = tpu.matmul %77, %78, %cst_49 {dimension_numbers = #tpu.dot_dimension_numbers<[1], [0], [0], [1], [0, 0, 1, 1], [], []>} : vector<32x128xf32>, vector<128x33xf32>, vector<32x33xf32> -> vector<32x33xf32>
    %80 = arith.addf %75, %79 : vector<32x33xf32>
    %c2_50 = arith.constant 2 : index
    %c0_51 = arith.constant 0 : index
    %c0_52 = arith.constant 0 : index
    %81 = vector.load %arg12[%c2_50, %c0_51, %c0_52] : memref<3x32x128xf32, #tpu.memory_space<vmem>>, vector<1x32x128xf32>
    %82 = vector.shape_cast %81 : vector<1x32x128xf32> to vector<32x128xf32>
    %83 = vector.extract_strided_slice %71 {offsets = [0, 2], sizes = [128, 33], strides = [1, 1]} : vector<128x35xf32> to vector<128x33xf32>
    %cst_53 = arith.constant dense<0.000000e+00> : vector<32x33xf32>
    %84 = tpu.matmul %82, %83, %cst_53 {dimension_numbers = #tpu.dot_dimension_numbers<[1], [0], [0], [1], [0, 0, 1, 1], [], []>} : vector<32x128xf32>, vector<128x33xf32>, vector<32x33xf32> -> vector<32x33xf32>
    %85 = arith.addf %80, %84 : vector<32x33xf32>
    %c0_54 = arith.constant 0 : index
    %c0_55 = arith.constant 0 : index
    %86 = vector.load %arg13[%c0_54, %c0_55] : memref<32x1xf32, #tpu.memory_space<vmem>>, vector<32x1xf32>
    %87 = vector.broadcast %86 : vector<32x1xf32> to vector<32x33xf32>
    %88 = arith.addf %85, %87 : vector<32x33xf32>
    %cst_56 = arith.constant 0.000000e+00 : f32
    %89 = vector.broadcast %cst_56 : f32 to vector<32x33xf32>
    %90 = arith.maximumf %88, %89 : vector<32x33xf32>
    %c0_57 = arith.constant 0 : index
    %c0_58 = arith.constant 0 : index
    %91 = vector.load %arg14[%c0_57, %c0_58] : memref<32x1xf32, #tpu.memory_space<vmem>>, vector<32x1xf32>
    %92 = vector.broadcast %91 : vector<32x1xf32> to vector<32x33xf32>
    %93 = arith.mulf %90, %92 : vector<32x33xf32>
    %c0_59 = arith.constant 0 : index
    %c0_60 = arith.constant 0 : index
    %94 = vector.load %arg15[%c0_59, %c0_60] : memref<32x1xf32, #tpu.memory_space<vmem>>, vector<32x1xf32>
    %95 = vector.broadcast %94 : vector<32x1xf32> to vector<32x33xf32>
    %96 = arith.addf %93, %95 : vector<32x33xf32>
    %cst_61 = arith.constant -1.000000e+30 : f32
    %97 = vector.broadcast %cst_61 : f32 to vector<32x1xf32>
    %98 = tpu.concatenate %97, %96, %97 in 1 : vector<32x1xf32>, vector<32x33xf32>, vector<32x1xf32> -> vector<32x35xf32>
    %99 = vector.extract_strided_slice %98 {offsets = [0, 0], sizes = [32, 34], strides = [1, 1]} : vector<32x35xf32> to vector<32x34xf32>
    %100 = vector.extract_strided_slice %98 {offsets = [0, 1], sizes = [32, 34], strides = [1, 1]} : vector<32x35xf32> to vector<32x34xf32>
    %101 = arith.maximumf %99, %100 : vector<32x34xf32>
    %c0_62 = arith.constant 0 : index
    %c0_63 = arith.constant 0 : index
    %102 = vector.load %arg16[%c0_62, %c0_63] : memref<34x19xf32, #tpu.memory_space<vmem>>, vector<34x19xf32>
    %cst_64 = arith.constant dense<0.000000e+00> : vector<32x19xf32>
    %103 = tpu.matmul %101, %102, %cst_64 {dimension_numbers = #tpu.dot_dimension_numbers<[1], [0], [0], [1], [0, 0, 1, 1], [], []>} : vector<32x34xf32>, vector<34x19xf32>, vector<32x19xf32> -> vector<32x19xf32>
    %104 = vector.extract_strided_slice %103 {offsets = [0, 1], sizes = [32, 17], strides = [1, 1]} : vector<32x19xf32> to vector<32x17xf32>
    %105 = vector.extract_strided_slice %103 {offsets = [0, 2], sizes = [32, 17], strides = [1, 1]} : vector<32x19xf32> to vector<32x17xf32>
    %c1_65 = arith.constant 1 : index
    %c0_66 = arith.constant 0 : index
    %c0_67 = arith.constant 0 : index
    %106 = vector.load %arg17[%c1_65, %c0_66, %c0_67] : memref<3x128x32xf32, #tpu.memory_space<vmem>>, vector<1x128x32xf32>
    %107 = vector.shape_cast %106 : vector<1x128x32xf32> to vector<128x32xf32>
    %cst_68 = arith.constant dense<0.000000e+00> : vector<128x17xf32>
    %108 = tpu.matmul %107, %104, %cst_68 {dimension_numbers = #tpu.dot_dimension_numbers<[1], [0], [0], [1], [0, 0, 1, 1], [], []>} : vector<128x32xf32>, vector<32x17xf32>, vector<128x17xf32> -> vector<128x17xf32>
    %c0_69 = arith.constant 0 : index
    %c0_70 = arith.constant 0 : index
    %109 = vector.load %arg18[%c0_69, %c0_70] : memref<128x1xf32, #tpu.memory_space<vmem>>, vector<128x1xf32>
    %110 = vector.broadcast %109 : vector<128x1xf32> to vector<128x17xf32>
    %111 = arith.addf %108, %110 : vector<128x17xf32>
    %c0_71 = arith.constant 0 : index
    %c0_72 = arith.constant 0 : index
    %c0_73 = arith.constant 0 : index
    %112 = vector.load %arg17[%c0_71, %c0_72, %c0_73] : memref<3x128x32xf32, #tpu.memory_space<vmem>>, vector<1x128x32xf32>
    %113 = vector.shape_cast %112 : vector<1x128x32xf32> to vector<128x32xf32>
    %cst_74 = arith.constant dense<0.000000e+00> : vector<128x17xf32>
    %114 = tpu.matmul %113, %105, %cst_74 {dimension_numbers = #tpu.dot_dimension_numbers<[1], [0], [0], [1], [0, 0, 1, 1], [], []>} : vector<128x32xf32>, vector<32x17xf32>, vector<128x17xf32> -> vector<128x17xf32>
    %c2_75 = arith.constant 2 : index
    %c0_76 = arith.constant 0 : index
    %c0_77 = arith.constant 0 : index
    %115 = vector.load %arg17[%c2_75, %c0_76, %c0_77] : memref<3x128x32xf32, #tpu.memory_space<vmem>>, vector<1x128x32xf32>
    %116 = vector.shape_cast %115 : vector<1x128x32xf32> to vector<128x32xf32>
    %cst_78 = arith.constant dense<0.000000e+00> : vector<128x17xf32>
    %117 = tpu.matmul %116, %104, %cst_78 {dimension_numbers = #tpu.dot_dimension_numbers<[1], [0], [0], [1], [0, 0, 1, 1], [], []>} : vector<128x32xf32>, vector<32x17xf32>, vector<128x17xf32> -> vector<128x17xf32>
    %118 = arith.addf %114, %117 : vector<128x17xf32>
    %c0_79 = arith.constant 0 : index
    %c0_80 = arith.constant 0 : index
    %119 = vector.load %arg18[%c0_79, %c0_80] : memref<128x1xf32, #tpu.memory_space<vmem>>, vector<128x1xf32>
    %120 = vector.broadcast %119 : vector<128x1xf32> to vector<128x17xf32>
    %121 = arith.addf %118, %120 : vector<128x17xf32>
    %cst_81 = arith.constant 0.000000e+00 : f32
    %122 = vector.broadcast %cst_81 : f32 to vector<128x17xf32>
    %123 = arith.maximumf %111, %122 : vector<128x17xf32>
    %c0_82 = arith.constant 0 : index
    %c0_83 = arith.constant 0 : index
    %124 = vector.load %arg19[%c0_82, %c0_83] : memref<128x1xf32, #tpu.memory_space<vmem>>, vector<128x1xf32>
    %125 = vector.broadcast %124 : vector<128x1xf32> to vector<128x17xf32>
    %126 = arith.mulf %123, %125 : vector<128x17xf32>
    %c0_84 = arith.constant 0 : index
    %c0_85 = arith.constant 0 : index
    %127 = vector.load %arg20[%c0_84, %c0_85] : memref<128x1xf32, #tpu.memory_space<vmem>>, vector<128x1xf32>
    %128 = vector.broadcast %127 : vector<128x1xf32> to vector<128x17xf32>
    %129 = arith.addf %126, %128 : vector<128x17xf32>
    %cst_86 = arith.constant 0.000000e+00 : f32
    %130 = vector.broadcast %cst_86 : f32 to vector<128x17xf32>
    %131 = arith.maximumf %121, %130 : vector<128x17xf32>
    %c0_87 = arith.constant 0 : index
    %c0_88 = arith.constant 0 : index
    %132 = vector.load %arg19[%c0_87, %c0_88] : memref<128x1xf32, #tpu.memory_space<vmem>>, vector<128x1xf32>
    %133 = vector.broadcast %132 : vector<128x1xf32> to vector<128x17xf32>
    %134 = arith.mulf %131, %133 : vector<128x17xf32>
    %c0_89 = arith.constant 0 : index
    %c0_90 = arith.constant 0 : index
    %135 = vector.load %arg20[%c0_89, %c0_90] : memref<128x1xf32, #tpu.memory_space<vmem>>, vector<128x1xf32>
    %136 = vector.broadcast %135 : vector<128x1xf32> to vector<128x17xf32>
    %137 = arith.addf %134, %136 : vector<128x17xf32>
    %c0_91 = arith.constant 0 : index
    %c0_92 = arith.constant 0 : index
    %138 = vector.load %arg21[%c0_91, %c0_92] : memref<17x36xf32, #tpu.memory_space<vmem>>, vector<17x36xf32>
    %cst_93 = arith.constant dense<0.000000e+00> : vector<128x36xf32>
    %139 = tpu.matmul %129, %138, %cst_93 {dimension_numbers = #tpu.dot_dimension_numbers<[1], [0], [0], [1], [0, 0, 1, 1], [], []>} : vector<128x17xf32>, vector<17x36xf32>, vector<128x36xf32> -> vector<128x36xf32>
    %c0_94 = arith.constant 0 : index
    %c0_95 = arith.constant 0 : index
    %140 = vector.load %arg22[%c0_94, %c0_95] : memref<17x36xf32, #tpu.memory_space<vmem>>, vector<17x36xf32>
    %cst_96 = arith.constant dense<0.000000e+00> : vector<128x36xf32>
    %141 = tpu.matmul %137, %140, %cst_96 {dimension_numbers = #tpu.dot_dimension_numbers<[1], [0], [0], [1], [0, 0, 1, 1], [], []>} : vector<128x17xf32>, vector<17x36xf32>, vector<128x36xf32> -> vector<128x36xf32>
    %142 = arith.addf %139, %141 : vector<128x36xf32>
    %143 = vector.extract_strided_slice %142 {offsets = [0, 1], sizes = [128, 34], strides = [1, 1]} : vector<128x36xf32> to vector<128x34xf32>
    %144 = vector.extract_strided_slice %142 {offsets = [0, 2], sizes = [128, 34], strides = [1, 1]} : vector<128x36xf32> to vector<128x34xf32>
    %c1_97 = arith.constant 1 : index
    %c0_98 = arith.constant 0 : index
    %c0_99 = arith.constant 0 : index
    %145 = vector.load %arg23[%c1_97, %c0_98, %c0_99] : memref<3x128x128xf32, #tpu.memory_space<vmem>>, vector<1x128x128xf32>
    %146 = vector.shape_cast %145 : vector<1x128x128xf32> to vector<128x128xf32>
    %cst_100 = arith.constant dense<0.000000e+00> : vector<128x34xf32>
    %147 = tpu.matmul %146, %143, %cst_100 {dimension_numbers = #tpu.dot_dimension_numbers<[1], [0], [0], [1], [0, 0, 1, 1], [], []>} : vector<128x128xf32>, vector<128x34xf32>, vector<128x34xf32> -> vector<128x34xf32>
    %c0_101 = arith.constant 0 : index
    %c0_102 = arith.constant 0 : index
    %148 = vector.load %arg24[%c0_101, %c0_102] : memref<128x1xf32, #tpu.memory_space<vmem>>, vector<128x1xf32>
    %149 = vector.broadcast %148 : vector<128x1xf32> to vector<128x34xf32>
    %150 = arith.addf %147, %149 : vector<128x34xf32>
    %c0_103 = arith.constant 0 : index
    %c0_104 = arith.constant 0 : index
    %c0_105 = arith.constant 0 : index
    %151 = vector.load %arg23[%c0_103, %c0_104, %c0_105] : memref<3x128x128xf32, #tpu.memory_space<vmem>>, vector<1x128x128xf32>
    %152 = vector.shape_cast %151 : vector<1x128x128xf32> to vector<128x128xf32>
    %cst_106 = arith.constant dense<0.000000e+00> : vector<128x34xf32>
    %153 = tpu.matmul %152, %144, %cst_106 {dimension_numbers = #tpu.dot_dimension_numbers<[1], [0], [0], [1], [0, 0, 1, 1], [], []>} : vector<128x128xf32>, vector<128x34xf32>, vector<128x34xf32> -> vector<128x34xf32>
    %c2_107 = arith.constant 2 : index
    %c0_108 = arith.constant 0 : index
    %c0_109 = arith.constant 0 : index
    %154 = vector.load %arg23[%c2_107, %c0_108, %c0_109] : memref<3x128x128xf32, #tpu.memory_space<vmem>>, vector<1x128x128xf32>
    %155 = vector.shape_cast %154 : vector<1x128x128xf32> to vector<128x128xf32>
    %cst_110 = arith.constant dense<0.000000e+00> : vector<128x34xf32>
    %156 = tpu.matmul %155, %143, %cst_110 {dimension_numbers = #tpu.dot_dimension_numbers<[1], [0], [0], [1], [0, 0, 1, 1], [], []>} : vector<128x128xf32>, vector<128x34xf32>, vector<128x34xf32> -> vector<128x34xf32>
    %157 = arith.addf %153, %156 : vector<128x34xf32>
    %c0_111 = arith.constant 0 : index
    %c0_112 = arith.constant 0 : index
    %158 = vector.load %arg24[%c0_111, %c0_112] : memref<128x1xf32, #tpu.memory_space<vmem>>, vector<128x1xf32>
    %159 = vector.broadcast %158 : vector<128x1xf32> to vector<128x34xf32>
    %160 = arith.addf %157, %159 : vector<128x34xf32>
    %cst_113 = arith.constant 0.000000e+00 : f32
    %161 = vector.broadcast %cst_113 : f32 to vector<128x34xf32>
    %162 = arith.maximumf %150, %161 : vector<128x34xf32>
    %c0_114 = arith.constant 0 : index
    %c0_115 = arith.constant 0 : index
    %163 = vector.load %arg25[%c0_114, %c0_115] : memref<128x1xf32, #tpu.memory_space<vmem>>, vector<128x1xf32>
    %164 = vector.broadcast %163 : vector<128x1xf32> to vector<128x34xf32>
    %165 = arith.mulf %162, %164 : vector<128x34xf32>
    %c0_116 = arith.constant 0 : index
    %c0_117 = arith.constant 0 : index
    %166 = vector.load %arg26[%c0_116, %c0_117] : memref<128x1xf32, #tpu.memory_space<vmem>>, vector<128x1xf32>
    %167 = vector.broadcast %166 : vector<128x1xf32> to vector<128x34xf32>
    %168 = arith.addf %165, %167 : vector<128x34xf32>
    %cst_118 = arith.constant 0.000000e+00 : f32
    %169 = vector.broadcast %cst_118 : f32 to vector<128x34xf32>
    %170 = arith.maximumf %160, %169 : vector<128x34xf32>
    %c0_119 = arith.constant 0 : index
    %c0_120 = arith.constant 0 : index
    %171 = vector.load %arg25[%c0_119, %c0_120] : memref<128x1xf32, #tpu.memory_space<vmem>>, vector<128x1xf32>
    %172 = vector.broadcast %171 : vector<128x1xf32> to vector<128x34xf32>
    %173 = arith.mulf %170, %172 : vector<128x34xf32>
    %c0_121 = arith.constant 0 : index
    %c0_122 = arith.constant 0 : index
    %174 = vector.load %arg26[%c0_121, %c0_122] : memref<128x1xf32, #tpu.memory_space<vmem>>, vector<128x1xf32>
    %175 = vector.broadcast %174 : vector<128x1xf32> to vector<128x34xf32>
    %176 = arith.addf %173, %175 : vector<128x34xf32>
    %c0_123 = arith.constant 0 : index
    %c0_124 = arith.constant 0 : index
    %177 = vector.load %arg27[%c0_123, %c0_124] : memref<34x70xf32, #tpu.memory_space<vmem>>, vector<34x70xf32>
    %cst_125 = arith.constant dense<0.000000e+00> : vector<128x70xf32>
    %178 = tpu.matmul %168, %177, %cst_125 {dimension_numbers = #tpu.dot_dimension_numbers<[1], [0], [0], [1], [0, 0, 1, 1], [], []>} : vector<128x34xf32>, vector<34x70xf32>, vector<128x70xf32> -> vector<128x70xf32>
    %c0_126 = arith.constant 0 : index
    %c0_127 = arith.constant 0 : index
    %179 = vector.load %arg28[%c0_126, %c0_127] : memref<34x70xf32, #tpu.memory_space<vmem>>, vector<34x70xf32>
    %cst_128 = arith.constant dense<0.000000e+00> : vector<128x70xf32>
    %180 = tpu.matmul %176, %179, %cst_128 {dimension_numbers = #tpu.dot_dimension_numbers<[1], [0], [0], [1], [0, 0, 1, 1], [], []>} : vector<128x34xf32>, vector<34x70xf32>, vector<128x70xf32> -> vector<128x70xf32>
    %181 = arith.addf %178, %180 : vector<128x70xf32>
    %182 = vector.extract_strided_slice %181 {offsets = [0, 1], sizes = [128, 68], strides = [1, 1]} : vector<128x70xf32> to vector<128x68xf32>
    %183 = vector.extract_strided_slice %181 {offsets = [0, 2], sizes = [128, 68], strides = [1, 1]} : vector<128x70xf32> to vector<128x68xf32>
    %c1_129 = arith.constant 1 : index
    %c0_130 = arith.constant 0 : index
    %c0_131 = arith.constant 0 : index
    %184 = vector.load %arg29[%c1_129, %c0_130, %c0_131] : memref<3x1x128xf32, #tpu.memory_space<vmem>>, vector<1x1x128xf32>
    %185 = vector.shape_cast %184 : vector<1x1x128xf32> to vector<1x128xf32>
    %cst_132 = arith.constant dense<0.000000e+00> : vector<1x68xf32>
    %186 = tpu.matmul %185, %182, %cst_132 {dimension_numbers = #tpu.dot_dimension_numbers<[1], [0], [0], [1], [0, 0, 1, 1], [], []>} : vector<1x128xf32>, vector<128x68xf32>, vector<1x68xf32> -> vector<1x68xf32>
    %c0_133 = arith.constant 0 : index
    %c0_134 = arith.constant 0 : index
    %187 = vector.load %arg30[%c0_133, %c0_134] : memref<1x1xf32, #tpu.memory_space<vmem>>, vector<1x1xf32>
    %188 = vector.broadcast %187 : vector<1x1xf32> to vector<1x68xf32>
    %189 = arith.addf %186, %188 : vector<1x68xf32>
    %c0_135 = arith.constant 0 : index
    %c0_136 = arith.constant 0 : index
    %c0_137 = arith.constant 0 : index
    %190 = vector.load %arg29[%c0_135, %c0_136, %c0_137] : memref<3x1x128xf32, #tpu.memory_space<vmem>>, vector<1x1x128xf32>
    %191 = vector.shape_cast %190 : vector<1x1x128xf32> to vector<1x128xf32>
    %cst_138 = arith.constant dense<0.000000e+00> : vector<1x68xf32>
    %192 = tpu.matmul %191, %183, %cst_138 {dimension_numbers = #tpu.dot_dimension_numbers<[1], [0], [0], [1], [0, 0, 1, 1], [], []>} : vector<1x128xf32>, vector<128x68xf32>, vector<1x68xf32> -> vector<1x68xf32>
    %c2_139 = arith.constant 2 : index
    %c0_140 = arith.constant 0 : index
    %c0_141 = arith.constant 0 : index
    %193 = vector.load %arg29[%c2_139, %c0_140, %c0_141] : memref<3x1x128xf32, #tpu.memory_space<vmem>>, vector<1x1x128xf32>
    %194 = vector.shape_cast %193 : vector<1x1x128xf32> to vector<1x128xf32>
    %cst_142 = arith.constant dense<0.000000e+00> : vector<1x68xf32>
    %195 = tpu.matmul %194, %182, %cst_142 {dimension_numbers = #tpu.dot_dimension_numbers<[1], [0], [0], [1], [0, 0, 1, 1], [], []>} : vector<1x128xf32>, vector<128x68xf32>, vector<1x68xf32> -> vector<1x68xf32>
    %196 = arith.addf %192, %195 : vector<1x68xf32>
    %c0_143 = arith.constant 0 : index
    %c0_144 = arith.constant 0 : index
    %197 = vector.load %arg30[%c0_143, %c0_144] : memref<1x1xf32, #tpu.memory_space<vmem>>, vector<1x1xf32>
    %198 = vector.broadcast %197 : vector<1x1xf32> to vector<1x68xf32>
    %199 = arith.addf %196, %198 : vector<1x68xf32>
    %c0_145 = arith.constant 0 : index
    %c0_146 = arith.constant 0 : index
    %200 = vector.load %arg31[%c0_145, %c0_146] : memref<68x136xf32, #tpu.memory_space<vmem>>, vector<68x136xf32>
    %cst_147 = arith.constant dense<0.000000e+00> : vector<1x136xf32>
    %201 = tpu.matmul %189, %200, %cst_147 {dimension_numbers = #tpu.dot_dimension_numbers<[1], [0], [0], [1], [0, 0, 1, 1], [], []>} : vector<1x68xf32>, vector<68x136xf32>, vector<1x136xf32> -> vector<1x136xf32>
    %c0_148 = arith.constant 0 : index
    %c0_149 = arith.constant 0 : index
    %202 = vector.load %arg32[%c0_148, %c0_149] : memref<68x136xf32, #tpu.memory_space<vmem>>, vector<68x136xf32>
    %cst_150 = arith.constant dense<0.000000e+00> : vector<1x136xf32>
    %203 = tpu.matmul %199, %202, %cst_150 {dimension_numbers = #tpu.dot_dimension_numbers<[1], [0], [0], [1], [0, 0, 1, 1], [], []>} : vector<1x68xf32>, vector<68x136xf32>, vector<1x136xf32> -> vector<1x136xf32>
    %204 = arith.addf %201, %203 : vector<1x136xf32>
    %c0_151 = arith.constant 0 : index
    %c0_152 = arith.constant 0 : index
    %c0_153 = arith.constant 0 : index
    %205 = vector.load %arg33[%c0_151, %c0_152, %c0_153] : memref<1x1x136xf32, #tpu.memory_space<vmem>>, vector<1x1x136xf32>
    %206 = vector.shape_cast %205 : vector<1x1x136xf32> to vector<1x136xf32>
    %207 = vector.shape_cast %204 : vector<1x136xf32> to vector<1x1x136xf32>
    tpu.vector_store %arg33[%c0_151, %c0_152, %c0_153], %207 {strides = array<i32>} : memref<1x1x136xf32, #tpu.memory_space<vmem>>, vector<1x1x136xf32>,
    return
  }
  func.func @transform_0(%arg0: i32) -> (i32, i32, i32) {
    %c0_i32 = arith.constant 0 : i32
    %c0_i32_0 = arith.constant 0 : i32
    %c0_i32_1 = arith.constant 0 : i32
    return %arg0, %c0_i32, %c0_i32_0 : i32, i32, i32
  }
  func.func @transform_1(%arg0: i32) -> (i32, i32, i32) {
    %c0_i32 = arith.constant 0 : i32
    %c0_i32_0 = arith.constant 0 : i32
    %c0_i32_1 = arith.constant 0 : i32
    %c0_i32_2 = arith.constant 0 : i32
    return %c0_i32, %c0_i32_0, %c0_i32_1 : i32, i32, i32
  }
  func.func @transform_2(%arg0: i32) -> (i32, i32) {
    %c0_i32 = arith.constant 0 : i32
    %c0_i32_0 = arith.constant 0 : i32
    %c0_i32_1 = arith.constant 0 : i32
    return %c0_i32, %c0_i32_0 : i32, i32
  }
  func.func @transform_3(%arg0: i32) -> (i32, i32) {
    %c0_i32 = arith.constant 0 : i32
    %c0_i32_0 = arith.constant 0 : i32
    %c0_i32_1 = arith.constant 0 : i32
    return %c0_i32, %c0_i32_0 : i32, i32
  }
  func.func @transform_4(%arg0: i32) -> (i32, i32) {
    %c0_i32 = arith.constant 0 : i32
    %c0_i32_0 = arith.constant 0 : i32
    %c0_i32_1 = arith.constant 0 : i32
    return %c0_i32, %c0_i32_0 : i32, i32
  }
  func.func @transform_5(%arg0: i32) -> (i32, i32) {
    %c0_i32 = arith.constant 0 : i32
    %c0_i32_0 = arith.constant 0 : i32
    %c0_i32_1 = arith.constant 0 : i32
    return %c0_i32, %c0_i32_0 : i32, i32
  }
  func.func @transform_6(%arg0: i32) -> (i32, i32, i32) {
    %c0_i32 = arith.constant 0 : i32
    %c0_i32_0 = arith.constant 0 : i32
    %c0_i32_1 = arith.constant 0 : i32
    %c0_i32_2 = arith.constant 0 : i32
    return %c0_i32, %c0_i32_0, %c0_i32_1 : i32, i32, i32
  }
  func.func @transform_7(%arg0: i32) -> (i32, i32) {
    %c0_i32 = arith.constant 0 : i32
    %c0_i32_0 = arith.constant 0 : i32
    %c0_i32_1 = arith.constant 0 : i32
    return %c0_i32, %c0_i32_0 : i32, i32
  }
  func.func @transform_8(%arg0: i32) -> (i32, i32) {
    %c0_i32 = arith.constant 0 : i32
    %c0_i32_0 = arith.constant 0 : i32
    %c0_i32_1 = arith.constant 0 : i32
    return %c0_i32, %c0_i32_0 : i32, i32
  }
  func.func @transform_9(%arg0: i32) -> (i32, i32) {
    %c0_i32 = arith.constant 0 : i32
    %c0_i32_0 = arith.constant 0 : i32
    %c0_i32_1 = arith.constant 0 : i32
    return %c0_i32, %c0_i32_0 : i32, i32
  }
  func.func @transform_10(%arg0: i32) -> (i32, i32) {
    %c0_i32 = arith.constant 0 : i32
    %c0_i32_0 = arith.constant 0 : i32
    %c0_i32_1 = arith.constant 0 : i32
    return %c0_i32, %c0_i32_0 : i32, i32
  }
  func.func @transform_11(%arg0: i32) -> (i32, i32, i32) {
    %c0_i32 = arith.constant 0 : i32
    %c0_i32_0 = arith.constant 0 : i32
    %c0_i32_1 = arith.constant 0 : i32
    %c0_i32_2 = arith.constant 0 : i32
    return %c0_i32, %c0_i32_0, %c0_i32_1 : i32, i32, i32
  }
  func.func @transform_12(%arg0: i32) -> (i32, i32) {
    %c0_i32 = arith.constant 0 : i32
    %c0_i32_0 = arith.constant 0 : i32
    %c0_i32_1 = arith.constant 0 : i32
    return %c0_i32, %c0_i32_0 : i32, i32
  }
  func.func @transform_13(%arg0: i32) -> (i32, i32) {
    %c0_i32 = arith.constant 0 : i32
    %c0_i32_0 = arith.constant 0 : i32
    %c0_i32_1 = arith.constant 0 : i32
    return %c0_i32, %c0_i32_0 : i32, i32
  }
  func.func @transform_14(%arg0: i32) -> (i32, i32) {
    %c0_i32 = arith.constant 0 : i32
    %c0_i32_0 = arith.constant 0 : i32
    %c0_i32_1 = arith.constant 0 : i32
    return %c0_i32, %c0_i32_0 : i32, i32
  }
  func.func @transform_15(%arg0: i32) -> (i32, i32) {
    %c0_i32 = arith.constant 0 : i32
    %c0_i32_0 = arith.constant 0 : i32
    %c0_i32_1 = arith.constant 0 : i32
    return %c0_i32, %c0_i32_0 : i32, i32
  }
  func.func @transform_16(%arg0: i32) -> (i32, i32, i32) {
    %c0_i32 = arith.constant 0 : i32
    %c0_i32_0 = arith.constant 0 : i32
    %c0_i32_1 = arith.constant 0 : i32
    %c0_i32_2 = arith.constant 0 : i32
    return %c0_i32, %c0_i32_0, %c0_i32_1 : i32, i32, i32
  }
  func.func @transform_17(%arg0: i32) -> (i32, i32) {
    %c0_i32 = arith.constant 0 : i32
    %c0_i32_0 = arith.constant 0 : i32
    %c0_i32_1 = arith.constant 0 : i32
    return %c0_i32, %c0_i32_0 : i32, i32
  }
  func.func @transform_18(%arg0: i32) -> (i32, i32) {
    %c0_i32 = arith.constant 0 : i32
    %c0_i32_0 = arith.constant 0 : i32
    %c0_i32_1 = arith.constant 0 : i32
    return %c0_i32, %c0_i32_0 : i32, i32
  }
  func.func @transform_19(%arg0: i32) -> (i32, i32) {
    %c0_i32 = arith.constant 0 : i32
    %c0_i32_0 = arith.constant 0 : i32
    %c0_i32_1 = arith.constant 0 : i32
    return %c0_i32, %c0_i32_0 : i32, i32
  }
  func.func @transform_20(%arg0: i32) -> (i32, i32) {
    %c0_i32 = arith.constant 0 : i32
    %c0_i32_0 = arith.constant 0 : i32
    %c0_i32_1 = arith.constant 0 : i32
    return %c0_i32, %c0_i32_0 : i32, i32
  }
  func.func @transform_21(%arg0: i32) -> (i32, i32) {
    %c0_i32 = arith.constant 0 : i32
    %c0_i32_0 = arith.constant 0 : i32
    %c0_i32_1 = arith.constant 0 : i32
    return %c0_i32, %c0_i32_0 : i32, i32
  }
  func.func @transform_22(%arg0: i32) -> (i32, i32, i32) {
    %c0_i32 = arith.constant 0 : i32
    %c0_i32_0 = arith.constant 0 : i32
    %c0_i32_1 = arith.constant 0 : i32
    %c0_i32_2 = arith.constant 0 : i32
    return %c0_i32, %c0_i32_0, %c0_i32_1 : i32, i32, i32
  }
  func.func @transform_23(%arg0: i32) -> (i32, i32) {
    %c0_i32 = arith.constant 0 : i32
    %c0_i32_0 = arith.constant 0 : i32
    %c0_i32_1 = arith.constant 0 : i32
    return %c0_i32, %c0_i32_0 : i32, i32
  }
  func.func @transform_24(%arg0: i32) -> (i32, i32) {
    %c0_i32 = arith.constant 0 : i32
    %c0_i32_0 = arith.constant 0 : i32
    %c0_i32_1 = arith.constant 0 : i32
    return %c0_i32, %c0_i32_0 : i32, i32
  }
  func.func @transform_25(%arg0: i32) -> (i32, i32) {
    %c0_i32 = arith.constant 0 : i32
    %c0_i32_0 = arith.constant 0 : i32
    %c0_i32_1 = arith.constant 0 : i32
    return %c0_i32, %c0_i32_0 : i32, i32
  }
  func.func @transform_26(%arg0: i32) -> (i32, i32) {
    %c0_i32 = arith.constant 0 : i32
    %c0_i32_0 = arith.constant 0 : i32
    %c0_i32_1 = arith.constant 0 : i32
    return %c0_i32, %c0_i32_0 : i32, i32
  }
  func.func @transform_27(%arg0: i32) -> (i32, i32) {
    %c0_i32 = arith.constant 0 : i32
    %c0_i32_0 = arith.constant 0 : i32
    %c0_i32_1 = arith.constant 0 : i32
    return %c0_i32, %c0_i32_0 : i32, i32
  }
  func.func @transform_28(%arg0: i32) -> (i32, i32, i32) {
    %c0_i32 = arith.constant 0 : i32
    %c0_i32_0 = arith.constant 0 : i32
    %c0_i32_1 = arith.constant 0 : i32
    %c0_i32_2 = arith.constant 0 : i32
    return %c0_i32, %c0_i32_0, %c0_i32_1 : i32, i32, i32
  }
  func.func @transform_29(%arg0: i32) -> (i32, i32) {
    %c0_i32 = arith.constant 0 : i32
    %c0_i32_0 = arith.constant 0 : i32
    %c0_i32_1 = arith.constant 0 : i32
    return %c0_i32, %c0_i32_0 : i32, i32
  }
  func.func @transform_30(%arg0: i32) -> (i32, i32) {
    %c0_i32 = arith.constant 0 : i32
    %c0_i32_0 = arith.constant 0 : i32
    %c0_i32_1 = arith.constant 0 : i32
    return %c0_i32, %c0_i32_0 : i32, i32
  }
  func.func @transform_31(%arg0: i32) -> (i32, i32) {
    %c0_i32 = arith.constant 0 : i32
    %c0_i32_0 = arith.constant 0 : i32
    %c0_i32_1 = arith.constant 0 : i32
    return %c0_i32, %c0_i32_0 : i32, i32
  }
  func.func @transform_32(%arg0: i32) -> (i32, i32, i32) {
    %c0_i32 = arith.constant 0 : i32
    %c0_i32_0 = arith.constant 0 : i32
    %c0_i32_1 = arith.constant 0 : i32
    return %arg0, %c0_i32, %c0_i32_0 : i32, i32, i32
  }
}

</mosaic_0001>

<bundles_post_ra>
// kernel: forward.1
= control target key start
LH: loop header
LB: loop body
LE: loop exit
PB: predicated region body
PF: predicated region fallthrough
CT: control target
= control target key end

     0   :  { %s10580_s6 = smov 1   ;;  %s10581_s10 = smov 2   ;;  %s12947_s0 = inlined_call_operand.smem [shape: u32[33], index: -1, kind: input, shape index: {}] }
   0x1   :  { %s10628_s5 = sld [smem:[%s12947_s0]]   ;;  %s10582_s14 = smov 3  }
   0x2   :  { %s10633_s9 = sld [smem:[%s12947_s0 + %s10580_s6]]   ;;  %s10583_s18 = smov 4  }
   0x3   :  { %s10638_s13 = sld [smem:[%s12947_s0 + %s10581_s10]]   ;;  %s10584_s22 = smov 5  }
   0x4   :  { %s10643_s17 = sld [smem:[%s12947_s0 + %s10582_s14]]   ;;  %s10585_s26 = smov 6  }
   0x5   :  { %s10648_s21 = sld [smem:[%s12947_s0 + %s10583_s18]]   ;;  %s10586_s30 = smov 7  }
   0x6   :  { %s10653_s25 = sld [smem:[%s12947_s0 + %s10584_s22]]   ;;  %s10587_s4 = smov 8  }
   0x7   :  { %s10658_s29 = sld [smem:[%s12947_s0 + %s10585_s26]]   ;;  %s10588_s10 = smov 9  }
   0x8   :  { %s10663_s3 = sld [smem:[%s12947_s0 + %s10586_s30]]   ;;  %s10589_s15 = smov 10  }
   0x9   :  { %s10668_s8 = sld [smem:[%s12947_s0 + %s10587_s4]]   ;;  %s10590_s20 = smov 11  }
   0xa   :  { %s10673_s14 = sld [smem:[%s12947_s0 + %s10588_s10]]   ;;  %s10591_s26 = smov 12  }
   0xb   :  { %s10678_s19 = sld [smem:[%s12947_s0 + %s10589_s15]]   ;;  %s10592_s1 = smov 13  }
   0xc   :  { %s10683_s24 = sld [smem:[%s12947_s0 + %s10590_s20]]   ;;  %s10593_s7 = smov 14  }
   0xd   :  { %s10688_s30 = sld [smem:[%s12947_s0 + %s10591_s26]]   ;;  %s10594_s15 = smov 15  }
   0xe   :  { %12985 = sst [smem:[#allocation3_spill]] %s10663_s3  ;;  %s10595_s22 = smov 16  }
   0xf   :  { %s10693_s6 = sld [smem:[%s12947_s0 + %s10592_s1]]   ;;  %s10596_s28 = smov 17  }
  0x10   :  { %s10698_s12 = sld [smem:[%s12947_s0 + %s10593_s7]]   ;;  %s10597_s7 = smov 18  }
  0x11   :  { %s10703_s20 = sld [smem:[%s12947_s0 + %s10594_s15]]   ;;  %s10598_s15 = smov 19  }
  0x12   :  { %s10708_s27 = sld [smem:[%s12947_s0 + %s10595_s22]]   ;;  %s10599_s22 = smov 20  }
  0x13   :  { %s10713_s4 = sld [smem:[%s12947_s0 + %s10596_s28]]   ;;  %s10600_s28 = smov 21  }
  0x14   :  { %s10609_s10 = smov 30   ;;  %s10610_s16 = smov 31  }
  0x15   :  { %s10611_s23 = smov 32  }
  0x16   :  { %12986 = sst [smem:[#allocation4_spill]] %s10698_s12 }
  0x17   :  { %12987 = sst [smem:[#allocation5_spill]] %s10703_s20 }
  0x18   :  { %12988 = sst [smem:[#allocation6_spill]] %s10708_s27 }
  0x19   :  { %12989 = sst [smem:[#allocation7_spill]] %s10713_s4 }
  0x1a   :  { %s10718_s12 = sld [smem:[%s12947_s0 + %s10597_s7]]   ;;  %s10601_s7 = smov 22  }
  0x1b   :  { %s10723_s20 = sld [smem:[%s12947_s0 + %s10598_s15]]   ;;  %s10602_s15 = smov 23  }
  0x1c   :  { %s10728_s27 = sld [smem:[%s12947_s0 + %s10599_s22]]   ;;  %s10603_s22 = smov 24  }
  0x1d   :  { %s10733_s4 = sld [smem:[%s12947_s0 + %s10600_s28]]   ;;  %s10604_s28 = smov 25  }
  0x20   :  { %12990 = sst [smem:[#allocation8_spill]] %s10718_s12 }
  0x21   :  { %12991 = sst [smem:[#allocation9_spill]] %s10723_s20 }
  0x22   :  { %12992 = sst [smem:[#allocation10_spill]] %s10728_s27 }
  0x23   :  { %12993 = sst [smem:[#allocation11_spill]] %s10733_s4 }
  0x24   :  { %s10738_s12 = sld [smem:[%s12947_s0 + %s10601_s7]]   ;;  %s10605_s7 = smov 26  }
  0x25   :  { %s10743_s20 = sld [smem:[%s12947_s0 + %s10602_s15]]   ;;  %s10606_s15 = smov 27  }
  0x26   :  { %s10748_s27 = sld [smem:[%s12947_s0 + %s10603_s22]]   ;;  %s10607_s22 = smov 28  }
  0x27   :  { %s10753_s4 = sld [smem:[%s12947_s0 + %s10604_s28]]   ;;  %s10608_s28 = smov 29  }
  0x2a   :  { %12994 = sst [smem:[#allocation12_spill]] %s10738_s12 }
  0x2b   :  { %12995 = sst [smem:[#allocation13_spill]] %s10743_s20 }
  0x2c   :  { %12996 = sst [smem:[#allocation14_spill]] %s10748_s27 }
  0x2d   :  { %12997 = sst [smem:[#allocation15_spill]] %s10753_s4 }
  0x2e   :  { %s10758_s12 = sld [smem:[%s12947_s0 + %s10605_s7]]  }
  0x2f   :  { %s10763_s20 = sld [smem:[%s12947_s0 + %s10606_s15]]  }
  0x30   :  { %s10768_s27 = sld [smem:[%s12947_s0 + %s10607_s22]]  }
  0x31   :  { %s7962_s4 = sld [smem:[%s12947_s0 + %s10608_s28]]   ;;  %s10788_s28 = smov 0  }
  0x34   :  { %12998 = sst [smem:[#allocation16_spill]] %s10758_s12 }
  0x35   :  { %12999 = sst [smem:[#allocation17_spill]] %s10763_s20 }
  0x36   :  { %13000 = sst [smem:[#allocation18_spill]] %s10768_s27 }
  0x37   :  { %s10776_s12 = sld [smem:[%s12947_s0 + %s10609_s10]]   ;;  %v70_v0 = vstv %s7962_s4 }
  0x38   :  { %s10781_s20 = sld [smem:[%s12947_s0 + %s10610_s16]]   ;;  %71 = vst [vmem:[#allocation2] sm:$0x1] %v70_v0 }
  0x39   :  { %s10786_s27 = sld [smem:[%s12947_s0 + %s10611_s23]]  }
  0x3a LB: > { %s13001_s3 = sld [smem:[#allocation3_spill]]  ;;  %s7966_s1 = sadd.s32 4294967295, %s10578_s28   ;;  %s10578_s28 = sphi %s10788_s28, %s77_s28  }
  0x3b   : > { %p7970_p0 = scmp.ge.s32.totalorder %s10578_s28, 1  ;;  %p896_p1 = scmp.lt.s32.totalorder %s10578_s28, 3 }
  0x3d   : > { %p897_p2 = pnand %p7970_p0, %p896_p1 }
  0x3f   : > { %900 = sbr.rel (%p897_p2) target bundleno = 4693 (0x1255), region = 148 }
  0x46   : > { %v7974_v1 = vld [vmem:[%s10633_s9 + $0x88] sm:$0xff]  ;;  %v7973_v2 = vld [vmem:[%s10633_s9 + $0x80] sm:$0xff]  ;;  %v10612_v3 = vmov 0   ;;  %v7991_v6 = vld [vmem:[%s10633_s9 + $0x110] sm:$0xff]  ;;  %p976_p3 = scmp.lt.s32.totalorder %s7966_s1, 1  ;;  %v12963_v53 = vlaneseq  ;;  %s12980_s2 = smov 127  }
  0x47   : > { %10231 = vset.pattern.permute.xlu1 %v10612_v3  ;;  %10230 = vset.pattern.permute.xlu0 %v10612_v3  ;;  %v7990_v4 = vld [vmem:[%s10633_s9 + $0x108] sm:$0xff]  ;;  %v7989_v5 = vld [vmem:[%s10633_s9 + $0x100] sm:$0xff]  ;;  %v7975_v7 = vld [vmem:[%s10633_s9 + $0x90] sm:$0xff]  ;;  %s12978_s10 = smov 126   ;;  %vm1333_vm0 = vcmask 1039360   ;;  %vm1607_vm1 = vcmask 1031168  }
  0x48   : > { %1127 = vperm.xlu1 %10231, %v7974_v1   ;;  %1122 = vperm.xlu0 %10230, %v7973_v2   ;;  %v7992_v8 = vld [vmem:[%s10633_s9 + $0x118] sm:$0xff]  ;;  %v7993_v10 = vld [vmem:[%s10633_s9 + $0x120] sm:$0xff]  ;;  %v7994_v12 = vld [vmem:[%s10633_s9 + $0x128] sm:$0xff]  ;;  %s13075_s1 = smov (!%p976_p3, %s7966_s1), 1  ;;  %v10855_v54 = vshrl.u32 %v12963_v53, 7  ;;  %s10615_s7 = smov 1  }
  0x49   : > { %v7976_v9 = vld [vmem:[%s10633_s9 + $0x98] sm:$0xff]  ;;  %v7977_v11 = vld [vmem:[%s10633_s9 + $0xa0] sm:$0xff]  ;;  %v7978_v13 = vld [vmem:[%s10633_s9 + $0xa8] sm:$0xff]  ;;  %s12975_s0 = sshll.u32 %s13075_s1, 1  ;;  %vm2072_vm2 = vcmask 7168   ;;  %vm2346_vm3 = vcmask 1040384  }
  0x4a   : > { %v7995_v14 = vld [vmem:[%s10633_s9 + $0x130] sm:$0xff]  ;;  %v7996_v16 = vld [vmem:[%s10633_s9 + $0x138] sm:$0xff]  ;;  %v7997_v18 = vld [vmem:[%s10633_s9 + $0x140] sm:$0xff]  ;;  %13002 = vst [vmem:[#allocation19_spill] sm:$0xff] %v10855_v54  ;;  %s979_s4 = scalar_lea.vmem %s10628_s5, %s12975_s0  ;;  %v12964_v55 = vsub.s32 0, %v10855_v54  ;;  %v1202_v56 = vsub.s32 1, %v10855_v54 }
  0x4b   : > { %v7979_v15 = vld [vmem:[%s10633_s9 + $0xb0] sm:$0xff]  ;;  %v7980_v17 = vld [vmem:[%s10633_s9 + $0xb8] sm:$0xff]  ;;  %v7981_v19 = vld [vmem:[%s10633_s9 + $0xc0] sm:$0xff]  ;;  %vm3694_vm4 = vcmask 1041408   ;;  %vm3540_vm5 = vcmask 539648   ;;  %s13009_s11 = sld [smem:[#allocation4_spill]] }
  0x4c   : > { %1406 = vperm.xlu1 %10231, %v7990_v4   ;;  %1401 = vperm.xlu0 %10230, %v7989_v5   ;;  %v7998_v20 = vld [vmem:[%s10633_s9 + $0x148] sm:$0xff]  ;;  %v7999_v22 = vld [vmem:[%s10633_s9 + $0x150] sm:$0xff]  ;;  %v8000_v24 = vld [vmem:[%s10633_s9 + $0x158] sm:$0xff]  ;;  %s13010_s16 = sld [smem:[#allocation5_spill]]  ;;  %vm4336_vm6 = vcmask 277504   ;;  %s13011_s15 = sld [smem:[#allocation6_spill]] }
  0x4d   : > { %v7982_v21 = vld [vmem:[%s10633_s9 + $0xc8] sm:$0xff]  ;;  %v7983_v23 = vld [vmem:[%s10633_s9 + $0xd0] sm:$0xff]  ;;  %v7984_v25 = vld [vmem:[%s10633_s9 + $0xd8] sm:$0xff]  ;;  %s13012_s18 = sld [smem:[#allocation7_spill]]  ;;  %vm4595_vm7 = vcmask 261120   ;;  %s13013_s23 = sld [smem:[#allocation8_spill]] }
  0x4e   : > { %v8001_v26 = vld [vmem:[%s10633_s9 + $0x160] sm:$0xff]  ;;  %v8002_v28 = vld [vmem:[%s10633_s9 + $0x168] sm:$0xff]  ;;  %v8003_v30 = vld [vmem:[%s10633_s9 + $0x170] sm:$0xff]  ;;  %s13014_s22 = sld [smem:[#allocation9_spill]]  ;;  %s13015_s26 = sld [smem:[#allocation11_spill]]  ;;  %vm5530_vm8 = vcmask 138240  }
  0x4f   : > { %v7985_v27 = vld [vmem:[%s10633_s9 + $0xe0] sm:$0xff]  ;;  %v7986_v29 = vld [vmem:[%s10633_s9 + $0xe8] sm:$0xff]  ;;  %v7987_v31 = vld [vmem:[%s10633_s9 + $0xf0] sm:$0xff]  ;;  %s13040_s0 = sld [smem:[#allocation13_spill]]  ;;  %vm10618_vm9 = vmmov 0   ;;  %vm7700_vm10 = vcmask 1043456  }
  0x50   : > { %1411 = vperm.xlu1 %10231, %v7991_v6   ;;  %1132 = vperm.xlu0 %10230, %v7975_v7   ;;  %v7988_v32 = vld [vmem:[%s10633_s9 + $0xf8] sm:$0xff]  ;;  %v985_v33 = vld [vmem:[%s10633_s9] sm:$0xff]  ;;  %v986_v34 = vld [vmem:[%s10633_s9 + $0x8] sm:$0xff]  ;;  %vm7696_vm11 = vcmask 556032  }
  0x51   : > { %v8004_v35 = vld [vmem:[%s10633_s9 + $0x178] sm:$0xff]  ;;  %v987_v36 = vld [vmem:[%s10633_s9 + $0x10] sm:$0xff]  ;;  %v1656_v37 = vld [vmem:[%s10638_s13] sm:$0xff] }
  0x52   : > { %v1784_v38 = vld [vmem:[%s10643_s17] sm:$0xff]  ;;  %v1657_v39 = vld [vmem:[%s10638_s13 + $0x8] sm:$0xff]  ;;  %v988_v41 = vld [vmem:[%s10633_s9 + $0x18] sm:$0xff] }
  0x53   : > { %v1896_v40 = vld [vmem:[%s10648_s21] sm:$0xff]  ;;  %v1785_v42 = vld [vmem:[%s10643_s17 + $0x8] sm:$0xff]  ;;  %v1658_v43 = vld [vmem:[%s10638_s13 + $0x10] sm:$0xff] }
  0x54   : > { %1416 = vperm.xlu1 %10231, %v7992_v8   ;;  %1137 = vperm.xlu0 %10230, %v7976_v9   ;;  %v1897_v44 = vld [vmem:[%s10648_s21 + $0x8] sm:$0xff]  ;;  %v989_v45 = vld [vmem:[%s10633_s9 + $0x20] sm:$0xff]  ;;  %v1786_v46 = vld [vmem:[%s10643_s17 + $0x10] sm:$0xff] }
  0x55   : > { %v1659_v47 = vld [vmem:[%s10638_s13 + $0x18] sm:$0xff]  ;;  %v1898_v48 = vld [vmem:[%s10648_s21 + $0x10] sm:$0xff]  ;;  %v990_v49 = vld [vmem:[%s10633_s9 + $0x28] sm:$0xff] }
  0x56   : > { %v1787_v50 = vld [vmem:[%s10643_s17 + $0x18] sm:$0xff]  ;;  %v1660_v51 = vld [vmem:[%s10638_s13 + $0x20] sm:$0xff]  ;;  %v991_v52 = vld [vmem:[%s10633_s9 + $0x30] sm:$0xff] }
  0x57   : > { %v984_v57 = vld [vmem:[%s979_s4] sm:$0x3]  ;;  %s13016_s4 = sld [smem:[#allocation10_spill]] }
  0x58   : > { %1421 = vperm.xlu1 %10231, %v7993_v10   ;;  %1142 = vperm.xlu0 %10230, %v7977_v11   ;;  %v10864_v58 = vrot.slane %v984_v57, %v12964_v55  ;;  %v10866_v59 = vrot.slane %v984_v57, %v1202_v56  ;;  %v1662_v57 = vld [vmem:[%s10638_s13 + $0x30] sm:$0xff] }
  0x5c   : > { %1426 = vperm.xlu1 %10231, %v7994_v12   ;;  %1147 = vperm.xlu0 %10230, %v7978_v13  }
  0x60   : > { %1431 = vperm.xlu1 %10231, %v7995_v14   ;;  %1152 = vperm.xlu0 %10230, %v7979_v15  }
  0x64   : > { %1436 = vperm.xlu1 %10231, %v7996_v16   ;;  %1157 = vperm.xlu0 %10230, %v7980_v17  }
  0x68   : > { %1441 = vperm.xlu1 %10231, %v7997_v18   ;;  %1162 = vperm.xlu0 %10230, %v7981_v19  }
  0x6c   : > { %1446 = vperm.xlu1 %10231, %v7998_v20   ;;  %1167 = vperm.xlu0 %10230, %v7982_v21  }
  0x70   : > { %1451 = vperm.xlu1 %10231, %v7999_v22   ;;  %1172 = vperm.xlu0 %10230, %v7983_v23  }
  0x74   : > { %1456 = vperm.xlu1 %10231, %v8000_v24   ;;  %1177 = vperm.xlu0 %10230, %v7984_v25  }
  0x78   : > { %1461 = vperm.xlu1 %10231, %v8001_v26   ;;  %1182 = vperm.xlu0 %10230, %v7985_v27  }
  0x7c   : > { %1466 = vperm.xlu1 %10231, %v8002_v28   ;;  %1187 = vperm.xlu0 %10230, %v7986_v29  }
  0x80   : > { %1471 = vperm.xlu1 %10231, %v8003_v30   ;;  %1192 = vperm.xlu0 %10230, %v7987_v31  }
  0x84   : > { %1197 = vperm.xlu1 %10231, %v7988_v32   ;;  %1003 = vperm.xlu0 %10230, %v985_v33  }
  0x88   : > { %1008 = vperm.xlu1 %10231, %v986_v34   ;;  %1476 = vperm.xlu0 %10230, %v8004_v35   ;;  %v1899_v34 = vld [vmem:[%s10648_s21 + $0x18] sm:$0xff] }
  0x8c   : > { %1013 = vperm.xlu1 %10231, %v987_v36   ;;  %1674 = vperm.xlu0 %10230, %v1656_v37  }
  0x90   : > { %1802 = vperm.xlu1 %10231, %v1784_v38   ;;  %1679 = vperm.xlu0 %10230, %v1657_v39   ;;  %v1661_v38 = vld [vmem:[%s10638_s13 + $0x28] sm:$0xff] }
  0x94   : > { %1914 = vperm.xlu1 %10231, %v1896_v40   ;;  %1018 = vperm.xlu0 %10230, %v988_v41  }
  0x98   : > { %1807 = vperm.xlu1 %10231, %v1785_v42   ;;  %1684 = vperm.xlu0 %10230, %v1658_v43   ;;  %v1788_v42 = vld [vmem:[%s10643_s17 + $0x20] sm:$0xff]  ;;  %v992_v43 = vld [vmem:[%s10633_s9 + $0x38] sm:$0xff] }
  0x9c   : > { %1919 = vperm.xlu1 %10231, %v1897_v44   ;;  %1023 = vperm.xlu0 %10230, %v989_v45  }
  0xa0   : > { %1812 = vperm.xlu1 %10231, %v1786_v46   ;;  %1689 = vperm.xlu0 %10230, %v1659_v47  }
  0xa4   : > { %1924 = vperm.xlu1 %10231, %v1898_v48   ;;  %1028 = vperm.xlu0 %10230, %v990_v49  }
  0xa8   : > { %1817 = vperm.xlu1 %10231, %v1787_v50   ;;  %1694 = vperm.xlu0 %10230, %v1660_v51   ;;  %v1900_v50 = vld [vmem:[%s10648_s21 + $0x20] sm:$0xff] }
  0xac   : > { %1033 = vperm.xlu0 %10230, %v991_v52  }
  0xc7   : > { %v1128_v60 = vpop.permute.xlu1 %1127  ;;  %v1123_v61 = vpop.permute.xlu0 %1122 }
  0xc8   : > { %v1205_v62 = vmul.f32 %v1123_v61, %v10864_v58  ;;  %v1206_v63 = vmul.f32 %v10866_v59, %v1123_v61  ;;  %v1207_v4 = vmul.f32 %v1128_v60, %v10864_v58  ;;  %v1208_v5 = vmul.f32 %v10866_v59, %v1128_v60 }
  0xca   : > { %1271 = vrot.lane.b32.xlu1 %v1206_v63, %s12980_s2  ;;  %1269 = vrot.lane.b32.xlu0 %v1205_v62, %s12980_s2  ;;  %v1789_v63 = vld [vmem:[%s10643_s17 + $0x28] sm:$0xff] }
  0xcb   : > { %v1407_v0 = vpop.permute.xlu1 %1406  ;;  %v1402_v1 = vpop.permute.xlu0 %1401 }
  0xcc   : > { %v1479_v2 = vmul.f32 %v1402_v1, %v10864_v58  ;;  %v1480_v3 = vmul.f32 %v1402_v1, %v10866_v59  ;;  %v1481_v10 = vmul.f32 %v1407_v0, %v10864_v58  ;;  %v1482_v11 = vmul.f32 %v1407_v0, %v10866_v59  ;;  %v993_v0 = vld [vmem:[%s10633_s9 + $0x40] sm:$0xff] }
  0xce   : > { %1545 = vrot.lane.b32.xlu1 %v1480_v3, %s12978_s10  ;;  %1543 = vrot.lane.b32.xlu0 %v1479_v2, %s12978_s10 }
  0xcf   : > { %v1412_v6 = vpop.permute.xlu1 %1411  ;;  %v1133_v7 = vpop.permute.xlu0 %1132 }
  0xd0   : > { %v1209_v14 = vmul.f32 %v1133_v7, %v10864_v58  ;;  %v1210_v15 = vmul.f32 %v10866_v59, %v1133_v7  ;;  %v1483_v18 = vmul.f32 %v1412_v6, %v10864_v58  ;;  %v1484_v19 = vmul.f32 %v1412_v6, %v10866_v59  ;;  %v1901_v6 = vld [vmem:[%s10648_s21 + $0x28] sm:$0xff] }
  0xd2   : > { %1273 = vrot.lane.b32.xlu1 %v1207_v4, %s12980_s2  ;;  %1275 = vrot.lane.b32.xlu0 %v1208_v5, %s12980_s2 }
  0xd3   : > { %v1417_v8 = vpop.permute.xlu1 %1416  ;;  %v1138_v9 = vpop.permute.xlu0 %1137 }
  0xd4   : > { %v1211_v22 = vmul.f32 %v1138_v9, %v10864_v58  ;;  %v1212_v23 = vmul.f32 %v10866_v59, %v1138_v9  ;;  %v1485_v26 = vmul.f32 %v1417_v8, %v10864_v58  ;;  %v1486_v27 = vmul.f32 %v1417_v8, %v10866_v59 }
  0xd6   : > { %1549 = vrot.lane.b32.xlu1 %v1482_v11, %s12978_s10  ;;  %1547 = vrot.lane.b32.xlu0 %v1481_v10, %s12978_s10  ;;  %v1663_v10 = vld [vmem:[%s10638_s13 + $0x38] sm:$0xff] }
  0xd7   : > { %v1422_v12 = vpop.permute.xlu1 %1421  ;;  %v1143_v13 = vpop.permute.xlu0 %1142 }
  0xd8   : > { %v1213_v30 = vmul.f32 %v1143_v13, %v10864_v58  ;;  %v1214_v31 = vmul.f32 %v10866_v59, %v1143_v13  ;;  %v1487_v35 = vmul.f32 %v1422_v12, %v10864_v58  ;;  %v1488_v39 = vmul.f32 %v1422_v12, %v10866_v59  ;;  %v1790_v12 = vld [vmem:[%s10643_s17 + $0x30] sm:$0xff]  ;;  %v994_v13 = vld [vmem:[%s10633_s9 + $0x48] sm:$0xff] }
  0xda   : > { %1277 = vrot.lane.b32.xlu1 %v1209_v14, %s12980_s2  ;;  %1279 = vrot.lane.b32.xlu0 %v1210_v15, %s12980_s2 }
  0xdb   : > { %v1427_v16 = vpop.permute.xlu1 %1426  ;;  %v1148_v17 = vpop.permute.xlu0 %1147 }
  0xdc   : > { %v1215_v46 = vmul.f32 %v1148_v17, %v10864_v58  ;;  %v1216_v47 = vmul.f32 %v10866_v59, %v1148_v17  ;;  %v1489_v51 = vmul.f32 %v1427_v16, %v10864_v58  ;;  %v1490_v60 = vmul.f32 %v1427_v16, %v10866_v59 }
  0xde   : > { %1553 = vrot.lane.b32.xlu1 %v1484_v19, %s12978_s10  ;;  %1551 = vrot.lane.b32.xlu0 %v1483_v18, %s12978_s10 }
  0xdf   : > { %v10892_v20 = vpop.permute.xlu1 %1431  ;;  %v1153_v21 = vpop.permute.xlu0 %1152 }
  0xe0   : > { %v1217_v2 = vmul.f32 %v1153_v21, %v10864_v58  ;;  %v1218_v3 = vmul.f32 %v10866_v59, %v1153_v21  ;;  %v1491_v7 = vmul.f32 %v10892_v20, %v10864_v58  ;;  %v1492_v11 = vmul.f32 %v10892_v20, %v10866_v59  ;;  %v1902_v20 = vld [vmem:[%s10648_s21 + $0x30] sm:$0xff] }
  0xe2   : > { %1281 = vrot.lane.b32.xlu1 %v1211_v22, %s12980_s2  ;;  %1283 = vrot.lane.b32.xlu0 %v1212_v23, %s12980_s2  ;;  %v1664_v22 = vld [vmem:[%s10638_s13 + $0x40] sm:$0xff] }
  0xe3   : > { %v10898_v24 = vpop.permute.xlu1 %1436  ;;  %v10900_v25 = vpop.permute.xlu0 %1157 }
  0xe4   : > { %v1219_v16 = vmul.f32 %v10900_v25, %v10864_v58  ;;  %v1220_v17 = vmul.f32 %v10866_v59, %v10900_v25  ;;  %v1493_v21 = vmul.f32 %v10898_v24, %v10864_v58  ;;  %v1494_v23 = vmul.f32 %v10898_v24, %v10866_v59 }
  0xe6   : > { %1557 = vrot.lane.b32.xlu1 %v1486_v27, %s12978_s10  ;;  %1555 = vrot.lane.b32.xlu0 %v1485_v26, %s12978_s10  ;;  %v1791_v27 = vld [vmem:[%s10643_s17 + $0x38] sm:$0xff] }
  0xe7   : > { %v10906_v28 = vpop.permute.xlu1 %1441  ;;  %v10908_v29 = vpop.permute.xlu0 %1162 }
  0xe8   : > { %v1222_v24 = vmul.f32 %v10866_v59, %v10908_v29 }
  0xea   : > { %1285 = vrot.lane.b32.xlu1 %v1213_v30, %s12980_s2  ;;  %1287 = vrot.lane.b32.xlu0 %v1214_v31, %s12980_s2  ;;  %v995_v30 = vld [vmem:[%s10633_s9 + $0x50] sm:$0xff] }
  0xeb   : > { %v10914_v32 = vpop.permute.xlu1 %1446  ;;  %v10916_v33 = vpop.permute.xlu0 %1167 }
  0xee   : > { %1929 = vperm.xlu1 %10231, %v1899_v34   ;;  %1559 = vrot.lane.b32.xlu0 %v1487_v35, %s12978_s10  ;;  %v1221_v35 = vmul.f32 %v10908_v29, %v10864_v58  ;;  %v1496_v29 = vmul.f32 %v10906_v28, %v10866_v59 }
  0xef   : > { %v10921_v36 = vpop.permute.xlu1 %1451  ;;  %v10923_v37 = vpop.permute.xlu0 %1172 }
  0xf2   : > { %1561 = vrot.lane.b32.xlu1 %v1488_v39, %s12978_s10  ;;  %1699 = vperm.xlu0 %10230, %v1661_v38   ;;  %v1903_v38 = vld [vmem:[%s10648_s21 + $0x38] sm:$0xff]  ;;  %v1495_v39 = vmul.f32 %v10906_v28, %v10864_v58 }
  0xf3   : > { %v10928_v40 = vpop.permute.xlu1 %1456  ;;  %v10930_v41 = vpop.permute.xlu0 %1177 }
  0xf6   : > { %1822 = vperm.xlu1 %10231, %v1788_v42   ;;  %1038 = vperm.xlu0 %10230, %v992_v43  }
  0xf7   : > { %v10934_v44 = vpop.permute.xlu1 %1461  ;;  %v10936_v45 = vpop.permute.xlu0 %1182 }
  0xfa   : > { %1289 = vrot.lane.b32.xlu1 %v1215_v46, %s12980_s2  ;;  %1291 = vrot.lane.b32.xlu0 %v1216_v47, %s12980_s2  ;;  %v1665_v46 = vld [vmem:[%s10638_s13 + $0x48] sm:$0xff] }
  0xfb   : > { %v10942_v48 = vpop.permute.xlu1 %1466  ;;  %v10944_v49 = vpop.permute.xlu0 %1187 }
  0xfe   : > { %1934 = vperm.xlu1 %10231, %v1900_v50   ;;  %1563 = vrot.lane.b32.xlu0 %v1489_v51, %s12978_s10  ;;  %v1792_v51 = vld [vmem:[%s10643_s17 + $0x40] sm:$0xff] }
  0xff   : > { %v10949_v52 = vpop.permute.xlu1 %1471  ;;  %v10951_v56 = vpop.permute.xlu0 %1192 }
 0x100   : > { %v1233_v53 = vmul.f32 %v10951_v56, %v10864_v58 }
 0x102   : > { %1565 = vrot.lane.b32.xlu1 %v1490_v60, %s12978_s10  ;;  %1704 = vperm.xlu0 %10230, %v1662_v57   ;;  %v996_v57 = vld [vmem:[%s10633_s9 + $0x58] sm:$0xff]  ;;  %v1223_v60 = vmul.f32 %v10916_v33, %v10864_v58 }
 0x103   : > { %v10956_v61 = vpop.permute.xlu1 %1197  ;;  %v10958_v62 = vpop.permute.xlu0 %1003 }
 0x106   : > { %1827 = vperm.xlu1 %10231, %v1789_v63   ;;  %1043 = vperm.xlu0 %10230, %v993_v0   ;;  %v1224_v63 = vmul.f32 %v10866_v59, %v10916_v33  ;;  %v1666_v33 = vld [vmem:[%s10638_s13 + $0x50] sm:$0xff] }
 0x107   : > { %v10962_v1 = vpop.permute.xlu0 %1476  ;;  %v10966_v4 = vpop.permute.xlu1 %1008 }
 0x10a   : > { %1293 = vrot.lane.b32.xlu1 %v1217_v2, %s12980_s2  ;;  %1295 = vrot.lane.b32.xlu0 %v1218_v3, %s12980_s2  ;;  %v1904_v2 = vld [vmem:[%s10648_s21 + $0x40] sm:$0xff]  ;;  %v1497_v3 = vmul.f32 %v10914_v32, %v10864_v58 }
 0x10b   : > { %v10970_v5 = vpop.permute.xlu0 %1674  ;;  %v10975_v8 = vpop.permute.xlu1 %1013 }
 0x10e   : > { %1939 = vperm.xlu1 %10231, %v1901_v6   ;;  %1567 = vrot.lane.b32.xlu0 %v1491_v7, %s12978_s10 }
 0x10f   : > { %v10978_v9 = vpop.permute.xlu0 %1679  ;;  %v10986_v14 = vpop.permute.xlu1 %1802 }
 0x112   : > { %1569 = vrot.lane.b32.xlu1 %v1492_v11, %s12978_s10  ;;  %1709 = vperm.xlu0 %10230, %v1663_v10   ;;  %v1498_v10 = vmul.f32 %v10914_v32, %v10866_v59  ;;  %v1225_v32 = vmul.f32 %v10923_v37, %v10864_v58 }
 0x113   : > { %v10988_v15 = vpop.permute.xlu0 %1018  ;;  %v10994_v18 = vpop.permute.xlu1 %1914 }
 0x116   : > { %1832 = vperm.xlu1 %10231, %v1790_v12   ;;  %1048 = vperm.xlu0 %10230, %v994_v13   ;;  %v1793_v13 = vld [vmem:[%s10643_s17 + $0x48] sm:$0xff] }
 0x117   : > { %v10996_v19 = vpop.permute.xlu0 %1684  ;;  %v11007_v25 = vpop.permute.xlu1 %1807 }
 0x11a   : > { %1297 = vrot.lane.b32.xlu1 %v1219_v16, %s12980_s2  ;;  %1299 = vrot.lane.b32.xlu0 %v1220_v17, %s12980_s2  ;;  %v997_v16 = vld [vmem:[%s10633_s9 + $0x60] sm:$0xff] }
 0x11b   : > { %v11009_v26 = vpop.permute.xlu0 %1023  ;;  %v11014_v31 = vpop.permute.xlu1 %1919 }
 0x11e   : > { %1944 = vperm.xlu1 %10231, %v1902_v20   ;;  %1571 = vrot.lane.b32.xlu0 %v1493_v21, %s12978_s10  ;;  %v1226_v21 = vmul.f32 %v10866_v59, %v10923_v37  ;;  %v1500_v37 = vmul.f32 %v10921_v36, %v10866_v59 }
 0x11f   : > { %v11016_v34 = vpop.permute.xlu0 %1689  ;;  %v11027_v42 = vpop.permute.xlu1 %1812 }
 0x122   : > { %1573 = vrot.lane.b32.xlu1 %v1494_v23, %s12978_s10  ;;  %1714 = vperm.xlu0 %10230, %v1664_v22  }
 0x123   : > { %v11029_v43 = vpop.permute.xlu0 %1028  ;;  %v11035_v47 = vpop.permute.xlu1 %1924 }
 0x126   : > { %1837 = vperm.xlu1 %10231, %v1791_v27   ;;  %1053 = vperm.xlu0 %10230, %v995_v30   ;;  %v1905_v27 = vld [vmem:[%s10648_s21 + $0x48] sm:$0xff]  ;;  %v1499_v30 = vmul.f32 %v10921_v36, %v10864_v58  ;;  %v1228_v36 = vmul.f32 %v10866_v59, %v10930_v41 }
 0x127   : > { %v11037_v50 = vpop.permute.xlu0 %1694  ;;  %v11046_v0 = vpop.permute.xlu1 %1817 }
 0x12a   : > { %1301 = vrot.lane.b32.xlu1 %v1221_v35, %s12980_s2  ;;  %1303 = vrot.lane.b32.xlu0 %v1222_v24, %s12980_s2  ;;  %v1667_v24 = vld [vmem:[%s10638_s13 + $0x58] sm:$0xff] }
 0x12b   : > { %v11048_v28 = vpop.permute.xlu0 %1033 }
 0x12e   : > { %1949 = vperm.xlu1 %10231, %v1903_v38   ;;  %1575 = vrot.lane.b32.xlu0 %v1495_v39, %s12978_s10  ;;  %v1794_v39 = vld [vmem:[%s10643_s17 + $0x50] sm:$0xff] }
 0x132   : > { %1577 = vrot.lane.b32.xlu1 %v1496_v29, %s12978_s10  ;;  %1719 = vperm.xlu0 %10230, %v1665_v46   ;;  %v998_v46 = vld [vmem:[%s10633_s9 + $0x68] sm:$0xff] }
 0x136   : > { %1842 = vperm.xlu1 %10231, %v1792_v51   ;;  %1058 = vperm.xlu0 %10230, %v996_v57   ;;  %v1227_v57 = vmul.f32 %v10930_v41, %v10864_v58  ;;  %v1502_v41 = vmul.f32 %v10928_v40, %v10866_v59 }
 0x13a   : > { %1305 = vrot.lane.b32.xlu1 %v1223_v60, %s12980_s2  ;;  %1307 = vrot.lane.b32.xlu0 %v1224_v63, %s12980_s2  ;;  %v1906_v63 = vld [vmem:[%s10648_s21 + $0x50] sm:$0xff] }
 0x13c   : > { %v11055_v6 = vpop.permute.xlu1 %1271  ;;  %v11057_v7 = vpop.permute.xlu0 %1269 }
 0x13e   : > { %1954 = vperm.xlu1 %10231, %v1904_v2   ;;  %1579 = vrot.lane.b32.xlu0 %v1497_v3, %s12978_s10  ;;  %v1501_v2 = vmul.f32 %v10928_v40, %v10864_v58  ;;  %v1230_v40 = vmul.f32 %v10866_v59, %v10936_v45 }
 0x140   : > { %v11063_v11 = vpop.permute.xlu1 %1545  ;;  %v11065_v12 = vpop.permute.xlu0 %1543 }
 0x142   : > { %1581 = vrot.lane.b32.xlu1 %v1498_v10, %s12978_s10  ;;  %1724 = vperm.xlu0 %10230, %v1666_v33   ;;  %v1668_v33 = vld [vmem:[%s10638_s13 + $0x60] sm:$0xff] }
 0x144   : > { %v11070_v17 = vpop.permute.xlu0 %1275  ;;  %v11072_v20 = vpop.permute.xlu1 %1273 }
 0x146   : > { %1847 = vperm.xlu1 %10231, %v1793_v13   ;;  %1063 = vperm.xlu0 %10230, %v997_v16   ;;  %v1795_v16 = vld [vmem:[%s10643_s17 + $0x58] sm:$0xff] }
 0x148   : > { %v11078_v22 = vpop.permute.xlu0 %1547  ;;  %v11082_v23 = vpop.permute.xlu1 %1549 }
 0x14a   : > { %1309 = vrot.lane.b32.xlu1 %v1225_v32, %s12980_s2  ;;  %1311 = vrot.lane.b32.xlu0 %v1226_v21, %s12980_s2  ;;  %v999_v32 = vld [vmem:[%s10633_s9 + $0x70] sm:$0xff] }
 0x14c   : > { %v11088_v35 = vpop.permute.xlu0 %1279  ;;  %v11093_v38 = vpop.permute.xlu1 %1277 }
 0x14e   : > { %1959 = vperm.xlu1 %10231, %v1905_v27   ;;  %1583 = vrot.lane.b32.xlu0 %v1499_v30, %s12978_s10  ;;  %v1229_v27 = vmul.f32 %v10936_v45, %v10864_v58  ;;  %v1669_v45 = vld [vmem:[%s10638_s13 + $0x68] sm:$0xff] }
 0x150   : > { %v11098_v29 = vpop.permute.xlu0 %1551  ;;  %v11100_v51 = vpop.permute.xlu1 %1553 }
 0x152   : > { %1585 = vrot.lane.b32.xlu1 %v1500_v37, %s12978_s10  ;;  %1729 = vperm.xlu0 %10230, %v1667_v24   ;;  %v1907_v24 = vld [vmem:[%s10648_s21 + $0x58] sm:$0xff]  ;;  %v1503_v37 = vmul.f32 %v10934_v44, %v10864_v58 }
 0x154   : > { %v11108_v60 = vpop.permute.xlu0 %1283  ;;  %v11113_v3 = vpop.permute.xlu1 %1281 }
 0x156   : > { %1852 = vperm.xlu1 %10231, %v1794_v39   ;;  %1068 = vperm.xlu0 %10230, %v998_v46  }
 0x158   : > { %v11119_v10 = vpop.permute.xlu0 %1555  ;;  %v11122_v13 = vpop.permute.xlu1 %1557 }
 0x15a   : > { %1313 = vrot.lane.b32.xlu1 %v1227_v57, %s12980_s2  ;;  %1315 = vrot.lane.b32.xlu0 %v1228_v36, %s12980_s2  ;;  %v1504_v57 = vmul.f32 %v10934_v44, %v10866_v59  ;;  %v1231_v44 = vmul.f32 %v10944_v49, %v10864_v58 }
 0x15c   : > { %v11126_v21 = vpop.permute.xlu0 %1287  ;;  %v11132_v30 = vpop.permute.xlu1 %1285 }
 0x15e   : > { %1964 = vperm.xlu1 %10231, %v1906_v63   ;;  %1587 = vrot.lane.b32.xlu0 %v1501_v2, %s12978_s10  ;;  %v1796_v2 = vld [vmem:[%s10643_s17 + $0x60] sm:$0xff] }
 0x160   : > { %v11139_v39 = vpop.permute.xlu0 %1559 }
 0x162   : > { %1589 = vrot.lane.b32.xlu1 %v1502_v41, %s12978_s10  ;;  %1734 = vperm.xlu0 %10230, %v1668_v33   ;;  %v1000_v33 = vld [vmem:[%s10633_s9 + $0x78] sm:$0xff] }
 0x166   : > { %1857 = vperm.xlu1 %10231, %v1795_v16   ;;  %1073 = vperm.xlu0 %10230, %v999_v32   ;;  %v1232_v32 = vmul.f32 %v10866_v59, %v10944_v49  ;;  %v1670_v49 = vld [vmem:[%s10638_s13 + $0x70] sm:$0xff] }
 0x16a   : > { %1317 = vrot.lane.b32.xlu1 %v1229_v27, %s12980_s2  ;;  %1319 = vrot.lane.b32.xlu0 %v1230_v40, %s12980_s2 }
 0x16d   : > { %v11141_v46 = vpop.permute.xlu1 %1929 }
 0x16e   : > { %1969 = vperm.xlu1 %10231, %v1907_v24   ;;  %1591 = vrot.lane.b32.xlu0 %v1503_v37, %s12978_s10  ;;  %v1908_v24 = vld [vmem:[%s10648_s21 + $0x60] sm:$0xff]  ;;  %v1505_v37 = vmul.f32 %v10942_v48, %v10864_v58 }
 0x171   : > { %v11147_v36 = vpop.permute.xlu1 %1561  ;;  %v11149_v63 = vpop.permute.xlu0 %1699 }
 0x172   : > { %1593 = vrot.lane.b32.xlu1 %v1504_v57, %s12978_s10  ;;  %1739 = vperm.xlu0 %10230, %v1669_v45  }
 0x175   : > { %v11154_v41 = vpop.permute.xlu1 %1822  ;;  %v11156_v16 = vpop.permute.xlu0 %1038 }
 0x176   : > { %1862 = vperm.xlu1 %10231, %v1796_v2   ;;  %1078 = vperm.xlu0 %10230, %v1000_v33   ;;  %v1506_v2 = vmul.f32 %v10942_v48, %v10866_v59  ;;  %v1909_v48 = vld [vmem:[%s10648_s21 + $0x68] sm:$0xff] }
 0x179   : > { %v11162_v27 = vpop.permute.xlu1 %1289  ;;  %v11164_v40 = vpop.permute.xlu0 %1291 }
 0x17a   : > { %1321 = vrot.lane.b32.xlu1 %v1231_v44, %s12980_s2  ;;  %1323 = vrot.lane.b32.xlu0 %v1232_v32, %s12980_s2  ;;  %v1797_v32 = vld [vmem:[%s10643_s17 + $0x68] sm:$0xff] }
 0x17d   : > { %v11171_v45 = vpop.permute.xlu1 %1934  ;;  %v11173_v57 = vpop.permute.xlu0 %1563 }
 0x17e   : > { %13003 = vst [vmem:[#allocation20_spill] sm:$0xff] %v11171_v45  ;;  %1974 = vperm.xlu1 %10231, %v1908_v24   ;;  %1595 = vrot.lane.b32.xlu0 %v1505_v37, %s12978_s10  ;;  %v1234_v37 = vmul.f32 %v10866_v59, %v10951_v56  ;;  %v1508_v56 = vmul.f32 %v10949_v52, %v10866_v59 }
 0x181   : > { %v11179_v33 = vpop.permute.xlu1 %1565  ;;  %v11181_v44 = vpop.permute.xlu0 %1704 }
 0x182   : > { %1597 = vrot.lane.b32.xlu1 %v1506_v2, %s12978_s10  ;;  %1744 = vperm.xlu0 %10230, %v1670_v49   ;;  %v1334_v49 = vsel %vm1333_vm0, %v11057_v7, %v11055_v6 }
 0x185   : > { %v11187_v55 = vpop.permute.xlu1 %1827  ;;  %v11189_v24 = vpop.permute.xlu0 %1043 }
 0x186   : > { %13004 = vst [vmem:[#allocation21_spill] sm:$0xff] %v11187_v55  ;;  %13005 = vst [vmem:[#allocation22_spill] sm:$0xff] %v11189_v24  ;;  %1867 = vperm.xlu1 %10231, %v1797_v32   ;;  %1325 = vrot.lane.b32.xlu0 %v1233_v53, %s12980_s2  ;;  %v1087_v53 = vmul.f32 %v10864_v58, %v10958_v62  ;;  %v1507_v32 = vmul.f32 %v10949_v52, %v10864_v58 }
 0x187   : > { %v1608_v24 = vsel %vm1607_vm1, %v11065_v12, %v11063_v11  ;;  %v1335_v62 = vsel %vm1333_vm0, %v11072_v20, %v11070_v17  ;;  %v1336_v52 = vsel %vm1333_vm0, %v11093_v38, %v11088_v35  ;;  %v1088_v11 = vmul.f32 %v10864_v58, %v10966_v4 }
 0x188   : > { %v1366_v55 = vadd.f32 %v1334_v49, %v1087_v53  ;;  %v1089_v12 = vmul.f32 %v10864_v58, %v10975_v8  ;;  %v1610_v17 = vsel %vm1607_vm1, %v11098_v29, %v11100_v51  ;;  %v1235_v4 = vmul.f32 %v10956_v61, %v10864_v58 }
 0x189   : > { %v1294_v54 = vpop.permute.xlu1 %1293  ;;  %v1296_v2 = vpop.permute.xlu0 %1295  ;;  %v1367_v35 = vadd.f32 %v1335_v62, %v1088_v11  ;;  %v1236_v8 = vmul.f32 %v10866_v59, %v10956_v61  ;;  %v1337_v29 = vsel %vm1333_vm0, %v11113_v3, %v11108_v60  ;;  %v1338_v51 = vsel %vm1333_vm0, %v11132_v30, %v11126_v21 }
 0x18a   : > { %1327 = vrot.lane.b32.xlu1 %v1234_v37, %s12980_s2  ;;  %1979 = vperm.xlu0 %10230, %v1909_v48   ;;  %v1640_v7 = vadd.f32 %v1608_v24, %v1366_v55  ;;  %v1671_v48 = vld [vmem:[%s10638_s13 + $0x78] sm:$0xff]  ;;  %v1798_v37 = vld [vmem:[%s10643_s17 + $0x70] sm:$0xff]  ;;  %v1609_v55 = vsel %vm1607_vm1, %v11078_v22, %v11082_v23  ;;  %v1368_v38 = vadd.f32 %v1336_v52, %v1089_v12 }
 0x18b   : > { %v1641_v22 = vadd.f32 %v1609_v55, %v1367_v35  ;;  %v1090_v53 = vmul.f32 %v10864_v58, %v10988_v15  ;;  %v1612_v60 = vsel %vm1607_vm1, %v11139_v39, %v11147_v36  ;;  %v1509_v30 = vmul.f32 %v10962_v1, %v10864_v58 }
 0x18c   : > { %v1752_v49 = vadd.f32 %v10970_v5, %v1640_v7  ;;  %v1642_v23 = vadd.f32 %v1610_v17, %v1368_v38  ;;  %v1339_v39 = vsel %vm1333_vm0, %v11162_v27, %v11164_v40  ;;  %v1340_v36 = vsel %vm1333_vm0, %v1294_v54, %v1296_v2  ;;  %v1799_v40 = vld [vmem:[%s10643_s17 + $0x78] sm:$0xff] }
 0x18d   : > { %v11208_v45 = vpop.permute.xlu1 %1939  ;;  %v1568_v6 = vpop.permute.xlu0 %1567  ;;  %v1369_v3 = vadd.f32 %v1337_v29, %v1090_v53  ;;  %v1753_v7 = vadd.f32 %v10978_v9, %v1641_v22  ;;  %v1093_v11 = vmul.f32 %v10864_v58, %v11048_v28  ;;  %v1510_v9 = vmul.f32 %v10962_v1, %v10866_v59 }
 0x18e   : > { %1599 = vrot.lane.b32.xlu1 %v1507_v32, %s12978_s10  ;;  %1601 = vrot.lane.b32.xlu0 %v1508_v56, %s12978_s10  ;;  %v1091_v32 = vmul.f32 %v10864_v58, %v11009_v26  ;;  %v1611_v56 = vsel %vm1607_vm1, %v11119_v10, %v11122_v13  ;;  %v1768_v15 = vmax.f32 %v1752_v49, 0.0  ;;  %v1910_v26 = vld [vmem:[%s10648_s21 + $0x70] sm:$0xff]  ;;  %v1754_v10 = vadd.f32 %v10996_v19, %v1642_v23 }
 0x18f   : > { %v1643_v13 = vadd.f32 %v1611_v56, %v1369_v3  ;;  %v1613_v54 = vsel %vm1607_vm1, %v11173_v57, %v11179_v33  ;;  %v1372_v28 = vadd.f32 %v1340_v36, %v1093_v11  ;;  %v1094_v57 = vmul.f32 %v10864_v58, %v11156_v16  ;;  %v1911_v33 = vld [vmem:[%s10648_s21 + $0x78] sm:$0xff]  ;;  %v13006_v3 = vld [vmem:[#allocation20_spill] sm:$0xff] }
 0x190   : > { %v1370_v21 = vadd.f32 %v1338_v51, %v1091_v32  ;;  %v1880_v19 = vmul.f32 %v10986_v14, %v1768_v15  ;;  %v1770_v2 = vmax.f32 %v1754_v10, 0.0 }
 0x191   : > { %v1570_v20 = vpop.permute.xlu1 %1569  ;;  %v11230_v24 = vpop.permute.xlu0 %1709  ;;  %v1755_v55 = vadd.f32 %v11016_v34, %v1643_v13 }
 0x192   : > { %1749 = vperm.xlu1 %10231, %v1671_v48   ;;  %1872 = vperm.xlu0 %10230, %v1798_v37   ;;  %v1644_v62 = vadd.f32 %v1612_v60, %v1370_v21  ;;  %v1092_v37 = vmul.f32 %v10864_v58, %v11029_v43  ;;  %v1614_v27 = vsel %vm1607_vm1, %v1568_v6, %v1570_v20  ;;  %v1769_v43 = vmax.f32 %v1753_v7, 0.0 }
 0x193   : > { %v1646_v14 = vadd.f32 %v1614_v27, %v1372_v28  ;;  %v1882_v20 = vmul.f32 %v11027_v42, %v1770_v2  ;;  %v1992_v34 = vadd.f32 %v10994_v18, %v1880_v19 }
 0x194   : > { %v1371_v12 = vadd.f32 %v1339_v39, %v1092_v37  ;;  %v1756_v17 = vadd.f32 %v11037_v50, %v1644_v62  ;;  %v1881_v6 = vmul.f32 %v11007_v25, %v1769_v43  ;;  %v1771_v50 = vmax.f32 %v1755_v55, 0.0  ;;  %v13008_v39 = vld [vmem:[#allocation22_spill] sm:$0xff] }
 0x195   : > { %v11247_v61 = vpop.permute.xlu1 %1832  ;;  %v11249_v5 = vpop.permute.xlu0 %1048  ;;  %v1758_v29 = vadd.f32 %v11181_v44, %v1646_v14  ;;  %v1994_v18 = vadd.f32 %v11035_v47, %v1882_v20 }
 0x196   : > { %1329 = vrot.lane.b32.xlu1 %v1235_v4, %s12980_s2  ;;  %1331 = vrot.lane.b32.xlu0 %v1236_v8, %s12980_s2  ;;  %v1645_v1 = vadd.f32 %v1613_v54, %v1371_v12  ;;  %v1772_v22 = vmax.f32 %v1756_v17, 0.0  ;;  %v1993_v42 = vadd.f32 %v11014_v31, %v1881_v6  ;;  %v1883_v16 = vmul.f32 %v11046_v0, %v1771_v50 }
 0x197   : > { %v1774_v60 = vmax.f32 %v1758_v29, 0.0 }
 0x198   : > { %v1757_v23 = vadd.f32 %v11149_v63, %v1645_v1  ;;  %v1884_v56 = vmul.f32 %v11154_v41, %v1772_v22  ;;  %v1995_v15 = vadd.f32 %v11141_v46, %v1883_v16 }
 0x199   : > { %v1298_v52 = vpop.permute.xlu1 %1297  ;;  %v1300_v48 = vpop.permute.xlu0 %1299 }
 0x19a   : > { %1984 = vperm.xlu1 %10231, %v1910_v26   ;;  %1603 = vrot.lane.b32.xlu0 %v1509_v30, %s12978_s10  ;;  %v1341_v38 = vsel %vm1333_vm0, %v1298_v52, %v1300_v48  ;;  %v1773_v63 = vmax.f32 %v1757_v23, 0.0  ;;  %v1996_v31 = vadd.f32 %v13006_v3, %v1884_v56  ;;  %v13007_v26 = vld [vmem:[#allocation21_spill] sm:$0xff]  ;;  %v1886_v30 = vmul.f32 %v11247_v61, %v1774_v60 }
 0x19b   : > { %v1373_v4 = vadd.f32 %v1341_v38, %v1094_v57  ;;  %v1095_v61 = vmul.f32 %v10864_v58, %v13008_v39 }
 0x19c   : > { %v1885_v0 = vmul.f32 %v13007_v26, %v1773_v63 }
 0x19d   : > { %v1945_v35 = vpop.permute.xlu1 %1944  ;;  %v1572_v59 = vpop.permute.xlu0 %1571 }
 0x19e   : > { %1605 = vrot.lane.b32.xlu1 %v1510_v9, %s12978_s10  ;;  %1877 = vperm.xlu0 %10230, %v1799_v40   ;;  %v1997_v41 = vadd.f32 %v11208_v45, %v1885_v0 }
 0x1a1   : > { %v1574_v8 = vpop.permute.xlu1 %1573  ;;  %v1715_v49 = vpop.permute.xlu0 %1714 }
 0x1a2   : > { %v1615_v51 = vsel %vm1607_vm1, %v1572_v59, %v1574_v8  ;;  %1989 = vperm.xlu1 %10231, %v1911_v33   ;;  %2024 = vrot.lane.b32.xlu0 %v1992_v34, %s10615_s7 }
 0x1a3   : > { %v1647_v25 = vadd.f32 %v1615_v51, %v1373_v4 }
 0x1a5   : > { %v1838_v53 = vpop.permute.xlu1 %1837  ;;  %v1054_v32 = vpop.permute.xlu0 %1053  ;;  %v1759_v44 = vadd.f32 %v11230_v24, %v1647_v25  ;;  %v1998_v24 = vadd.f32 %v1945_v35, %v1886_v30  ;;  %v1096_v35 = vmul.f32 %v10864_v58, %v11249_v5 }
 0x1a6   : > { %2026 = vrot.lane.b32.xlu1 %v1993_v42, %s10615_s7  ;;  %2028 = vrot.lane.b32.xlu0 %v1994_v18, %s10615_s7  ;;  %v1097_v29 = vmul.f32 %v10864_v58, %v1054_v32 }
 0x1a7   : > { %v1775_v7 = vmax.f32 %v1759_v44, 0.0 }
 0x1a9   : > { %v1302_v21 = vpop.permute.xlu1 %1301  ;;  %v1304_v47 = vpop.permute.xlu0 %1303  ;;  %v1887_v62 = vmul.f32 %v1838_v53, %v1775_v7 }
 0x1aa   : > { %2030 = vrot.lane.b32.xlu1 %v1995_v15, %s10615_s7  ;;  %2032 = vrot.lane.b32.xlu0 %v1996_v31, %s10615_s7  ;;  %v1342_v46 = vsel %vm1333_vm0, %v1302_v21, %v1304_v47 }
 0x1ab   : > { %v1374_v52 = vadd.f32 %v1342_v46, %v1095_v61 }
 0x1ad   : > { %v1950_v10 = vpop.permute.xlu1 %1949  ;;  %v1576_v13 = vpop.permute.xlu0 %1575 }
 0x1ae   : > { %2034 = vrot.lane.b32.xlu1 %v1997_v41, %s10615_s7  ;;  %2036 = vrot.lane.b32.xlu0 %v1998_v24, %s10615_s7  ;;  %v1999_v36 = vadd.f32 %v1950_v10, %v1887_v62 }
 0x1b1   : > { %v1578_v48 = vpop.permute.xlu1 %1577  ;;  %v1720_v37 = vpop.permute.xlu0 %1719 }
 0x1b2   : > { %v1616_v11 = vsel %vm1607_vm1, %v1576_v13, %v1578_v48  ;;  %2038 = vrot.lane.b32.xlu1 %v1999_v36, %s10615_s7 }
 0x1b3   : > { %v1648_v45 = vadd.f32 %v1616_v11, %v1374_v52 }
 0x1b5   : > { %v1843_v9 = vpop.permute.xlu1 %1842  ;;  %v1760_v19 = vadd.f32 %v1715_v49, %v1648_v45  ;;  %v1059_v54 = vpop.permute.xlu0 %1058 }
 0x1b6   : > { %v1098_v26 = vmul.f32 %v10864_v58, %v1059_v54 }
 0x1b7   : > { %v1776_v27 = vmax.f32 %v1760_v19, 0.0 }
 0x1b9   : > { %v1306_v40 = vpop.permute.xlu1 %1305  ;;  %v1308_v43 = vpop.permute.xlu0 %1307  ;;  %v1888_v2 = vmul.f32 %v1843_v9, %v1776_v27 }
 0x1ba   : > { %v1343_v55 = vsel %vm1333_vm0, %v1306_v40, %v1308_v43 }
 0x1bb   : > { %v1375_v59 = vadd.f32 %v1343_v55, %v1096_v35 }
 0x1bd   : > { %v1955_v12 = vpop.permute.xlu1 %1954  ;;  %v1580_v28 = vpop.permute.xlu0 %1579 }
 0x1be   : > { %v2000_v17 = vadd.f32 %v1955_v12, %v1888_v2 }
 0x1c0   : > { %2040 = vrot.lane.b32.xlu0 %v2000_v17, %s10615_s7 }
 0x1c1   : > { %v1582_v1 = vpop.permute.xlu1 %1581  ;;  %v1725_v14 = vpop.permute.xlu0 %1724 }
 0x1c2   : > { %v1617_v38 = vsel %vm1607_vm1, %v1580_v28, %v1582_v1 }
 0x1c3   : > { %v1649_v57 = vadd.f32 %v1617_v38, %v1375_v59 }
 0x1c5   : > { %v1848_v33 = vpop.permute.xlu1 %1847  ;;  %v1761_v6 = vadd.f32 %v1720_v37, %v1649_v57  ;;  %v1064_v20 = vpop.permute.xlu0 %1063 }
 0x1c6   : > { %v1099_v45 = vmul.f32 %v10864_v58, %v1064_v20  ;;  %v2282_v20 = vld [vmem:[%s10653_s25 + $0x8] sm:$0xff] }
 0x1c7   : > { %v1777_v34 = vmax.f32 %v1761_v6, 0.0  ;;  %v2281_v6 = vld [vmem:[%s10653_s25] sm:$0xff] }
 0x1c9   : > { %v1310_v50 = vpop.permute.xlu1 %1309  ;;  %v1312_v4 = vpop.permute.xlu0 %1311  ;;  %v1889_v8 = vmul.f32 %v1848_v33, %v1777_v34  ;;  %v12969_v33 = vmov 0.0|0.0  }
 0x1ca   : > { %v1344_v23 = vsel %vm1333_vm0, %v1310_v50, %v1312_v4  ;;  %9588 = vmatprep.subr.bf16.mxu0 %v12969_v33 }
 0x1cb   : > { %v1376_v51 = vadd.f32 %v1344_v23, %v1097_v29 }
 0x1cd   : > { %v1960_v49 = vpop.permute.xlu1 %1959  ;;  %v1584_v22 = vpop.permute.xlu0 %1583 }
 0x1ce   : > { %v2001_v5 = vadd.f32 %v1960_v49, %v1889_v8  ;;  %v9589_v8 = vpack.c.bf16 %v2282_v20, %v2281_v6  ;;  %v2283_v49 = vld [vmem:[%s10653_s25 + $0x10] sm:$0xff] }
 0x1d0   : > { %2042 = vrot.lane.b32.xlu1 %v2001_v5, %s10615_s7  ;;  %9590 = vmatpush1.bf16.msra.mxu0 %v9589_v8 }
 0x1d1   : > { %v1586_v25 = vpop.permute.xlu1 %1585  ;;  %v1730_v42 = vpop.permute.xlu0 %1729  ;;  %9591 = vmatprep.subr.bf16.mxu0 %v12969_v33 }
 0x1d2   : > { %v1618_v18 = vsel %vm1607_vm1, %v1584_v22, %v1586_v25  ;;  %v2284_v22 = vld [vmem:[%s10653_s25 + $0x18] sm:$0xff]  ;;  %v2286_v25 = vld [vmem:[%s10653_s25 + $0x28] sm:$0xff] }
 0x1d3   : > { %v1650_v16 = vadd.f32 %v1618_v18, %v1376_v51  ;;  %v9592_v29 = vpack.c.bf16 %v2284_v22, %v2283_v49  ;;  %v2285_v51 = vld [vmem:[%s10653_s25 + $0x20] sm:$0xff] }
 0x1d5   : > { %v1853_v53 = vpop.permute.xlu1 %1852  ;;  %v1762_v56 = vadd.f32 %v1725_v14, %v1650_v16  ;;  %v1069_v63 = vpop.permute.xlu0 %1068  ;;  %9593 = vmatpush1.bf16.msra.mxu0 %v9592_v29 }
 0x1d6   : > { %v1100_v57 = vmul.f32 %v10864_v58, %v1069_v63  ;;  %9594 = vmatprep.subr.bf16.mxu0 %v12969_v33  ;;  %v2287_v63 = vld [vmem:[%s10653_s25 + $0x30] sm:$0xff] }
 0x1d7   : > { %v1778_v60 = vmax.f32 %v1762_v56, 0.0  ;;  %v9595_v56 = vpack.c.bf16 %v2286_v25, %v2285_v51 }
 0x1d9   : > { %v1314_v44 = vpop.permute.xlu1 %1313  ;;  %v1316_v15 = vpop.permute.xlu0 %1315  ;;  %v1890_v3 = vmul.f32 %v1853_v53, %v1778_v60  ;;  %v2288_v60 = vld [vmem:[%s10653_s25 + $0x38] sm:$0xff]  ;;  %9596 = vmatpush1.bf16.msra.mxu0 %v9595_v56 }
 0x1da   : > { %v1345_v47 = vsel %vm1333_vm0, %v1314_v44, %v1316_v15  ;;  %9597 = vmatprep.subr.bf16.mxu0 %v12969_v33 }
 0x1db   : > { %v1377_v0 = vadd.f32 %v1345_v47, %v1098_v26 }
 0x1dd   : > { %v1965_v31 = vpop.permute.xlu1 %1964  ;;  %v1588_v21 = vpop.permute.xlu0 %1587 }
 0x1de   : > { %v2002_v32 = vadd.f32 %v1965_v31, %v1890_v3 }
 0x1e0   : > { %2044 = vrot.lane.b32.xlu0 %v2002_v32, %s10615_s7  ;;  %v9598_v32 = vpack.c.bf16 %v2288_v60, %v2287_v63 }
 0x1e1   : > { %v1590_v30 = vpop.permute.xlu1 %1589  ;;  %v1735_v7 = vpop.permute.xlu0 %1734 }
 0x1e2   : > { %v1619_v41 = vsel %vm1607_vm1, %v1588_v21, %v1590_v30  ;;  %9599 = vmatpush1.bf16.msra.mxu0 %v9598_v32 }
 0x1e3   : > { %v1651_v24 = vadd.f32 %v1619_v41, %v1377_v0  ;;  %9600 = vmatprep.subr.bf16.mxu0 %v12969_v33 }
 0x1e5   : > { %v1858_v10 = vpop.permute.xlu1 %1857  ;;  %v1763_v13 = vadd.f32 %v1730_v42, %v1651_v24  ;;  %v1074_v62 = vpop.permute.xlu0 %1073  ;;  %v2289_v24 = vld [vmem:[%s10653_s25 + $0x40] sm:$0xff] }
 0x1e6   : > { %v1101_v21 = vmul.f32 %v10864_v58, %v1074_v62 }
 0x1e7   : > { %v1779_v46 = vmax.f32 %v1763_v13, 0.0 }
 0x1e9   : > { %v1318_v39 = vpop.permute.xlu1 %1317  ;;  %v1320_v61 = vpop.permute.xlu0 %1319  ;;  %v1891_v36 = vmul.f32 %v1858_v10, %v1779_v46  ;;  %v2290_v10 = vld [vmem:[%s10653_s25 + $0x48] sm:$0xff] }
 0x1ea   : > { %v1346_v37 = vsel %vm1333_vm0, %v1318_v39, %v1320_v61  ;;  %v9601_v39 = vpack.c.bf16 %v2290_v10, %v2289_v24 }
 0x1eb   : > { %v1378_v9 = vadd.f32 %v1346_v37, %v1099_v45 }
 0x1ec   : > { %9602 = vmatpush1.bf16.msra.mxu0 %v9601_v39 }
 0x1ed   : > { %v1970_v52 = vpop.permute.xlu1 %1969  ;;  %v1592_v48 = vpop.permute.xlu0 %1591  ;;  %9603 = vmatprep.subr.bf16.mxu0 %v12969_v33 }
 0x1ee   : > { %v2003_v11 = vadd.f32 %v1970_v52, %v1891_v36  ;;  %v2291_v36 = vld [vmem:[%s10653_s25 + $0x50] sm:$0xff]  ;;  %v2292_v52 = vld [vmem:[%s10653_s25 + $0x58] sm:$0xff] }
 0x1f0   : > { %2046 = vrot.lane.b32.xlu1 %v2003_v11, %s10615_s7  ;;  %v9604_v11 = vpack.c.bf16 %v2292_v52, %v2291_v36 }
 0x1f1   : > { %v1594_v19 = vpop.permute.xlu1 %1593  ;;  %v1740_v54 = vpop.permute.xlu0 %1739 }
 0x1f2   : > { %v1620_v27 = vsel %vm1607_vm1, %v1592_v48, %v1594_v19  ;;  %9605 = vmatpush1.bf16.msra.mxu0 %v9604_v11  ;;  %v2294_v19 = vld [vmem:[%s10653_s25 + $0x68] sm:$0xff] }
 0x1f3   : > { %v1652_v40 = vadd.f32 %v1620_v27, %v1378_v9  ;;  %9606 = vmatprep.subr.bf16.mxu0 %v12969_v33  ;;  %v2293_v9 = vld [vmem:[%s10653_s25 + $0x60] sm:$0xff] }
 0x1f5   : > { %v1863_v43 = vpop.permute.xlu1 %1862  ;;  %v1764_v2 = vadd.f32 %v1735_v7, %v1652_v40  ;;  %v11333_v12 = vpop.permute.xlu0 %1078  ;;  %v9607_v40 = vpack.c.bf16 %v2294_v19, %v2293_v9 }
 0x1f7   : > { %v1780_v28 = vmax.f32 %v1764_v2, 0.0  ;;  %9608 = vmatpush1.bf16.msra.mxu0 %v9607_v40 }
 0x1f8   : > { %9609 = vmatprep.subr.bf16.mxu0 %v12969_v33 }
 0x1f9   : > { %v1322_v55 = vpop.permute.xlu1 %1321  ;;  %v1324_v17 = vpop.permute.xlu0 %1323  ;;  %v1892_v35 = vmul.f32 %v1863_v43, %v1780_v28  ;;  %v1102_v28 = vmul.f32 %v10864_v58, %v11333_v12  ;;  %v2297_v12 = vld [vmem:[%s10653_s25 + $0x80] sm:$0x1] }
 0x1fa   : > { %v1347_v14 = vsel %vm1333_vm0, %v1322_v55, %v1324_v17  ;;  %v2295_v55 = vld [vmem:[%s10653_s25 + $0x70] sm:$0xff]  ;;  %v2296_v17 = vld [vmem:[%s10653_s25 + $0x78] sm:$0xff] }
 0x1fb   : > { %v1379_v34 = vadd.f32 %v1347_v14, %v1100_v57  ;;  %v9610_v14 = vpack.c.bf16 %v2296_v17, %v2295_v55 }
 0x1fd   : > { %v1975_v59 = vpop.permute.xlu1 %1974  ;;  %v1596_v1 = vpop.permute.xlu0 %1595  ;;  %9611 = vmatpush1.bf16.msra.mxu0 %v9610_v14 }
 0x1fe   : > { %v2004_v38 = vadd.f32 %v1975_v59, %v1892_v35 }
 0x200   : > { %2048 = vrot.lane.b32.xlu0 %v2004_v38, %s10615_s7 }
 0x201   : > { %v1598_v50 = vpop.permute.xlu1 %1597  ;;  %v1745_v4 = vpop.permute.xlu0 %1744 }
 0x202   : > { %v1621_v23 = vsel %vm1607_vm1, %v1596_v1, %v1598_v50  ;;  %v12967_v50 = vmov 0.0  }
 0x203   : > { %v1653_v5 = vadd.f32 %v1621_v23, %v1379_v34  ;;  %2382 = vmatprep.subr.mxu0 %v12967_v50 }
 0x204   : > { %8005 = vmatpush1.msk.msra.mxu0 %vm2346_vm3, %v2297_v12 }
 0x205   : > { %v1868_v42 = vpop.permute.xlu1 %1867  ;;  %v1765_v18 = vadd.f32 %v1740_v54, %v1653_v5  ;;  %v1326_v16 = vpop.permute.xlu0 %1325 }
 0x207   : > { %v1781_v53 = vmax.f32 %v1765_v18, 0.0 }
 0x209   : > { %v1893_v44 = vmul.f32 %v1868_v42, %v1781_v53  ;;  %v1328_v15 = vpop.permute.xlu1 %1327  ;;  %v1980_v3 = vpop.permute.xlu0 %1979 }
 0x20a   : > { %v1348_v31 = vsel %vm1333_vm0, %v1326_v16, %v1328_v15 }
 0x20b   : > { %v2005_v47 = vadd.f32 %v1980_v3, %v1893_v44  ;;  %v1380_v26 = vadd.f32 %v1348_v31, %v1101_v21 }
 0x20d   : > { %v1600_v0 = vpop.permute.xlu1 %1599  ;;  %v1602_v30 = vpop.permute.xlu0 %1601  ;;  %2050 = vrot.lane.b32.xlu1 %v2005_v47, %s10615_s7 }
 0x20e   : > { %v1622_v7 = vsel %vm1607_vm1, %v1600_v0, %v1602_v30 }
 0x20f   : > { %v1654_v41 = vadd.f32 %v1622_v7, %v1380_v26 }
 0x211   : > { %v1750_v13 = vpop.permute.xlu1 %1749  ;;  %v1766_v62 = vadd.f32 %v1745_v4, %v1654_v41  ;;  %v1873_v46 = vpop.permute.xlu0 %1872 }
 0x213   : > { %v1782_v61 = vmax.f32 %v1766_v62, 0.0 }
 0x215   : > { %v1330_v48 = vpop.permute.xlu1 %1329  ;;  %v1332_v37 = vpop.permute.xlu0 %1331  ;;  %v1894_v45 = vmul.f32 %v1873_v46, %v1782_v61 }
 0x216   : > { %v1349_v43 = vsel %vm1333_vm0, %v1330_v48, %v1332_v37 }
 0x217   : > { %v1381_v35 = vadd.f32 %v1349_v43, %v1102_v28 }
 0x219   : > { %v1985_v54 = vpop.permute.xlu1 %1984  ;;  %v1604_v27 = vpop.permute.xlu0 %1603 }
 0x21a   : > { %v2006_v2 = vadd.f32 %v1985_v54, %v1894_v45 }
 0x21c   : > { %2052 = vrot.lane.b32.xlu0 %v2006_v2, %s10615_s7 }
 0x21d   : > { %v1606_v59 = vpop.permute.xlu1 %1605  ;;  %v1878_v1 = vpop.permute.xlu0 %1877 }
 0x21e   : > { %v1623_v38 = vsel %vm1607_vm1, %v1604_v27, %v1606_v59 }
 0x21f   : > { %v1655_v57 = vadd.f32 %v1623_v38, %v1381_v35 }
 0x221   : > { %v1767_v6 = vadd.f32 %v1750_v13, %v1655_v57  ;;  %v1990_v20 = vpop.permute.xlu1 %1989  ;;  %v2025_v58 = vpop.permute.xlu0 %2024 }
 0x222   : > { %v11374_v34 = vsel %vm2072_vm2, %v2025_v58, -1e+30  ;;  %v11392_v25 = vsel %vm2072_vm2, -1e+30, %v2025_v58 }
 0x223   : > { %v1783_v4 = vmax.f32 %v1767_v6, 0.0  ;;  %2139 = vrot.lane.b32.xlu0 %v11374_v34, %s12980_s2 }
 0x225   : > { %v1895_v8 = vmul.f32 %v1878_v1, %v1783_v4  ;;  %v2027_v49 = vpop.permute.xlu1 %2026  ;;  %v2029_v5 = vpop.permute.xlu0 %2028 }
 0x226   : > { %v11381_v22 = vsel %vm2072_vm2, -1e+30, %v2027_v49  ;;  %v11387_v29 = vsel %vm2072_vm2, -1e+30, %v2029_v5  ;;  %v11402_v16 = vsel %vm2072_vm2, %v2027_v49, -1e+30 }
 0x227   : > { %v2007_v23 = vadd.f32 %v1990_v20, %v1895_v8  ;;  %2141 = vrot.lane.b32.xlu0 %v11381_v22, %s12980_s2  ;;  %v11412_v63 = vsel %vm2072_vm2, %v2029_v5, -1e+30 }
 0x229   : > { %2054 = vrot.lane.b32.xlu1 %v2007_v23, %s10615_s7  ;;  %v2031_v51 = vpop.permute.xlu1 %2030  ;;  %v2033_v18 = vpop.permute.xlu0 %2032 }
 0x22a   : > { %v11397_v42 = vsel %vm2072_vm2, -1e+30, %v2031_v51  ;;  %v11407_v53 = vsel %vm2072_vm2, -1e+30, %v2033_v18  ;;  %v11422_v15 = vsel %vm2072_vm2, %v2031_v51, -1e+30 }
 0x22b   : > { %2145 = vrot.lane.b32.xlu0 %v11387_v29, %s12980_s2  ;;  %v11432_v21 = vsel %vm2072_vm2, %v2033_v18, -1e+30 }
 0x22d   : > { %2137 = vrot.lane.b32.xlu1 %v11392_v25, %s12980_s2  ;;  %v2035_v56 = vpop.permute.xlu1 %2034  ;;  %v2037_v44 = vpop.permute.xlu0 %2036 }
 0x22e   : > { %v11417_v60 = vsel %vm2072_vm2, -1e+30, %v2035_v56  ;;  %v11427_v3 = vsel %vm2072_vm2, -1e+30, %v2037_v44  ;;  %v11442_v26 = vsel %vm2072_vm2, %v2035_v56, -1e+30 }
 0x22f   : > { %2149 = vrot.lane.b32.xlu0 %v11397_v42, %s12980_s2  ;;  %v11452_v7 = vsel %vm2072_vm2, %v2037_v44, -1e+30 }
 0x231   : > { %2143 = vrot.lane.b32.xlu1 %v11402_v16, %s12980_s2  ;;  %v2039_v31 = vpop.permute.xlu1 %2038 }
 0x232   : > { %v11437_v47 = vsel %vm2072_vm2, -1e+30, %v2039_v31  ;;  %v2041_v32 = vpop.permute.xlu0 %2040  ;;  %v11462_v24 = vsel %vm2072_vm2, %v2039_v31, -1e+30 }
 0x233   : > { %2153 = vrot.lane.b32.xlu0 %v11407_v53, %s12980_s2  ;;  %v11447_v0 = vsel %vm2072_vm2, -1e+30, %v2041_v32  ;;  %v11467_v10 = vsel %vm2072_vm2, %v2041_v32, -1e+30 }
 0x235   : > { %2147 = vrot.lane.b32.xlu1 %v11412_v63, %s12980_s2 }
 0x237   : > { %2157 = vrot.lane.b32.xlu0 %v11417_v60, %s12980_s2 }
 0x239   : > { %2151 = vrot.lane.b32.xlu1 %v11422_v15, %s12980_s2 }
 0x23b   : > { %2161 = vrot.lane.b32.xlu0 %v11427_v3, %s12980_s2 }
 0x23d   : > { %2155 = vrot.lane.b32.xlu1 %v11432_v21, %s12980_s2 }
 0x23f   : > { %2165 = vrot.lane.b32.xlu0 %v11437_v47, %s12980_s2 }
 0x241   : > { %2159 = vrot.lane.b32.xlu1 %v11442_v26, %s12980_s2 }
 0x242   : > { %v2043_v30 = vpop.permute.xlu1 %2042 }
 0x243   : > { %2169 = vrot.lane.b32.xlu0 %v11447_v0, %s12980_s2  ;;  %v11457_v41 = vsel %vm2072_vm2, -1e+30, %v2043_v30  ;;  %v11472_v13 = vsel %vm2072_vm2, %v2043_v30, -1e+30 }
 0x245   : > { %2163 = vrot.lane.b32.xlu1 %v11452_v7, %s12980_s2 }
 0x247   : > { %2173 = vrot.lane.b32.xlu0 %v11457_v41, %s12980_s2 }
 0x249   : > { %2167 = vrot.lane.b32.xlu1 %v11462_v24, %s12980_s2 }
 0x24d   : > { %2171 = vrot.lane.b32.xlu1 %v11467_v10, %s12980_s2 }
 0x251   : > { %2175 = vrot.lane.b32.xlu1 %v11472_v13, %s12980_s2 }
 0x252   : > { %v2045_v62 = vpop.permute.xlu0 %2044 }
 0x253   : > { %v11477_v46 = vsel %vm2072_vm2, -1e+30, %v2045_v62  ;;  %v11480_v39 = vsel %vm2072_vm2, %v2045_v62, -1e+30 }
 0x254   : > { %2177 = vrot.lane.b32.xlu0 %v11477_v46, %s12980_s2 }
 0x255   : > { %2179 = vrot.lane.b32.xlu1 %v11480_v39, %s12980_s2 }
 0x262   : > { %v2047_v61 = vpop.permute.xlu1 %2046 }
 0x263   : > { %v11487_v36 = vsel %vm2072_vm2, %v2047_v61, -1e+30  ;;  %v11490_v52 = vsel %vm2072_vm2, -1e+30, %v2047_v61 }
 0x264   : > { %2183 = vrot.lane.b32.xlu1 %v11487_v36, %s12980_s2  ;;  %2181 = vrot.lane.b32.xlu0 %v11490_v52, %s12980_s2 }
 0x272   : > { %v2049_v48 = vpop.permute.xlu0 %2048 }
 0x273   : > { %v11497_v37 = vsel %vm2072_vm2, %v2049_v48, -1e+30  ;;  %v11500_v11 = vsel %vm2072_vm2, -1e+30, %v2049_v48 }
 0x274   : > { %2187 = vrot.lane.b32.xlu1 %v11497_v37, %s12980_s2  ;;  %2185 = vrot.lane.b32.xlu0 %v11500_v11, %s12980_s2 }
 0x27f   : > { %v2051_v45 = vpop.permute.xlu1 %2050 }
 0x280   : > { %v11507_v9 = vsel %vm2072_vm2, %v2051_v45, -1e+30  ;;  %v11510_v19 = vsel %vm2072_vm2, -1e+30, %v2051_v45 }
 0x281   : > { %2191 = vrot.lane.b32.xlu1 %v11507_v9, %s12980_s2  ;;  %2189 = vrot.lane.b32.xlu0 %v11510_v19, %s12980_s2 }
 0x28e   : > { %v2053_v54 = vpop.permute.xlu0 %2052 }
 0x28f   : > { %v11517_v27 = vsel %vm2072_vm2, %v2053_v54, -1e+30  ;;  %v11520_v40 = vsel %vm2072_vm2, -1e+30, %v2053_v54 }
 0x290   : > { %2195 = vrot.lane.b32.xlu1 %v11517_v27, %s12980_s2  ;;  %2193 = vrot.lane.b32.xlu0 %v11520_v40, %s12980_s2 }
 0x295   : > { %v2140_v43 = vpop.permute.xlu0 %2139 }
 0x296   : > { %v2250_v2 = vmax.f32 %v11374_v34, %v2140_v43 }
 0x298   : > { %8006 = vmatprep.mubr.msk.f32.mxu0 %vm2072_vm2, %v2250_v2 }
 0x299   : > { %v2142_v28 = vpop.permute.xlu0 %2141 }
 0x29b   : > { %v2055_v55 = vpop.permute.xlu1 %2054 }
 0x29c   : > { %v11529_v17 = vsel %vm2072_vm2, %v2055_v55, -1e+30  ;;  %v11532_v35 = vsel %vm2072_vm2, -1e+30, %v2055_v55 }
 0x29d   : > { %2199 = vrot.lane.b32.xlu1 %v11529_v17, %s12980_s2  ;;  %2197 = vrot.lane.b32.xlu0 %v11532_v35, %s12980_s2  ;;  %v2146_v59 = vpop.permute.xlu0 %2145 }
 0x29f   : > { %v2138_v1 = vpop.permute.xlu1 %2137 }
 0x2a0   : > { %v2201_v14 = vsel %vm1333_vm0, %v2138_v1, %v2140_v43 }
 0x2a1   : > { %v2249_v38 = vmax.f32 %v11392_v25, %v2201_v14  ;;  %v2150_v57 = vpop.permute.xlu0 %2149 }
 0x2a3   : > { %v2144_v6 = vpop.permute.xlu1 %2143  ;;  %2415 = vmatmul.mubr.f32.vlgmr.msra.gmra.mrb[0].mxu0 %v2249_v38 }
 0x2a4   : > { %v2202_v20 = vsel %vm1333_vm0, %v2142_v28, %v2144_v6  ;;  %v2252_v58 = vmax.f32 %v11402_v16, %v2144_v6 }
 0x2a5   : > { %v2154_v12 = vpop.permute.xlu0 %2153  ;;  %v2251_v34 = vmax.f32 %v11381_v22, %v2202_v20 }
 0x2a6   : > { %8007 = vmatprep.mubr.msk.f32.mxu0 %vm2072_vm2, %v2252_v58 }
 0x2a7   : > { %v2148_v4 = vpop.permute.xlu1 %2147  ;;  %2420 = vmatmul.mubr.f32.gmra.mrb[2].mxu0 %v2251_v34 }
 0x2a8   : > { %v2203_v8 = vsel %vm1333_vm0, %v2146_v59, %v2148_v4  ;;  %v2254_v49 = vmax.f32 %v11412_v63, %v2148_v4 }
 0x2a9   : > { %v2253_v23 = vmax.f32 %v11387_v29, %v2203_v8  ;;  %v2158_v5 = vpop.permute.xlu0 %2157 }
 0x2aa   : > { %8008 = vmatprep.mubr.msk.f32.mxu0 %vm2072_vm2, %v2254_v49 }
 0x2ab   : > { %v2152_v51 = vpop.permute.xlu1 %2151  ;;  %2425 = vmatmul.mubr.f32.gmra.mrb[4].mxu0 %v2253_v23 }
 0x2ac   : > { %v2204_v25 = vsel %vm1333_vm0, %v2150_v57, %v2152_v51  ;;  %v2256_v18 = vmax.f32 %v11422_v15, %v2152_v51 }
 0x2ad   : > { %v2255_v22 = vmax.f32 %v11397_v42, %v2204_v25  ;;  %v2162_v56 = vpop.permute.xlu0 %2161 }
 0x2ae   : > { %8009 = vmatprep.mubr.msk.f32.mxu0 %vm2072_vm2, %v2256_v18 }
 0x2af   : > { %v2156_v16 = vpop.permute.xlu1 %2155  ;;  %2430 = vmatmul.mubr.f32.gmra.mrb[6].mxu0 %v2255_v22 }
 0x2b0   : > { %v2205_v63 = vsel %vm1333_vm0, %v2154_v12, %v2156_v16  ;;  %v2258_v29 = vmax.f32 %v11432_v21, %v2156_v16 }
 0x2b1   : > { %v2257_v44 = vmax.f32 %v11407_v53, %v2205_v63  ;;  %v2166_v30 = vpop.permute.xlu0 %2165 }
 0x2b2   : > { %8010 = vmatprep.mubr.msk.f32.mxu0 %vm2072_vm2, %v2258_v29 }
 0x2b3   : > { %v2160_v31 = vpop.permute.xlu1 %2159  ;;  %2435 = vmatmul.mubr.f32.gmra.mrb[8].mxu0 %v2257_v44 }
 0x2b4   : > { %v2206_v32 = vsel %vm1333_vm0, %v2158_v5, %v2160_v31  ;;  %v2260_v15 = vmax.f32 %v11442_v26, %v2160_v31 }
 0x2b5   : > { %v2259_v42 = vmax.f32 %v11417_v60, %v2206_v32  ;;  %v2170_v45 = vpop.permute.xlu0 %2169 }
 0x2b6   : > { %8011 = vmatprep.mubr.msk.f32.mxu0 %vm2072_vm2, %v2260_v15 }
 0x2b7   : > { %v2164_v62 = vpop.permute.xlu1 %2163  ;;  %2440 = vmatmul.mubr.f32.gmra.mrb[10].mxu0 %v2259_v42 }
 0x2b8   : > { %v2207_v61 = vsel %vm1333_vm0, %v2162_v56, %v2164_v62  ;;  %v2262_v21 = vmax.f32 %v11452_v7, %v2164_v62 }
 0x2b9   : > { %v2261_v53 = vmax.f32 %v11427_v3, %v2207_v61  ;;  %v2174_v28 = vpop.permute.xlu0 %2173 }
 0x2ba   : > { %8012 = vmatprep.mubr.msk.f32.mxu0 %vm2072_vm2, %v2262_v21 }
 0x2bb   : > { %v2168_v48 = vpop.permute.xlu1 %2167  ;;  %2445 = vmatmul.mubr.f32.gmra.mrb[12].mxu0 %v2261_v53 }
 0x2bc   : > { %v2208_v26 = vsel %vm1333_vm0, %v2166_v30, %v2168_v48  ;;  %v2264_v60 = vmax.f32 %v11462_v24, %v2168_v48 }
 0x2bd   : > { %v2263_v54 = vmax.f32 %v11437_v47, %v2208_v26 }
 0x2be   : > { %8013 = vmatprep.mubr.msk.f32.mxu0 %vm2072_vm2, %v2264_v60 }
 0x2bf   : > { %v2172_v43 = vpop.permute.xlu1 %2171  ;;  %2450 = vmatmul.mubr.f32.gmra.mrb[14].mxu0 %v2263_v54 }
 0x2c0   : > { %v2209_v2 = vsel %vm1333_vm0, %v2170_v45, %v2172_v43  ;;  %v2266_v7 = vmax.f32 %v11467_v10, %v2172_v43 }
 0x2c1   : > { %v2265_v3 = vmax.f32 %v11447_v0, %v2209_v2 }
 0x2c2   : > { %8014 = vmatprep.mubr.msk.f32.mxu0 %vm2072_vm2, %v2266_v7 }
 0x2c3   : > { %v2176_v55 = vpop.permute.xlu1 %2175  ;;  %2455 = vmatmul.mubr.f32.gmra.mrb[16].mxu0 %v2265_v3 }
 0x2c4   : > { %v2210_v59 = vsel %vm1333_vm0, %v2174_v28, %v2176_v55  ;;  %v2268_v24 = vmax.f32 %v11472_v13, %v2176_v55 }
 0x2c5   : > { %v2267_v47 = vmax.f32 %v11457_v41, %v2210_v59 }
 0x2c6   : > { %8015 = vmatprep.mubr.msk.f32.mxu0 %vm2072_vm2, %v2268_v24  ;;  %v2178_v1 = vpop.permute.xlu0 %2177 }
 0x2c7   : > { %v2180_v14 = vpop.permute.xlu1 %2179  ;;  %2460 = vmatmul.mubr.f32.gmra.mrb[18].mxu0 %v2267_v47 }
 0x2c8   : > { %v2211_v10 = vsel %vm1333_vm0, %v2178_v1, %v2180_v14  ;;  %v2270_v0 = vmax.f32 %v11480_v39, %v2180_v14 }
 0x2c9   : > { %v2269_v38 = vmax.f32 %v11477_v46, %v2211_v10 }
 0x2ca   : > { %8016 = vmatprep.mubr.msk.f32.mxu0 %vm2072_vm2, %v2270_v0 }
 0x2cb   : > { %2465 = vmatmul.mubr.f32.gmra.mrb[20].mxu0 %v2269_v38 }
 0x2d6   : > { %v2184_v57 = vpop.permute.xlu1 %2183  ;;  %v2182_v6 = vpop.permute.xlu0 %2181 }
 0x2d7   : > { %v2272_v13 = vmax.f32 %v11487_v36, %v2184_v57  ;;  %v2212_v41 = vsel %vm1333_vm0, %v2182_v6, %v2184_v57 }
 0x2d8   : > { %v2271_v20 = vmax.f32 %v11490_v52, %v2212_v41 }
 0x2d9   : > { %8017 = vmatprep.mubr.msk.f32.mxu0 %vm2072_vm2, %v2272_v13 }
 0x2da   : > { %2470 = vmatmul.mubr.f32.gmra.mrb[22].mxu0 %v2271_v20 }
 0x2e6   : > { %v2188_v58 = vpop.permute.xlu1 %2187  ;;  %v2186_v12 = vpop.permute.xlu0 %2185 }
 0x2e7   : > { %v2274_v39 = vmax.f32 %v11497_v37, %v2188_v58  ;;  %v2213_v46 = vsel %vm1333_vm0, %v2186_v12, %v2188_v58 }
 0x2e8   : > { %v2273_v34 = vmax.f32 %v11500_v11, %v2213_v46  ;;  %v3110_v46 = vld [vmem:[%s13001_s3 + $0x10] sm:$0xff] }
 0x2e9   : > { %8018 = vmatprep.mubr.msk.f32.mxu0 %vm2072_vm2, %v2274_v39  ;;  %v3108_v39 = vld [vmem:[%s13001_s3] sm:$0xff] }
 0x2ea   : > { %2475 = vmatmul.mubr.f32.gmra.mrb[24].mxu0 %v2273_v34  ;;  %v8022_v34 = vld [vmem:[%s10658_s29 + $0x80] sm:$0xff] }
 0x2eb   : > { %8783 = vmatprep.mubr.f32.mxu1 %v8022_v34 }
 0x2f3   : > { %v2192_v4 = vpop.permute.xlu1 %2191  ;;  %v2190_v36 = vpop.permute.xlu0 %2189 }
 0x2f4   : > { %v2276_v8 = vmax.f32 %v11507_v9, %v2192_v4  ;;  %v2214_v52 = vsel %vm1333_vm0, %v2190_v36, %v2192_v4  ;;  %v3111_v36 = vld [vmem:[%s13001_s3 + $0x18] sm:$0xff] }
 0x2f5   : > { %v2275_v49 = vmax.f32 %v11510_v19, %v2214_v52 }
 0x2f6   : > { %8019 = vmatprep.mubr.msk.f32.mxu0 %vm2072_vm2, %v2276_v8 }
 0x2f7   : > { %2480 = vmatmul.mubr.f32.gmra.mrb[26].mxu0 %v2275_v49 }
 0x302   : > { %v2196_v23 = vpop.permute.xlu1 %2195  ;;  %v2194_v37 = vpop.permute.xlu0 %2193 }
 0x303   : > { %v2278_v5 = vmax.f32 %v11517_v27, %v2196_v23  ;;  %v2215_v11 = vsel %vm1333_vm0, %v2194_v37, %v2196_v23  ;;  %v3348_v23 = vld [vmem:[%s10673_s14] sm:$0xff] }
 0x304   : > { %v2277_v51 = vmax.f32 %v11520_v40, %v2215_v11  ;;  %v3112_v37 = vld [vmem:[%s13001_s3 + $0x20] sm:$0xff] }
 0x305   : > { %8020 = vmatprep.mubr.msk.f32.mxu0 %vm2072_vm2, %v2278_v5 }
 0x306   : > { %2485 = vmatmul.mubr.f32.gmra.mrb[28].mxu0 %v2277_v51 }
 0x30f   : > { %v2200_v25 = vpop.permute.xlu1 %2199  ;;  %v2198_v9 = vpop.permute.xlu0 %2197 }
 0x310   : > { %v2280_v18 = vmax.f32 %v11529_v17, %v2200_v25  ;;  %v2216_v19 = vsel %vm1333_vm0, %v2198_v9, %v2200_v25  ;;  %v3113_v9 = vld [vmem:[%s13001_s3 + $0x28] sm:$0xff] }
 0x311   : > { %v2279_v22 = vmax.f32 %v11532_v35, %v2216_v19 }
 0x312   : > { %8021 = vmatprep.mubr.msk.f32.mxu0 %vm2072_vm2, %v2280_v18  ;;  %v3350_v18 = vld [vmem:[%s10673_s14 + $0x10] sm:$0xff] }
 0x313   : > { %2490 = vmatmul.mubr.f32.gmra.mrb[30].mxu0 %v2279_v22 }
 0x376   : > { %v2416_v16 = vpop.f32.mrb[0].mxu0 }
 0x377   : > { %v2418_v27 = vpop.f32.mrb[1].mxu0 }
 0x37a   : > { %v2421_v56 = vpop.f32.mrb[2].mxu0 }
 0x37b   : > { %v10272_v63 = vpack.i.bf16 %v2421_v56, %v2416_v16  ;;  %v11600_v29 = vpack.c.bf16 %v2421_v56, %v2416_v16  ;;  %v2423_v40 = vpop.f32.mrb[3].mxu0  ;;  %v3114_v56 = vld [vmem:[%s13001_s3 + $0x30] sm:$0xff] }
 0x37c   : > { %v3115_v40 = vld [vmem:[%s13001_s3 + $0x38] sm:$0xff] }
 0x37d   : > { %10233 = vrot.lane.b32.xlu0 %v10272_v63, %s12980_s2 }
 0x37e   : > { %v2426_v44 = vpop.f32.mrb[4].mxu0 }
 0x37f   : > { %v2428_v31 = vpop.f32.mrb[5].mxu0 }
 0x382   : > { %v2431_v32 = vpop.f32.mrb[6].mxu0 }
 0x383   : > { %v10277_v17 = vpack.i.bf16 %v2431_v32, %v2426_v44  ;;  %v11603_v15 = vpack.c.bf16 %v2431_v32, %v2426_v44  ;;  %v2433_v42 = vpop.f32.mrb[7].mxu0  ;;  %v3236_v44 = vld [vmem:[%s10668_s8] sm:$0xff] }
 0x385   : > { %10238 = vrot.lane.b32.xlu1 %v10277_v17, %s12980_s2 }
 0x386   : > { %v2436_v35 = vpop.f32.mrb[8].mxu0 }
 0x387   : > { %v2438_v30 = vpop.f32.mrb[9].mxu0 }
 0x388   : > { %v3237_v30 = vld [vmem:[%s10668_s8 + $0x8] sm:$0xff] }
 0x38a   : > { %v2441_v62 = vpop.f32.mrb[10].mxu0 }
 0x38b   : > { %v10282_v61 = vpack.i.bf16 %v2441_v62, %v2436_v35  ;;  %v11606_v21 = vpack.c.bf16 %v2441_v62, %v2436_v35  ;;  %v2443_v53 = vpop.f32.mrb[11].mxu0  ;;  %v3352_v35 = vld [vmem:[%s10673_s14 + $0x20] sm:$0xff] }
 0x38c   : > { %v3116_v62 = vld [vmem:[%s13001_s3 + $0x40] sm:$0xff] }
 0x38d   : > { %10243 = vrot.lane.b32.xlu0 %v10282_v61, %s12980_s2 }
 0x38e   : > { %v2446_v48 = vpop.f32.mrb[12].mxu0 }
 0x38f   : > { %v2448_v45 = vpop.f32.mrb[13].mxu0 }
 0x392   : > { %v2451_v26 = vpop.f32.mrb[14].mxu0 }
 0x393   : > { %v10287_v60 = vpack.i.bf16 %v2451_v26, %v2446_v48  ;;  %v11609_v54 = vpack.c.bf16 %v2451_v26, %v2446_v48  ;;  %v2453_v43 = vpop.f32.mrb[15].mxu0 }
 0x394   : > { %v3238_v43 = vld [vmem:[%s10668_s8 + $0x10] sm:$0xff] }
 0x395   : > { %10248 = vrot.lane.b32.xlu1 %v10287_v60, %s12980_s2 }
 0x396   : > { %v2456_v2 = vpop.f32.mrb[16].mxu0 }
 0x397   : > { %v2458_v7 = vpop.f32.mrb[17].mxu0 }
 0x398   : > { %v3239_v7 = vld [vmem:[%s10668_s8 + $0x18] sm:$0xff] }
 0x39a   : > { %v2461_v3 = vpop.f32.mrb[18].mxu0 }
 0x39b   : > { %v10292_v28 = vpack.i.bf16 %v2461_v3, %v2456_v2  ;;  %v11612_v55 = vpack.c.bf16 %v2461_v3, %v2456_v2  ;;  %v2463_v59 = vpop.f32.mrb[19].mxu0  ;;  %v3354_v2 = vld [vmem:[%s10673_s14 + $0x30] sm:$0xff] }
 0x39d   : > { %10253 = vrot.lane.b32.xlu0 %v10292_v28, %s12980_s2 }
 0x39e   : > { %v2466_v24 = vpop.f32.mrb[20].mxu0 }
 0x39f   : > { %v2468_v47 = vpop.f32.mrb[21].mxu0 }
 0x3a0   : > { %v3118_v47 = vld [vmem:[%s13001_s3 + $0x50] sm:$0xff] }
 0x3ad   : > { %v2471_v1 = vpop.f32.mrb[22].mxu0 }
 0x3ae   : > { %v10297_v14 = vpack.i.bf16 %v2471_v1, %v2466_v24  ;;  %v11615_v10 = vpack.c.bf16 %v2471_v1, %v2466_v24  ;;  %v2473_v0 = vpop.f32.mrb[23].mxu0  ;;  %v3351_v1 = vld [vmem:[%s10673_s14 + $0x18] sm:$0xff] }
 0x3af   : > { %v3240_v0 = vld [vmem:[%s10668_s8 + $0x20] sm:$0xff] }
 0x3b0   : > { %10258 = vrot.lane.b32.xlu1 %v10297_v14, %s12980_s2 }
 0x3bd   : > { %v2476_v38 = vpop.f32.mrb[24].mxu0 }
 0x3be   : > { %v2478_v57 = vpop.f32.mrb[25].mxu0 }
 0x3bf   : > { %v3241_v57 = vld [vmem:[%s10668_s8 + $0x28] sm:$0xff] }
 0x3ca   : > { %v2481_v6 = vpop.f32.mrb[26].mxu0 }
 0x3cb   : > { %v10302_v13 = vpack.i.bf16 %v2481_v6, %v2476_v38  ;;  %v11618_v41 = vpack.c.bf16 %v2481_v6, %v2476_v38  ;;  %v2483_v20 = vpop.f32.mrb[27].mxu0  ;;  %v3356_v38 = vld [vmem:[%s10673_s14 + $0x40] sm:$0xff] }
 0x3cc   : > { %v3120_v6 = vld [vmem:[%s13001_s3 + $0x60] sm:$0xff] }
 0x3cd   : > { %10263 = vrot.lane.b32.xlu0 %v10302_v13, %s12980_s2 }
 0x3d1   : > { %10273 = vrot.lane.b32.xlu0 %v10272_v63, %s12978_s10  ;;  %v3109_v63 = vld [vmem:[%s13001_s3 + $0x8] sm:$0xff] }
 0x3d5   : > { %10283 = vrot.lane.b32.xlu0 %v10282_v61, %s12978_s10  ;;  %v3349_v61 = vld [vmem:[%s10673_s14 + $0x8] sm:$0xff] }
 0x3d9   : > { %10293 = vrot.lane.b32.xlu0 %v10292_v28, %s12978_s10  ;;  %v2486_v58 = vpop.f32.mrb[28].mxu0 }
 0x3da   : > { %v2488_v12 = vpop.f32.mrb[29].mxu0 }
 0x3db   : > { %v3242_v12 = vld [vmem:[%s10668_s8 + $0x30] sm:$0xff] }
 0x3dd   : > { %10303 = vrot.lane.b32.xlu0 %v10302_v13, %s12978_s10  ;;  %v3353_v13 = vld [vmem:[%s10673_s14 + $0x28] sm:$0xff] }
 0x3e1   : > { %3126 = vperm.xlu0 %10230, %v3108_v39  }
 0x3e5   : > { %3136 = vperm.xlu0 %10230, %v3110_v46  }
 0x3e6   : > { %v2491_v4 = vpop.f32.mrb[30].mxu0 }
 0x3e7   : > { %v10307_v8 = vpack.i.bf16 %v2491_v4, %v2486_v58  ;;  %v11629_v52 = vpack.c.bf16 %v2491_v4, %v2486_v58  ;;  %v2493_v49 = vpop.f32.mrb[31].mxu0  ;;  %v3121_v58 = vld [vmem:[%s13001_s3 + $0x68] sm:$0xff]  ;;  %v3358_v4 = vld [vmem:[%s10673_s14 + $0x50] sm:$0xff] }
 0x3e8   : > { %v3355_v49 = vld [vmem:[%s10673_s14 + $0x38] sm:$0xff] }
 0x3e9   : > { %3141 = vperm.xlu0 %10230, %v3111_v36   ;;  %10268 = vrot.lane.b32.xlu1 %v10307_v8, %s12980_s2  ;;  %v3243_v36 = vld [vmem:[%s10668_s8 + $0x38] sm:$0xff] }
 0x3ed   : > { %3366 = vperm.xlu0 %10230, %v3348_v23   ;;  %10278 = vrot.lane.b32.xlu1 %v10277_v17, %s12978_s10  ;;  %v3123_v23 = vld [vmem:[%s13001_s3 + $0x78] sm:$0xff] }
 0x3ef   : > { %v10234_v5 = vpop.permute.xlu0 %10233 }
 0x3f0   : > { %v10236_v11 = vunpack.i.h.bf16 %v10234_v5  ;;  %v10235_v51 = vunpack.i.l.bf16 %v10234_v5  ;;  %v3360_v5 = vld [vmem:[%s10673_s14 + $0x60] sm:$0xff] }
 0x3f1   : > { %3146 = vperm.xlu0 %10230, %v3112_v37   ;;  %10288 = vrot.lane.b32.xlu1 %v10287_v60, %s12978_s10  ;;  %v3117_v60 = vld [vmem:[%s13001_s3 + $0x48] sm:$0xff]  ;;  %v3244_v37 = vld [vmem:[%s10668_s8 + $0x40] sm:$0xff] }
 0x3f2   : > { %v9612_v25 = vpack.c.bf16 %v10236_v11, %v10235_v51  ;;  %v3245_v11 = vld [vmem:[%s10668_s8 + $0x48] sm:$0xff]  ;;  %v3250_v51 = vld [vmem:[%s10668_s8 + $0x70] sm:$0xff] }
 0x3f4   : > { %9613 = vmatprep.subr.bf16.mxu1 %v9612_v25 }
 0x3f5   : > { %3151 = vperm.xlu0 %10230, %v3113_v9   ;;  %10298 = vrot.lane.b32.xlu1 %v10297_v14, %s12978_s10  ;;  %v3119_v14 = vld [vmem:[%s13001_s3 + $0x58] sm:$0xff]  ;;  %v3362_v9 = vld [vmem:[%s10673_s14 + $0x70] sm:$0xff] }
 0x3f6   : > { %9615 = vmatpush3.bf16.msra.mxu1 %v9612_v25  ;;  %v3357_v25 = vld [vmem:[%s10673_s14 + $0x48] sm:$0xff] }
 0x3f7   : > { %v10239_v19 = vpop.permute.xlu1 %10238 }
 0x3f8   : > { %v10241_v22 = vunpack.i.h.bf16 %v10239_v19  ;;  %v10240_v16 = vunpack.i.l.bf16 %v10239_v19  ;;  %v3247_v19 = vld [vmem:[%s10668_s8 + $0x58] sm:$0xff] }
 0x3f9   : > { %3376 = vperm.xlu0 %10230, %v3350_v18   ;;  %10308 = vrot.lane.b32.xlu1 %v10307_v8, %s12978_s10  ;;  %v3122_v8 = vld [vmem:[%s13001_s3 + $0x70] sm:$0xff]  ;;  %s13041_s3 = sld [smem:[#allocation14_spill]] }
 0x3fa   : > { %v9616_v27 = vpack.c.bf16 %v10241_v22, %v10240_v16  ;;  %v3246_v18 = vld [vmem:[%s10668_s8 + $0x50] sm:$0xff] }
 0x3fc   : > { %9617 = vmatprep.subr.bf16.mxu1 %v9616_v27 }
 0x3fd   : > { %3156 = vperm.xlu0 %10230, %v3114_v56   ;;  %3131 = vperm.xlu1 %10231, %v3109_v63   ;;  %v3359_v63 = vld [vmem:[%s10673_s14 + $0x58] sm:$0xff] }
 0x3fe   : > { %9619 = vmatpush3.bf16.msra.mxu1 %v9616_v27 }
 0x3ff   : > { %v10244_v31 = vpop.permute.xlu0 %10243 }
 0x400   : > { %v10246_v32 = vunpack.i.h.bf16 %v10244_v31  ;;  %v10245_v17 = vunpack.i.l.bf16 %v10244_v31  ;;  %v3361_v31 = vld [vmem:[%s10673_s14 + $0x68] sm:$0xff] }
 0x401   : > { %3161 = vperm.xlu0 %10230, %v3115_v40   ;;  %3254 = vperm.xlu1 %10231, %v3236_v44   ;;  %v3248_v40 = vld [vmem:[%s10668_s8 + $0x60] sm:$0xff]  ;;  %v3249_v44 = vld [vmem:[%s10668_s8 + $0x68] sm:$0xff] }
 0x402   : > { %v9620_v42 = vpack.c.bf16 %v10246_v32, %v10245_v17  ;;  %v3251_v32 = vld [vmem:[%s10668_s8 + $0x78] sm:$0xff] }
 0x403   : > { %v3363_v17 = vld [vmem:[%s10673_s14 + $0x78] sm:$0xff] }
 0x404   : > { %9621 = vmatprep.subr.bf16.mxu1 %v9620_v42 }
 0x405   : > { %3386 = vperm.xlu0 %10230, %v3352_v35   ;;  %3259 = vperm.xlu1 %10231, %v3237_v30  }
 0x406   : > { %9623 = vmatpush3.bf16.msra.mxu1 %v9620_v42 }
 0x407   : > { %v10249_v53 = vpop.permute.xlu1 %10248 }
 0x408   : > { %v10251_v48 = vunpack.i.h.bf16 %v10249_v53  ;;  %v10250_v45 = vunpack.i.l.bf16 %v10249_v53  ;;  %v8024_v53 = vld [vmem:[%s10658_s29 + $0x90] sm:$0xff] }
 0x409   : > { %3166 = vperm.xlu0 %10230, %v3116_v62   ;;  %3371 = vperm.xlu1 %10231, %v3349_v61   ;;  %v8023_v61 = vld [vmem:[%s10658_s29 + $0x88] sm:$0xff] }
 0x40a   : > { %v9624_v26 = vpack.c.bf16 %v10251_v48, %v10250_v45  ;;  %v8025_v48 = vld [vmem:[%s10658_s29 + $0x98] sm:$0xff]  ;;  %v8026_v45 = vld [vmem:[%s10658_s29 + $0xa0] sm:$0xff] }
 0x40c   : > { %9625 = vmatprep.subr.bf16.mxu1 %v9624_v26 }
 0x40d   : > { %3171 = vperm.xlu0 %10230, %v3117_v60   ;;  %3264 = vperm.xlu1 %10231, %v3238_v43   ;;  %v8028_v60 = vld [vmem:[%s10658_s29 + $0xb0] sm:$0xff]  ;;  %v8030_v43 = vld [vmem:[%s10658_s29 + $0xc0] sm:$0xff] }
 0x40e   : > { %9627 = vmatpush3.bf16.msra.mxu1 %v9624_v26  ;;  %v8027_v26 = vld [vmem:[%s10658_s29 + $0xa8] sm:$0xff] }
 0x40f   : > { %v10254_v3 = vpop.permute.xlu0 %10253 }
 0x410   : > { %v10256_v28 = vunpack.i.h.bf16 %v10254_v3  ;;  %v10255_v59 = vunpack.i.l.bf16 %v10254_v3 }
 0x411   : > { %3396 = vperm.xlu0 %10230, %v3354_v2   ;;  %3269 = vperm.xlu1 %10231, %v3239_v7   ;;  %v8032_v2 = vld [vmem:[%s10658_s29 + $0xd0] sm:$0xff]  ;;  %v8034_v7 = vld [vmem:[%s10658_s29 + $0xe0] sm:$0xff] }
 0x412   : > { %v9628_v24 = vpack.c.bf16 %v10256_v28, %v10255_v59  ;;  %v8036_v28 = vld [vmem:[%s10658_s29 + $0xf0] sm:$0xff] }
 0x414   : > { %9629 = vmatprep.subr.bf16.mxu1 %v9628_v24 }
 0x415   : > { %3176 = vperm.xlu0 %10230, %v3118_v47   ;;  %3381 = vperm.xlu1 %10231, %v3351_v1   ;;  %v8037_v47 = vld [vmem:[%s10658_s29 + $0xf8] sm:$0xff]  ;;  %v2495_v1 = vld [vmem:[%s10658_s29] sm:$0xff] }
 0x416   : > { %9631 = vmatpush3.bf16.msra.mxu1 %v9628_v24 }
 0x419   : > { %3181 = vperm.xlu0 %10230, %v3119_v14   ;;  %3274 = vperm.xlu1 %10231, %v3240_v0  }
 0x41d   : > { %3406 = vperm.xlu0 %10230, %v3356_v38   ;;  %3279 = vperm.xlu1 %10231, %v3241_v57   ;;  %v2496_v57 = vld [vmem:[%s10658_s29 + $0x8] sm:$0xff] }
 0x421   : > { %3186 = vperm.xlu0 %10230, %v3120_v6   ;;  %3391 = vperm.xlu1 %10231, %v3353_v13   ;;  %v2497_v6 = vld [vmem:[%s10658_s29 + $0x10] sm:$0xff] }
 0x422   : > { %v10259_v20 = vpop.permute.xlu1 %10258 }
 0x423   : > { %v10261_v39 = vunpack.i.h.bf16 %v10259_v20  ;;  %v10260_v46 = vunpack.i.l.bf16 %v10259_v20 }
 0x425   : > { %3191 = vperm.xlu0 %10230, %v3121_v58   ;;  %3284 = vperm.xlu1 %10231, %v3242_v12   ;;  %v9632_v34 = vpack.c.bf16 %v10261_v39, %v10260_v46  ;;  %v2498_v12 = vld [vmem:[%s10658_s29 + $0x18] sm:$0xff]  ;;  %v2499_v39 = vld [vmem:[%s10658_s29 + $0x20] sm:$0xff] }
 0x427   : > { %9633 = vmatprep.subr.bf16.mxu1 %v9632_v34 }
 0x428   : > { %9635 = vmatpush3.bf16.msra.mxu1 %v9632_v34 }
 0x429   : > { %3416 = vperm.xlu0 %10230, %v3358_v4   ;;  %3289 = vperm.xlu1 %10231, %v3243_v36   ;;  %v2500_v36 = vld [vmem:[%s10658_s29 + $0x28] sm:$0xff] }
 0x42d   : > { %3196 = vperm.xlu0 %10230, %v3122_v8   ;;  %3401 = vperm.xlu1 %10231, %v3355_v49   ;;  %v2501_v8 = vld [vmem:[%s10658_s29 + $0x30] sm:$0xff] }
 0x431   : > { %3201 = vperm.xlu0 %10230, %v3123_v23   ;;  %3294 = vperm.xlu1 %10231, %v3244_v37  }
 0x435   : > { %3426 = vperm.xlu0 %10230, %v3360_v5   ;;  %3299 = vperm.xlu1 %10231, %v3245_v11   ;;  %v2502_v11 = vld [vmem:[%s10658_s29 + $0x38] sm:$0xff] }
 0x439   : > { %3324 = vperm.xlu0 %10230, %v3250_v51   ;;  %3411 = vperm.xlu1 %10231, %v3357_v25   ;;  %v2503_v51 = vld [vmem:[%s10658_s29 + $0x40] sm:$0xff] }
 0x43d   : > { %3436 = vperm.xlu0 %10230, %v3362_v9   ;;  %3304 = vperm.xlu1 %10231, %v3246_v18  }
 0x43f   : > { %v10264_v22 = vpop.permute.xlu0 %10263 }
 0x440   : > { %v10266_v16 = vunpack.i.h.bf16 %v10264_v22  ;;  %v10265_v27 = vunpack.i.l.bf16 %v10264_v22  ;;  %v2504_v22 = vld [vmem:[%s10658_s29 + $0x48] sm:$0xff] }
 0x441   : > { %3309 = vperm.xlu1 %10231, %v3247_v19  }
 0x442   : > { %v9636_v56 = vpack.c.bf16 %v10266_v16, %v10265_v27  ;;  %v2505_v16 = vld [vmem:[%s10658_s29 + $0x50] sm:$0xff] }
 0x443   : > { %v10274_v3 = vpop.permute.xlu0 %10273 }
 0x444   : > { %9637 = vmatprep.subr.bf16.mxu1 %v9636_v56  ;;  %v10276_v59 = vunpack.i.h.bf16 %v10274_v3  ;;  %v10275_v24 = vunpack.i.l.bf16 %v10274_v3  ;;  %v8049_v3 = vld [vmem:[%s10658_s29 + $0x158] sm:$0xff] }
 0x445   : > { %3421 = vperm.xlu1 %10231, %v3359_v63   ;;  %9639 = vmatpush3.bf16.msra.mxu1 %v9636_v56 }
 0x446   : > { %v9676_v0 = vpack.c.bf16 %v10276_v59, %v10275_v24  ;;  %v8052_v59 = vld [vmem:[%s10658_s29 + $0x170] sm:$0xff]  ;;  %v8053_v24 = vld [vmem:[%s10658_s29 + $0x178] sm:$0xff] }
 0x447   : > { %v10284_v38 = vpop.permute.xlu0 %10283 }
 0x448   : > { %v10286_v13 = vunpack.i.h.bf16 %v10284_v38 }
 0x449   : > { %3314 = vperm.xlu1 %10231, %v3248_v40  }
 0x44b   : > { %v10294_v4 = vpop.permute.xlu0 %10293 }
 0x44c   : > { %v10296_v49 = vunpack.i.h.bf16 %v10294_v4  ;;  %v10295_v23 = vunpack.i.l.bf16 %v10294_v4 }
 0x44d   : > { %3319 = vperm.xlu1 %10231, %v3249_v44   ;;  %v2506_v44 = vld [vmem:[%s10658_s29 + $0x58] sm:$0xff] }
 0x44e   : > { %v9692_v18 = vpack.c.bf16 %v10296_v49, %v10295_v23 }
 0x44f   : > { %v10304_v19 = vpop.permute.xlu0 %10303 }
 0x450   : > { %v10306_v27 = vunpack.i.h.bf16 %v10304_v19  ;;  %v10305_v56 = vunpack.i.l.bf16 %v10304_v19 }
 0x451   : > { %3431 = vperm.xlu1 %10231, %v3361_v31   ;;  %v2507_v31 = vld [vmem:[%s10658_s29 + $0x60] sm:$0xff] }
 0x455   : > { %3329 = vperm.xlu1 %10231, %v3251_v32  }
 0x459   : > { %3441 = vperm.xlu1 %10231, %v3363_v17  }
 0x45b   : > { %v10269_v42 = vpop.permute.xlu1 %10268 }
 0x45c   : > { %v10271_v35 = vunpack.i.h.bf16 %v10269_v42  ;;  %v10270_v30 = vunpack.i.l.bf16 %v10269_v42  ;;  %v9700_v42 = vpack.c.bf16 %v10306_v27, %v10305_v56 }
 0x45e   : > { %v9640_v62 = vpack.c.bf16 %v10271_v35, %v10270_v30  ;;  %v2508_v35 = vld [vmem:[%s10658_s29 + $0x68] sm:$0xff]  ;;  %v2509_v30 = vld [vmem:[%s10658_s29 + $0x70] sm:$0xff] }
 0x460   : > { %9641 = vmatprep.subr.bf16.mxu1 %v9640_v62 }
 0x461   : > { %9643 = vmatpush3.bf16.msra.mxu1 %v9640_v62 }
 0x462   : > { %9645 = vmatprep.subr.bf16.mxu1 %v11600_v29 }
 0x464   : > { %8784 = vmatmul.mubr.f32.vlgmr.msra.gmra.mrb[0].mxu1 %v8023_v61  ;;  %v2510_v61 = vld [vmem:[%s10658_s29 + $0x78] sm:$0xff] }
 0x465   : > { %9647 = vmatpush3.bf16.msra.mxu1 %v11600_v29  ;;  %8786 = vmatprep.mubr.f32.mxu1 %v8024_v53  ;;  %v8029_v29 = vld [vmem:[%s10658_s29 + $0xb8] sm:$0xff]  ;;  %v8038_v53 = vld [vmem:[%s10658_s29 + $0x100] sm:$0xff] }
 0x466   : > { %9649 = vmatprep.subr.bf16.mxu1 %v11603_v15 }
 0x468   : > { %8787 = vmatmul.mubr.f32.gmra.mrb[2].mxu1 %v8025_v48  ;;  %v8039_v48 = vld [vmem:[%s10658_s29 + $0x108] sm:$0xff] }
 0x469   : > { %9651 = vmatpush3.bf16.msra.mxu1 %v11603_v15  ;;  %8789 = vmatprep.mubr.f32.mxu1 %v8026_v45  ;;  %v8031_v15 = vld [vmem:[%s10658_s29 + $0xc8] sm:$0xff]  ;;  %v8040_v45 = vld [vmem:[%s10658_s29 + $0x110] sm:$0xff] }
 0x46a   : > { %9653 = vmatprep.subr.bf16.mxu1 %v11606_v21 }
 0x46c   : > { %8790 = vmatmul.mubr.f32.gmra.mrb[4].mxu1 %v8027_v26  ;;  %v8041_v26 = vld [vmem:[%s10658_s29 + $0x118] sm:$0xff] }
 0x46d   : > { %9655 = vmatpush3.bf16.msra.mxu1 %v11606_v21  ;;  %8792 = vmatprep.mubr.f32.mxu1 %v8028_v60  ;;  %v8033_v21 = vld [vmem:[%s10658_s29 + $0xd8] sm:$0xff]  ;;  %v8042_v60 = vld [vmem:[%s10658_s29 + $0x120] sm:$0xff] }
 0x46e   : > { %9657 = vmatprep.subr.bf16.mxu1 %v11609_v54 }
 0x470   : > { %8793 = vmatmul.mubr.f32.gmra.mrb[6].mxu1 %v8029_v29  ;;  %v8043_v29 = vld [vmem:[%s10658_s29 + $0x128] sm:$0xff] }
 0x471   : > { %9659 = vmatpush3.bf16.msra.mxu1 %v11609_v54  ;;  %8795 = vmatprep.mubr.f32.mxu1 %v8030_v43  ;;  %v8035_v54 = vld [vmem:[%s10658_s29 + $0xe8] sm:$0xff]  ;;  %v8044_v43 = vld [vmem:[%s10658_s29 + $0x130] sm:$0xff] }
 0x472   : > { %9661 = vmatprep.subr.bf16.mxu1 %v11612_v55 }
 0x474   : > { %8796 = vmatmul.mubr.f32.gmra.mrb[8].mxu1 %v8031_v15  ;;  %v8045_v15 = vld [vmem:[%s10658_s29 + $0x138] sm:$0xff] }
 0x475   : > { %9663 = vmatpush3.bf16.msra.mxu1 %v11612_v55  ;;  %8798 = vmatprep.mubr.f32.mxu1 %v8032_v2  ;;  %v10279_v55 = vpop.permute.xlu1 %10278  ;;  %v8046_v2 = vld [vmem:[%s10658_s29 + $0x140] sm:$0xff] }
 0x476   : > { %9665 = vmatprep.subr.bf16.mxu1 %v11615_v10  ;;  %v10281_v14 = vunpack.i.h.bf16 %v10279_v55 }
 0x478   : > { %8799 = vmatmul.mubr.f32.gmra.mrb[10].mxu1 %v8033_v21  ;;  %v8047_v21 = vld [vmem:[%s10658_s29 + $0x148] sm:$0xff] }
 0x479   : > { %9667 = vmatpush3.bf16.msra.mxu1 %v11615_v10  ;;  %8801 = vmatprep.mubr.f32.mxu1 %v8034_v7  ;;  %v10280_v10 = vunpack.i.l.bf16 %v10279_v55  ;;  %v10289_v58 = vpop.permute.xlu1 %10288  ;;  %v8048_v7 = vld [vmem:[%s10658_s29 + $0x150] sm:$0xff] }
 0x47a   : > { %9669 = vmatprep.subr.bf16.mxu1 %v11618_v41  ;;  %v10291_v46 = vunpack.i.h.bf16 %v10289_v58  ;;  %v10290_v34 = vunpack.i.l.bf16 %v10289_v58 }
 0x47b   : > { %v9680_v20 = vpack.c.bf16 %v10281_v14, %v10280_v10 }
 0x47c   : > { %8802 = vmatmul.mubr.f32.gmra.mrb[12].mxu1 %v8035_v54  ;;  %v9688_v37 = vpack.c.bf16 %v10291_v46, %v10290_v34  ;;  %v8050_v54 = vld [vmem:[%s10658_s29 + $0x160] sm:$0xff] }
 0x47d   : > { %9671 = vmatpush3.bf16.msra.mxu1 %v11618_v41  ;;  %8804 = vmatprep.mubr.f32.mxu1 %v8036_v28  ;;  %v10285_v41 = vunpack.i.l.bf16 %v10284_v38  ;;  %v10299_v5 = vpop.permute.xlu1 %10298  ;;  %v8051_v28 = vld [vmem:[%s10658_s29 + $0x168] sm:$0xff] }
 0x47e   : > { %9673 = vmatprep.subr.bf16.mxu1 %v11629_v52  ;;  %v10301_v25 = vunpack.i.h.bf16 %v10299_v5  ;;  %v10300_v9 = vunpack.i.l.bf16 %v10299_v5 }
 0x480   : > { %8805 = vmatmul.mubr.f32.gmra.mrb[14].mxu1 %v8037_v47  ;;  %v9696_v63 = vpack.c.bf16 %v10301_v25, %v10300_v9  ;;  %v3127_v47 = vpop.permute.xlu0 %3126 }
 0x481   : > { %9675 = vmatpush3.bf16.msra.mxu1 %v11629_v52  ;;  %8839 = vmatprep.mubr.f32.mxu1 %v2495_v1  ;;  %v9684_v52 = vpack.c.bf16 %v10286_v13, %v10285_v41  ;;  %v10309_v40 = vpop.permute.xlu1 %10308 }
 0x482   : > { %9677 = vmatprep.subr.bf16.mxu1 %v9676_v0  ;;  %v10311_v32 = vunpack.i.h.bf16 %v10309_v40  ;;  %v10310_v17 = vunpack.i.l.bf16 %v10309_v40 }
 0x484   : > { %8840 = vmatmul.mubr.f32.vlgmr.msra.gmra.mrb[0].mxu1 %v2496_v57  ;;  %v9704_v62 = vpack.c.bf16 %v10311_v32, %v10310_v17  ;;  %v3137_v14 = vpop.permute.xlu0 %3136 }
 0x485   : > { %9679 = vmatpush3.bf16.msra.mxu1 %v9676_v0  ;;  %8842 = vmatprep.mubr.f32.mxu1 %v2497_v6  ;;  %v3132_v55 = vpop.permute.xlu1 %3131 }
 0x486   : > { %9681 = vmatprep.subr.bf16.mxu1 %v9680_v20 }
 0x488   : > { %8843 = vmatmul.mubr.f32.gmra.mrb[2].mxu1 %v2498_v12  ;;  %v3142_v0 = vpop.permute.xlu0 %3141 }
 0x489   : > { %9683 = vmatpush3.bf16.msra.mxu1 %v9680_v20  ;;  %8845 = vmatprep.mubr.f32.mxu1 %v2499_v39  ;;  %v3255_v1 = vpop.permute.xlu1 %3254 }
 0x48a   : > { %9685 = vmatprep.subr.bf16.mxu1 %v9684_v52 }
 0x48c   : > { %8846 = vmatmul.mubr.f32.gmra.mrb[4].mxu1 %v2500_v36  ;;  %v3367_v57 = vpop.permute.xlu0 %3366 }
 0x48d   : > { %9687 = vmatpush3.bf16.msra.mxu1 %v9684_v52  ;;  %8848 = vmatprep.mubr.f32.mxu1 %v2501_v8  ;;  %v3260_v10 = vpop.permute.xlu1 %3259 }
 0x48e   : > { %9689 = vmatprep.subr.bf16.mxu1 %v9688_v37 }
 0x490   : > { %8849 = vmatmul.mubr.f32.gmra.mrb[6].mxu1 %v2502_v11  ;;  %v3147_v13 = vpop.permute.xlu0 %3146 }
 0x491   : > { %9691 = vmatpush3.bf16.msra.mxu1 %v9688_v37  ;;  %8851 = vmatprep.mubr.f32.mxu1 %v2503_v51  ;;  %v3372_v38 = vpop.permute.xlu1 %3371 }
 0x492   : > { %9693 = vmatprep.subr.bf16.mxu1 %v9692_v18 }
 0x494   : > { %8852 = vmatmul.mubr.f32.gmra.mrb[8].mxu1 %v2504_v22  ;;  %v3152_v20 = vpop.permute.xlu0 %3151 }
 0x495   : > { %9695 = vmatpush3.bf16.msra.mxu1 %v9692_v18  ;;  %8854 = vmatprep.mubr.f32.mxu1 %v2505_v16  ;;  %v3265_v6 = vpop.permute.xlu1 %3264 }
 0x496   : > { %9697 = vmatprep.subr.bf16.mxu1 %v9696_v63 }
 0x498   : > { %8855 = vmatmul.mubr.f32.gmra.mrb[10].mxu1 %v2506_v44  ;;  %v3377_v12 = vpop.permute.xlu0 %3376 }
 0x499   : > { %9699 = vmatpush3.bf16.msra.mxu1 %v9696_v63  ;;  %8857 = vmatprep.mubr.f32.mxu1 %v2507_v31  ;;  %v3270_v41 = vpop.permute.xlu1 %3269 }
 0x49a   : > { %9701 = vmatprep.subr.bf16.mxu1 %v9700_v42 }
 0x49c   : > { %8858 = vmatmul.mubr.f32.gmra.mrb[12].mxu1 %v2508_v35  ;;  %v3157_v46 = vpop.permute.xlu0 %3156 }
 0x49d   : > { %9703 = vmatpush3.bf16.msra.mxu1 %v9700_v42  ;;  %8860 = vmatprep.mubr.f32.mxu1 %v2509_v30  ;;  %v3382_v58 = vpop.permute.xlu1 %3381 }
 0x49e   : > { %9705 = vmatprep.subr.bf16.mxu1 %v9704_v62 }
 0x4a0   : > { %8861 = vmatmul.mubr.f32.gmra.mrb[14].mxu1 %v2510_v61  ;;  %v3162_v52 = vpop.permute.xlu0 %3161 }
 0x4a1   : > { %9707 = vmatpush3.bf16.msra.mxu1 %v9704_v62  ;;  %8895 = vmatprep.mubr.f32.mxu1 %v8038_v53  ;;  %v3275_v39 = vpop.permute.xlu1 %3274 }
 0x4a4   : > { %8896 = vmatmul.mubr.f32.vlgmr.msra.gmra.mrb[0].mxu1 %v8039_v48  ;;  %v3387_v36 = vpop.permute.xlu0 %3386 }
 0x4a5   : > { %8898 = vmatprep.mubr.f32.mxu1 %v8040_v45  ;;  %v3280_v34 = vpop.permute.xlu1 %3279 }
 0x4a8   : > { %8899 = vmatmul.mubr.f32.gmra.mrb[2].mxu1 %v8041_v26  ;;  %v11746_v49 = vpop.permute.xlu0 %3166 }
 0x4a9   : > { %8901 = vmatprep.mubr.f32.mxu1 %v8042_v60  ;;  %v3392_v4 = vpop.permute.xlu1 %3391 }
 0x4ac   : > { %8902 = vmatmul.mubr.f32.gmra.mrb[4].mxu1 %v8043_v29  ;;  %v3172_v37 = vpop.permute.xlu0 %3171 }
 0x4ad   : > { %8904 = vmatprep.mubr.f32.mxu1 %v8044_v43  ;;  %v11744_v8 = vpop.permute.xlu1 %3284 }
 0x4b0   : > { %8905 = vmatmul.mubr.f32.gmra.mrb[6].mxu1 %v8045_v15  ;;  %v11750_v11 = vpop.permute.xlu0 %3396 }
 0x4b1   : > { %8907 = vmatprep.mubr.f32.mxu1 %v8046_v2  ;;  %v3290_v23 = vpop.permute.xlu1 %3289 }
 0x4b4   : > { %8908 = vmatmul.mubr.f32.gmra.mrb[8].mxu1 %v8047_v21  ;;  %v11754_v25 = vpop.permute.xlu0 %3176 }
 0x4b5   : > { %8910 = vmatprep.mubr.f32.mxu1 %v8048_v7  ;;  %v11748_v5 = vpop.permute.xlu1 %3401 }
 0x4b8   : > { %8911 = vmatmul.mubr.f32.gmra.mrb[10].mxu1 %v8049_v3  ;;  %v11758_v18 = vpop.permute.xlu0 %3181 }
 0x4b9   : > { %8913 = vmatprep.mubr.f32.mxu1 %v8050_v54  ;;  %v11752_v51 = vpop.permute.xlu1 %3294 }
 0x4bc   : > { %8914 = vmatmul.mubr.f32.gmra.mrb[12].mxu1 %v8051_v28  ;;  %v11762_v22 = vpop.permute.xlu0 %3406 }
 0x4bd   : > { %8916 = vmatprep.mubr.f32.mxu1 %v8052_v59  ;;  %v11756_v9 = vpop.permute.xlu1 %3299 }
 0x4c0   : > { %8917 = vmatmul.mubr.f32.gmra.mrb[14].mxu1 %v8053_v24  ;;  %v11766_v27 = vpop.permute.xlu0 %3186 }
 0x4c1   : > { %v11760_v19 = vpop.permute.xlu1 %3411 }
 0x4c4   : > { %v11770_v63 = vpop.permute.xlu0 %3191 }
 0x4c5   : > { %v11764_v16 = vpop.permute.xlu1 %3304 }
 0x4c8   : > { %v11774_v62 = vpop.permute.xlu0 %3416 }
 0x4c9   : > { %v11768_v56 = vpop.permute.xlu1 %3309 }
 0x4cc   : > { %v11780_v24 = vpop.permute.xlu0 %3196 }
 0x4cd   : > { %v11772_v42 = vpop.permute.xlu1 %3421 }
 0x4d1   : > { %v11777_v54 = vpop.permute.xlu1 %3314 }
 0x577   : > { %v8897_v40 = vpop.f32.mrb[0].mxu1 }
 0x578   : > { %v3205_v44 = vadd.f32 %v8897_v40, %v3132_v55  ;;  %v3013_v31 = vpop.f32.mrb[1].mxu1  ;;  %v3320_v40 = vpop.permute.xlu1 %3319 }
 0x579   : > { %v3204_v32 = vadd.f32 %v3127_v47, %v3013_v31 }
 0x57a   : > { %v3221_v17 = vmax.f32 %v3205_v44, 0.0 }
 0x57b   : > { %v3220_v35 = vmax.f32 %v3204_v32, 0.0  ;;  %v8900_v30 = vpop.f32.mrb[2].mxu1 }
 0x57c   : > { %v3333_v61 = vmul.f32 %v3260_v10, %v3221_v17  ;;  %v3207_v53 = vadd.f32 %v8900_v30, %v3142_v0  ;;  %v3023_v48 = vpop.f32.mrb[3].mxu1 }
 0x57d   : > { %v3332_v45 = vmul.f32 %v3255_v1, %v3220_v35  ;;  %v3206_v26 = vadd.f32 %v3137_v14, %v3023_v48 }
 0x57e   : > { %v3445_v60 = vadd.f32 %v3372_v38, %v3333_v61  ;;  %v3223_v29 = vmax.f32 %v3207_v53, 0.0  ;;  %v3432_v53 = vpop.permute.xlu1 %3431 }
 0x57f   : > { %v3444_v43 = vadd.f32 %v3367_v57, %v3332_v45  ;;  %v3222_v15 = vmax.f32 %v3206_v26, 0.0  ;;  %v8903_v2 = vpop.f32.mrb[4].mxu1 }
 0x580   : > { %v3335_v21 = vmul.f32 %v3270_v41, %v3223_v29  ;;  %v3209_v7 = vadd.f32 %v8903_v2, %v3152_v20  ;;  %3478 = vrot.lane.b32.xlu1 %v3445_v60, %s10615_s7  ;;  %v3033_v3 = vpop.f32.mrb[5].mxu1 }
 0x581   : > { %v3334_v28 = vmul.f32 %v3265_v6, %v3222_v15  ;;  %v3208_v59 = vadd.f32 %v3147_v13, %v3033_v3  ;;  %3476 = vrot.lane.b32.xlu0 %v3444_v43, %s10615_s7  ;;  %v3638_v15 = vld [vmem:[%s10678_s19 + $0x8] sm:$0xff] }
 0x582   : > { %v3447_v55 = vadd.f32 %v3382_v58, %v3335_v21  ;;  %v3225_v47 = vmax.f32 %v3209_v7, 0.0  ;;  %v3202_v58 = vpop.permute.xlu0 %3201  ;;  %v3330_v2 = vpop.permute.xlu1 %3329 }
 0x583   : > { %v3446_v1 = vadd.f32 %v3377_v12, %v3334_v28  ;;  %v3224_v14 = vmax.f32 %v3208_v59, 0.0  ;;  %v8906_v10 = vpop.f32.mrb[6].mxu1  ;;  %v3640_v28 = vld [vmem:[%s10678_s19 + $0x18] sm:$0xff] }
 0x584   : > { %v3337_v0 = vmul.f32 %v3280_v34, %v3225_v47  ;;  %v3211_v38 = vadd.f32 %v8906_v10, %v3162_v52  ;;  %3482 = vrot.lane.b32.xlu1 %v3447_v55, %s10615_s7  ;;  %v3043_v57 = vpop.f32.mrb[7].mxu1  ;;  %v3641_v47 = vld [vmem:[%s10678_s19 + $0x20] sm:$0xff] }
 0x585   : > { %v3336_v41 = vmul.f32 %v3275_v39, %v3224_v14  ;;  %v3210_v20 = vadd.f32 %v3157_v46, %v3043_v57  ;;  %3480 = vrot.lane.b32.xlu0 %v3446_v1, %s10615_s7  ;;  %v3642_v1 = vld [vmem:[%s10678_s19 + $0x28] sm:$0xff] }
 0x586   : > { %v3449_v6 = vadd.f32 %v3392_v4, %v3337_v0  ;;  %v3227_v13 = vmax.f32 %v3211_v38, 0.0 }
 0x587   : > { %v3448_v44 = vadd.f32 %v3387_v36, %v3336_v41  ;;  %v3226_v31 = vmax.f32 %v3210_v20, 0.0  ;;  %v8909_v32 = vpop.f32.mrb[8].mxu1  ;;  %v9716_v41 = vpack.c.bf16 %v3642_v1, %v3641_v47 }
 0x588   : > { %v3339_v17 = vmul.f32 %v3290_v23, %v3227_v13  ;;  %v3213_v12 = vadd.f32 %v8909_v32, %v3172_v37  ;;  %3486 = vrot.lane.b32.xlu1 %v3449_v6, %s10615_s7  ;;  %v3053_v34 = vpop.f32.mrb[9].mxu1  ;;  %v3643_v6 = vld [vmem:[%s10678_s19 + $0x30] sm:$0xff]  ;;  %v3644_v13 = vld [vmem:[%s10678_s19 + $0x38] sm:$0xff] }
 0x589   : > { %v3338_v52 = vmul.f32 %v11744_v8, %v3226_v31  ;;  %v3212_v35 = vadd.f32 %v11746_v49, %v3053_v34  ;;  %3484 = vrot.lane.b32.xlu0 %v3448_v44, %s10615_s7  ;;  %v9720_v32 = vpack.c.bf16 %v3644_v13, %v3643_v6 }
 0x58a   : > { %v3451_v39 = vadd.f32 %v11748_v5, %v3339_v17  ;;  %v3229_v46 = vmax.f32 %v3213_v12, 0.0  ;;  %v3427_v5 = vpop.permute.xlu0 %3426 }
 0x58b   : > { %v3450_v4 = vadd.f32 %v11750_v11, %v3338_v52  ;;  %v3228_v36 = vmax.f32 %v3212_v35, 0.0  ;;  %v8912_v30 = vpop.f32.mrb[10].mxu1 }
 0x58c   : > { %v3341_v61 = vmul.f32 %v11756_v9, %v3229_v46  ;;  %v3215_v23 = vadd.f32 %v8912_v30, %v11758_v18  ;;  %3490 = vrot.lane.b32.xlu1 %v3451_v39, %s10615_s7  ;;  %v3063_v37 = vpop.f32.mrb[11].mxu1 }
 0x58d   : > { %v3340_v8 = vmul.f32 %v11752_v51, %v3228_v36  ;;  %v3214_v49 = vadd.f32 %v11754_v25, %v3063_v37  ;;  %3488 = vrot.lane.b32.xlu0 %v3450_v4, %s10615_s7 }
 0x58e   : > { %v3453_v11 = vadd.f32 %v11760_v19, %v3341_v61  ;;  %v3231_v48 = vmax.f32 %v3215_v23, 0.0 }
 0x58f   : > { %v3452_v9 = vadd.f32 %v11762_v22, %v3340_v8  ;;  %v3230_v18 = vmax.f32 %v3214_v49, 0.0  ;;  %v8915_v45 = vpop.f32.mrb[12].mxu1  ;;  %v3637_v22 = vld [vmem:[%s10678_s19] sm:$0xff] }
 0x590   : > { %v3343_v26 = vmul.f32 %v11768_v56, %v3231_v48  ;;  %v3217_v60 = vadd.f32 %v8915_v45, %v11770_v63  ;;  %3494 = vrot.lane.b32.xlu1 %v3453_v11, %s10615_s7  ;;  %v3073_v51 = vpop.f32.mrb[13].mxu1  ;;  %v3639_v56 = vld [vmem:[%s10678_s19 + $0x10] sm:$0xff]  ;;  %v9708_v3 = vpack.c.bf16 %v3638_v15, %v3637_v22 }
 0x591   : > { %v3342_v25 = vmul.f32 %v11764_v16, %v3230_v18  ;;  %v3216_v29 = vadd.f32 %v11766_v27, %v3073_v51  ;;  %3492 = vrot.lane.b32.xlu0 %v3452_v9, %s10615_s7  ;;  %v3325_v16 = vpop.permute.xlu0 %3324 }
 0x592   : > { %v3455_v19 = vadd.f32 %v11772_v42, %v3343_v26  ;;  %v3233_v43 = vmax.f32 %v3217_v60, 0.0  ;;  %v9712_v42 = vpack.c.bf16 %v3640_v28, %v3639_v56  ;;  %9709 = vmatprep.subr.bf16.mxu0 %v9708_v3 }
 0x593   : > { %v3454_v63 = vadd.f32 %v11774_v62, %v3342_v25  ;;  %v3232_v21 = vmax.f32 %v3216_v29, 0.0  ;;  %v8918_v7 = vpop.f32.mrb[14].mxu1  ;;  %9711 = vmatpush3.bf16.msra.mxu0 %v9708_v3 }
 0x594   : > { %v3345_v59 = vmul.f32 %v3320_v40, %v3233_v43  ;;  %v3219_v27 = vadd.f32 %v8918_v7, %v3202_v58  ;;  %3498 = vrot.lane.b32.xlu1 %v3455_v19, %s10615_s7  ;;  %v3083_v55 = vpop.f32.mrb[15].mxu1  ;;  %9713 = vmatprep.subr.bf16.mxu0 %v9712_v42  ;;  %v3442_v40 = vpop.permute.xlu1 %3441  ;;  %v3645_v58 = vld [vmem:[%s10678_s19 + $0x40] sm:$0x3] }
 0x595   : > { %v3344_v14 = vmul.f32 %v11777_v54, %v3232_v21  ;;  %v3218_v10 = vadd.f32 %v11780_v24, %v3083_v55  ;;  %3496 = vrot.lane.b32.xlu0 %v3454_v63, %s10615_s7  ;;  %v3437_v24 = vpop.permute.xlu0 %3436 }
 0x596   : > { %v3457_v62 = vadd.f32 %v3432_v53, %v3345_v59  ;;  %v3235_v0 = vmax.f32 %v3219_v27, 0.0 }
 0x597   : > { %v3456_v38 = vadd.f32 %v3427_v5, %v3344_v14  ;;  %v3234_v57 = vmax.f32 %v3218_v10, 0.0  ;;  %9715 = vmatpush3.bf16.msra.mxu0 %v9712_v42 }
 0x598   : > { %v3347_v20 = vmul.f32 %v3330_v2, %v3235_v0  ;;  %3502 = vrot.lane.b32.xlu1 %v3457_v62, %s10615_s7  ;;  %9717 = vmatprep.subr.bf16.mxu0 %v9716_v41 }
 0x599   : > { %v3346_v54 = vmul.f32 %v3325_v16, %v3234_v57  ;;  %3500 = vrot.lane.b32.xlu0 %v3456_v38, %s10615_s7 }
 0x59a   : > { %v3459_v44 = vadd.f32 %v3442_v40, %v3347_v20 }
 0x59b   : > { %v3458_v31 = vadd.f32 %v3437_v24, %v3346_v54  ;;  %9719 = vmatpush3.bf16.msra.mxu0 %v9716_v41 }
 0x59c   : > { %3506 = vrot.lane.b32.xlu1 %v3459_v44, %s10615_s7  ;;  %9721 = vmatprep.subr.bf16.mxu0 %v9720_v32 }
 0x59d   : > { %3504 = vrot.lane.b32.xlu0 %v3458_v31, %s10615_s7 }
 0x59f   : > { %9723 = vmatpush3.bf16.msra.mxu0 %v9720_v32 }
 0x5a0   : > { %8935 = vmatprep.subr.msk.mxu0 %vm3694_vm4, %v3645_v58 }
 0x5a3   : > { %8936 = vmatpush3.msk.msra.mxu0 %vm3694_vm4, %v3645_v58 }
 0x5f2   : > { %v3479_v17 = vpop.permute.xlu1 %3478 }
 0x5f3   : > { %v3525_v12 = vsel %vm2072_vm2, -1e+30, %v3479_v17  ;;  %v3477_v34 = vpop.permute.xlu0 %3476 }
 0x5f4   : > { %v11827_v52 = vsel %vm3540_vm5, %v3525_v12, -1e+30  ;;  %v3524_v35 = vsel %vm2072_vm2, -1e+30, %v3477_v34 }
 0x5f5   : > { %v11831_v39 = vsel %vm3540_vm5, %v3524_v35, -1e+30  ;;  %3575 = vrot.lane.b32.xlu1 %v11827_v52, %s12980_s2 }
 0x5f6   : > { %v3483_v46 = vpop.permute.xlu1 %3482  ;;  %3573 = vrot.lane.b32.xlu0 %v11831_v39, %s12980_s2 }
 0x5f7   : > { %v3527_v4 = vsel %vm2072_vm2, -1e+30, %v3483_v46  ;;  %v3481_v36 = vpop.permute.xlu0 %3480 }
 0x5f8   : > { %v11839_v30 = vsel %vm3540_vm5, %v3527_v4, -1e+30  ;;  %v3526_v61 = vsel %vm2072_vm2, -1e+30, %v3481_v36 }
 0x5f9   : > { %v11843_v23 = vsel %vm3540_vm5, %v3526_v61, -1e+30  ;;  %3579 = vrot.lane.b32.xlu1 %v11839_v30, %s12980_s2 }
 0x5fa   : > { %v3487_v37 = vpop.permute.xlu1 %3486  ;;  %3577 = vrot.lane.b32.xlu0 %v11843_v23, %s12980_s2 }
 0x5fb   : > { %v3529_v53 = vsel %vm2072_vm2, -1e+30, %v3487_v37  ;;  %v3485_v8 = vpop.permute.xlu0 %3484 }
 0x5fc   : > { %v11851_v49 = vsel %vm3540_vm5, %v3529_v53, -1e+30  ;;  %v3528_v5 = vsel %vm2072_vm2, -1e+30, %v3485_v8 }
 0x5fd   : > { %v3545_v11 = vsel %vm3540_vm5, %v3528_v5, -1e+30  ;;  %3583 = vrot.lane.b32.xlu1 %v11851_v49, %s12980_s2 }
 0x5fe   : > { %v3491_v48 = vpop.permute.xlu1 %3490  ;;  %3581 = vrot.lane.b32.xlu0 %v3545_v11, %s12980_s2 }
 0x5ff   : > { %v3531_v9 = vsel %vm2072_vm2, -1e+30, %v3491_v48  ;;  %v3489_v18 = vpop.permute.xlu0 %3488 }
 0x600   : > { %v3548_v45 = vsel %vm3540_vm5, %v3531_v9, -1e+30  ;;  %v3530_v26 = vsel %vm2072_vm2, -1e+30, %v3489_v18 }
 0x601   : > { %v3547_v60 = vsel %vm3540_vm5, %v3530_v26, -1e+30  ;;  %3587 = vrot.lane.b32.xlu1 %v3548_v45, %s12980_s2 }
 0x602   : > { %v3495_v51 = vpop.permute.xlu1 %3494  ;;  %3585 = vrot.lane.b32.xlu0 %v3547_v60, %s12980_s2 }
 0x603   : > { %v3533_v25 = vsel %vm2072_vm2, -1e+30, %v3495_v51  ;;  %v3493_v29 = vpop.permute.xlu0 %3492 }
 0x604   : > { %v3550_v19 = vsel %vm3540_vm5, %v3533_v25, -1e+30  ;;  %v3532_v43 = vsel %vm2072_vm2, -1e+30, %v3493_v29 }
 0x605   : > { %v3549_v22 = vsel %vm3540_vm5, %v3532_v43, -1e+30  ;;  %3591 = vrot.lane.b32.xlu1 %v3550_v19, %s12980_s2 }
 0x606   : > { %v3499_v15 = vpop.permute.xlu1 %3498  ;;  %3589 = vrot.lane.b32.xlu0 %v3549_v22, %s12980_s2 }
 0x607   : > { %v3535_v56 = vsel %vm2072_vm2, -1e+30, %v3499_v15  ;;  %v3497_v2 = vpop.permute.xlu0 %3496 }
 0x608   : > { %v3552_v63 = vsel %vm3540_vm5, %v3535_v56, -1e+30  ;;  %v3534_v21 = vsel %vm2072_vm2, -1e+30, %v3497_v2 }
 0x609   : > { %v3551_v7 = vsel %vm3540_vm5, %v3534_v21, -1e+30  ;;  %3595 = vrot.lane.b32.xlu1 %v3552_v63, %s12980_s2 }
 0x60a   : > { %v3503_v3 = vpop.permute.xlu1 %3502  ;;  %3593 = vrot.lane.b32.xlu0 %v3551_v7, %s12980_s2 }
 0x60b   : > { %v3537_v28 = vsel %vm2072_vm2, -1e+30, %v3503_v3  ;;  %v3501_v16 = vpop.permute.xlu0 %3500 }
 0x60c   : > { %v3554_v59 = vsel %vm3540_vm5, %v3537_v28, -1e+30  ;;  %v3536_v27 = vsel %vm2072_vm2, -1e+30, %v3501_v16 }
 0x60d   : > { %v3553_v55 = vsel %vm3540_vm5, %v3536_v27, -1e+30  ;;  %3599 = vrot.lane.b32.xlu1 %v3554_v59, %s12980_s2 }
 0x60e   : > { %v3507_v42 = vpop.permute.xlu1 %3506  ;;  %3597 = vrot.lane.b32.xlu0 %v3553_v55, %s12980_s2 }
 0x60f   : > { %v3539_v47 = vsel %vm2072_vm2, -1e+30, %v3507_v42  ;;  %v3505_v1 = vpop.permute.xlu0 %3504 }
 0x610   : > { %v3556_v14 = vsel %vm3540_vm5, %v3539_v47, -1e+30  ;;  %v3538_v10 = vsel %vm2072_vm2, -1e+30, %v3505_v1 }
 0x611   : > { %v3555_v62 = vsel %vm3540_vm5, %v3538_v10, -1e+30  ;;  %3603 = vrot.lane.b32.xlu1 %v3556_v14, %s12980_s2  ;;  %v8071_v10 = vld [vmem:[%s10683_s24 + $0x20] sm:$0xff] }
 0x612   : > { %3601 = vrot.lane.b32.xlu0 %v3555_v62, %s12980_s2  ;;  %8993 = vmatprep.mubr.f32.mxu1 %v8071_v10 }
 0x667   : > { %v3576_v0 = vpop.permute.xlu1 %3575 }
 0x668   : > { %v3574_v38 = vpop.permute.xlu0 %3573  ;;  %v3622_v41 = vmax.f32 %v11827_v52, %v3576_v0 }
 0x669   : > { %v3621_v57 = vmax.f32 %v11831_v39, %v3574_v38 }
 0x66b   : > { %v3580_v20 = vpop.permute.xlu1 %3579  ;;  %8937 = vmatprep.mubr.msk.f32.mxu0 %vm3540_vm5, %v3621_v57 }
 0x66c   : > { %8938 = vmatmul.mubr.msk.f32.vlgmr.msra.gmra.mrb[32].mxu0 %vm3540_vm5, %v3622_v41  ;;  %v3578_v6 = vpop.permute.xlu0 %3577  ;;  %v3624_v40 = vmax.f32 %v11839_v30, %v3580_v20  ;;  %v4228_v41 = vld [vmem:[%s10688_s30] sm:$0xff]  ;;  %v4230_v20 = vld [vmem:[%s10688_s30 + $0x10] sm:$0xff] }
 0x66d   : > { %v3623_v13 = vmax.f32 %v11843_v23, %v3578_v6  ;;  %v4229_v6 = vld [vmem:[%s10688_s30 + $0x8] sm:$0xff] }
 0x66f   : > { %v3584_v54 = vpop.permute.xlu1 %3583  ;;  %8940 = vmatprep.mubr.msk.f32.mxu0 %vm3540_vm5, %v3623_v13  ;;  %v4231_v13 = vld [vmem:[%s10688_s30 + $0x18] sm:$0xff] }
 0x670   : > { %8941 = vmatmul.mubr.msk.f32.gmra.mrb[34].mxu0 %vm3540_vm5, %v3624_v40  ;;  %v3582_v24 = vpop.permute.xlu0 %3581  ;;  %v3626_v31 = vmax.f32 %v11851_v49, %v3584_v54  ;;  %v4260_v40 = vld [vmem:[%s10693_s6] sm:$0xff] }
 0x671   : > { %v3625_v44 = vmax.f32 %v3545_v11, %v3582_v24  ;;  %v4288_v54 = vld [vmem:[%s13009_s11] sm:$0xff]  ;;  %v4261_v24 = vld [vmem:[%s10693_s6 + $0x8] sm:$0xff] }
 0x673   : > { %v3588_v32 = vpop.permute.xlu1 %3587  ;;  %8943 = vmatprep.mubr.msk.f32.mxu0 %vm3540_vm5, %v3625_v44  ;;  %v4262_v44 = vld [vmem:[%s10693_s6 + $0x10] sm:$0xff] }
 0x674   : > { %8944 = vmatmul.mubr.msk.f32.gmra.mrb[36].mxu0 %vm3540_vm5, %v3626_v31  ;;  %v3586_v58 = vpop.permute.xlu0 %3585  ;;  %v3628_v12 = vmax.f32 %v3548_v45, %v3588_v32  ;;  %v4289_v31 = vld [vmem:[%s13009_s11 + $0x8] sm:$0xff]  ;;  %v4290_v32 = vld [vmem:[%s13009_s11 + $0x10] sm:$0xff] }
 0x675   : > { %v3627_v17 = vmax.f32 %v3547_v60, %v3586_v58  ;;  %v4263_v58 = vld [vmem:[%s10693_s6 + $0x18] sm:$0xff] }
 0x677   : > { %v3592_v34 = vpop.permute.xlu1 %3591  ;;  %8946 = vmatprep.mubr.msk.f32.mxu0 %vm3540_vm5, %v3627_v17  ;;  %v4291_v17 = vld [vmem:[%s13009_s11 + $0x18] sm:$0xff] }
 0x678   : > { %8947 = vmatmul.mubr.msk.f32.gmra.mrb[38].mxu0 %vm3540_vm5, %v3628_v12  ;;  %v3590_v52 = vpop.permute.xlu0 %3589  ;;  %v3630_v39 = vmax.f32 %v3550_v19, %v3592_v34 }
 0x679   : > { %v3629_v35 = vmax.f32 %v3549_v22, %v3590_v52 }
 0x67b   : > { %v3596_v46 = vpop.permute.xlu1 %3595  ;;  %8949 = vmatprep.mubr.msk.f32.mxu0 %vm3540_vm5, %v3629_v35 }
 0x67c   : > { %8950 = vmatmul.mubr.msk.f32.gmra.mrb[40].mxu0 %vm3540_vm5, %v3630_v39  ;;  %v3594_v4 = vpop.permute.xlu0 %3593  ;;  %v3632_v30 = vmax.f32 %v3552_v63, %v3596_v46 }
 0x67d   : > { %v3631_v36 = vmax.f32 %v3551_v7, %v3594_v4 }
 0x67f   : > { %v3600_v61 = vpop.permute.xlu1 %3599  ;;  %8952 = vmatprep.mubr.msk.f32.mxu0 %vm3540_vm5, %v3631_v36 }
 0x680   : > { %8953 = vmatmul.mubr.msk.f32.gmra.mrb[42].mxu0 %vm3540_vm5, %v3632_v30  ;;  %v3598_v23 = vpop.permute.xlu0 %3597  ;;  %v3634_v53 = vmax.f32 %v3554_v59, %v3600_v61 }
 0x681   : > { %v3633_v37 = vmax.f32 %v3553_v55, %v3598_v23 }
 0x683   : > { %v3604_v8 = vpop.permute.xlu1 %3603  ;;  %8955 = vmatprep.mubr.msk.f32.mxu0 %vm3540_vm5, %v3633_v37 }
 0x684   : > { %8956 = vmatmul.mubr.msk.f32.gmra.mrb[44].mxu0 %vm3540_vm5, %v3634_v53  ;;  %v3602_v49 = vpop.permute.xlu0 %3601  ;;  %v3636_v11 = vmax.f32 %v3556_v14, %v3604_v8 }
 0x685   : > { %v3635_v5 = vmax.f32 %v3555_v62, %v3602_v49 }
 0x687   : > { %8958 = vmatprep.mubr.msk.f32.mxu0 %vm3540_vm5, %v3635_v5 }
 0x688   : > { %8959 = vmatmul.mubr.msk.f32.gmra.mrb[46].mxu0 %vm3540_vm5, %v3636_v11 }
 0x73f   : > { %v8939_v48 = vpop.f32.mrb[32].mxu0 }
 0x740   : > { %v3764_v9 = vpop.f32.mrb[33].mxu0 }
 0x741   : > { %v10352_v18 = vpack.i.bf16 %v8939_v48, %v3764_v9  ;;  %v11909_v45 = vpack.c.bf16 %v8939_v48, %v3764_v9 }
 0x743   : > { %10313 = vrot.lane.b32.xlu0 %v10352_v18, %s12980_s2  ;;  %v8942_v26 = vpop.f32.mrb[34].mxu0 }
 0x744   : > { %v3774_v60 = vpop.f32.mrb[35].mxu0 }
 0x745   : > { %v10357_v51 = vpack.i.bf16 %v8942_v26, %v3774_v60  ;;  %v11912_v25 = vpack.c.bf16 %v8942_v26, %v3774_v60 }
 0x747   : > { %10318 = vrot.lane.b32.xlu1 %v10357_v51, %s12980_s2  ;;  %v8945_v29 = vpop.f32.mrb[36].mxu0 }
 0x748   : > { %v3784_v19 = vpop.f32.mrb[37].mxu0 }
 0x749   : > { %v10362_v43 = vpack.i.bf16 %v8945_v29, %v3784_v19  ;;  %v11915_v22 = vpack.c.bf16 %v8945_v29, %v3784_v19 }
 0x74b   : > { %10323 = vrot.lane.b32.xlu0 %v10362_v43, %s12980_s2  ;;  %v8948_v15 = vpop.f32.mrb[38].mxu0 }
 0x74c   : > { %v3794_v56 = vpop.f32.mrb[39].mxu0 }
 0x74d   : > { %v10367_v2 = vpack.i.bf16 %v8948_v15, %v3794_v56  ;;  %v11918_v63 = vpack.c.bf16 %v8948_v15, %v3794_v56 }
 0x74f   : > { %10328 = vrot.lane.b32.xlu1 %v10367_v2, %s12980_s2  ;;  %v8951_v21 = vpop.f32.mrb[40].mxu0 }
 0x750   : > { %v3804_v7 = vpop.f32.mrb[41].mxu0 }
 0x751   : > { %v10372_v3 = vpack.i.bf16 %v8951_v21, %v3804_v7  ;;  %v11921_v28 = vpack.c.bf16 %v8951_v21, %v3804_v7 }
 0x753   : > { %10333 = vrot.lane.b32.xlu0 %v10372_v3, %s12980_s2  ;;  %v8954_v16 = vpop.f32.mrb[42].mxu0 }
 0x754   : > { %v3814_v59 = vpop.f32.mrb[43].mxu0 }
 0x755   : > { %v10377_v27 = vpack.i.bf16 %v8954_v16, %v3814_v59  ;;  %v11924_v55 = vpack.c.bf16 %v8954_v16, %v3814_v59  ;;  %v8072_v16 = vld [vmem:[%s10683_s24 + $0x28] sm:$0xff]  ;;  %v8073_v59 = vld [vmem:[%s10683_s24 + $0x30] sm:$0xff] }
 0x757   : > { %10338 = vrot.lane.b32.xlu1 %v10377_v27, %s12980_s2  ;;  %v8957_v42 = vpop.f32.mrb[44].mxu0 }
 0x758   : > { %v3824_v47 = vpop.f32.mrb[45].mxu0 }
 0x759   : > { %v10382_v1 = vpack.i.bf16 %v8957_v42, %v3824_v47  ;;  %v11927_v14 = vpack.c.bf16 %v8957_v42, %v3824_v47  ;;  %v3843_v42 = vld [vmem:[%s10683_s24] sm:$0xff] }
 0x75b   : > { %10343 = vrot.lane.b32.xlu0 %v10382_v1, %s12980_s2  ;;  %v8960_v62 = vpop.f32.mrb[46].mxu0 }
 0x75c   : > { %v3834_v0 = vpop.f32.mrb[47].mxu0 }
 0x75d   : > { %v10387_v38 = vpack.i.bf16 %v8960_v62, %v3834_v0  ;;  %v11931_v57 = vpack.c.bf16 %v8960_v62, %v3834_v0  ;;  %v3844_v62 = vld [vmem:[%s10683_s24 + $0x8] sm:$0xff] }
 0x75f   : > { %10353 = vrot.lane.b32.xlu0 %v10352_v18, %s12978_s10  ;;  %10348 = vrot.lane.b32.xlu1 %v10387_v38, %s12980_s2 }
 0x763   : > { %10363 = vrot.lane.b32.xlu0 %v10362_v43, %s12978_s10  ;;  %10358 = vrot.lane.b32.xlu1 %v10357_v51, %s12978_s10 }
 0x767   : > { %10373 = vrot.lane.b32.xlu0 %v10372_v3, %s12978_s10  ;;  %10368 = vrot.lane.b32.xlu1 %v10367_v2, %s12978_s10 }
 0x76b   : > { %10383 = vrot.lane.b32.xlu0 %v10382_v1, %s12978_s10  ;;  %10378 = vrot.lane.b32.xlu1 %v10377_v27, %s12978_s10  ;;  %v8074_v27 = vld [vmem:[%s10683_s24 + $0x38] sm:$0xff] }
 0x76f   : > { %4234 = vperm.xlu0 %10230, %v4228_v41   ;;  %10388 = vrot.lane.b32.xlu1 %v10387_v38, %s12978_s10 }
 0x773   : > { %4244 = vperm.xlu0 %10230, %v4230_v20   ;;  %4239 = vperm.xlu1 %10231, %v4229_v6   ;;  %v8075_v6 = vld [vmem:[%s10683_s24 + $0x40] sm:$0xff] }
 0x777   : > { %4249 = vperm.xlu0 %10230, %v4231_v13   ;;  %4266 = vperm.xlu1 %10231, %v4260_v40  }
 0x77b   : > { %4294 = vperm.xlu0 %10230, %v4288_v54   ;;  %4271 = vperm.xlu1 %10231, %v4261_v24  }
 0x77f   : > { %4276 = vperm.xlu0 %10230, %v4262_v44   ;;  %4299 = vperm.xlu1 %10231, %v4289_v31  }
 0x783   : > { %4304 = vperm.xlu0 %10230, %v4290_v32   ;;  %4281 = vperm.xlu1 %10231, %v4263_v58  }
 0x787   : > { %4309 = vperm.xlu1 %10231, %v4291_v17  }
 0x7b5   : > { %v10314_v12 = vpop.permute.xlu0 %10313 }
 0x7b6   : > { %v10316_v34 = vunpack.i.h.bf16 %v10314_v12  ;;  %v10315_v52 = vunpack.i.l.bf16 %v10314_v12 }
 0x7b8   : > { %v9724_v35 = vpack.c.bf16 %v10316_v34, %v10315_v52 }
 0x7b9   : > { %v10319_v39 = vpop.permute.xlu1 %10318 }
 0x7ba   : > { %v10321_v46 = vunpack.i.h.bf16 %v10319_v39  ;;  %v10320_v4 = vunpack.i.l.bf16 %v10319_v39  ;;  %9725 = vmatprep.subr.bf16.mxu1 %v9724_v35 }
 0x7bb   : > { %9727 = vmatpush3.bf16.msra.mxu1 %v9724_v35 }
 0x7bc   : > { %v9728_v36 = vpack.c.bf16 %v10321_v46, %v10320_v4 }
 0x7bd   : > { %v10324_v30 = vpop.permute.xlu0 %10323 }
 0x7be   : > { %v10326_v61 = vunpack.i.h.bf16 %v10324_v30  ;;  %v10325_v23 = vunpack.i.l.bf16 %v10324_v30  ;;  %9729 = vmatprep.subr.bf16.mxu1 %v9728_v36 }
 0x7bf   : > { %9731 = vmatpush3.bf16.msra.mxu1 %v9728_v36 }
 0x7c0   : > { %v9732_v37 = vpack.c.bf16 %v10326_v61, %v10325_v23  ;;  %v8076_v23 = vld [vmem:[%s10683_s24 + $0x48] sm:$0xff] }
 0x7c1   : > { %v10329_v53 = vpop.permute.xlu1 %10328 }
 0x7c2   : > { %v10331_v8 = vunpack.i.h.bf16 %v10329_v53  ;;  %v10330_v49 = vunpack.i.l.bf16 %v10329_v53  ;;  %9733 = vmatprep.subr.bf16.mxu1 %v9732_v37  ;;  %v8078_v53 = vld [vmem:[%s10683_s24 + $0x58] sm:$0xff] }
 0x7c3   : > { %9735 = vmatpush3.bf16.msra.mxu1 %v9732_v37  ;;  %v8077_v37 = vld [vmem:[%s10683_s24 + $0x50] sm:$0xff] }
 0x7c4   : > { %v9736_v5 = vpack.c.bf16 %v10331_v8, %v10330_v49 }
 0x7c5   : > { %v10334_v11 = vpop.permute.xlu0 %10333 }
 0x7c6   : > { %v10336_v48 = vunpack.i.h.bf16 %v10334_v11  ;;  %v10335_v9 = vunpack.i.l.bf16 %v10334_v11  ;;  %9737 = vmatprep.subr.bf16.mxu1 %v9736_v5 }
 0x7c7   : > { %9739 = vmatpush3.bf16.msra.mxu1 %v9736_v5 }
 0x7c8   : > { %v9740_v18 = vpack.c.bf16 %v10336_v48, %v10335_v9 }
 0x7c9   : > { %v10339_v26 = vpop.permute.xlu1 %10338 }
 0x7ca   : > { %v10341_v60 = vunpack.i.h.bf16 %v10339_v26  ;;  %v10340_v51 = vunpack.i.l.bf16 %v10339_v26  ;;  %9741 = vmatprep.subr.bf16.mxu1 %v9740_v18 }
 0x7cb   : > { %9743 = vmatpush3.bf16.msra.mxu1 %v9740_v18 }
 0x7cc   : > { %v9744_v29 = vpack.c.bf16 %v10341_v60, %v10340_v51 }
 0x7cd   : > { %v10344_v19 = vpop.permute.xlu0 %10343 }
 0x7ce   : > { %v10346_v43 = vunpack.i.h.bf16 %v10344_v19  ;;  %v10345_v15 = vunpack.i.l.bf16 %v10344_v19  ;;  %9745 = vmatprep.subr.bf16.mxu1 %v9744_v29 }
 0x7cf   : > { %9747 = vmatpush3.bf16.msra.mxu1 %v9744_v29 }
 0x7d0   : > { %v9748_v56 = vpack.c.bf16 %v10346_v43, %v10345_v15  ;;  %v4361_v15 = vld [vmem:[%s13010_s16] sm:$0xff] }
 0x7d1   : > { %v10349_v2 = vpop.permute.xlu1 %10348 }
 0x7d2   : > { %v10351_v21 = vunpack.i.h.bf16 %v10349_v2  ;;  %v10350_v7 = vunpack.i.l.bf16 %v10349_v2  ;;  %9749 = vmatprep.subr.bf16.mxu1 %v9748_v56  ;;  %v4363_v2 = vld [vmem:[%s13010_s16 + $0x10] sm:$0xff] }
 0x7d3   : > { %9751 = vmatpush3.bf16.msra.mxu1 %v9748_v56  ;;  %v4362_v56 = vld [vmem:[%s13010_s16 + $0x8] sm:$0xff] }
 0x7d4   : > { %v9752_v3 = vpack.c.bf16 %v10351_v21, %v10350_v7 }
 0x7d6   : > { %9753 = vmatprep.subr.bf16.mxu1 %v9752_v3 }
 0x7d7   : > { %9755 = vmatpush3.bf16.msra.mxu1 %v9752_v3 }
 0x7d8   : > { %9757 = vmatprep.subr.bf16.mxu1 %v11909_v45 }
 0x7da   : > { %8994 = vmatmul.mubr.f32.vlgmr.msra.gmra.mrb[16].mxu1 %v8072_v16  ;;  %v9820_v16 = vpack.c.bf16 %v4362_v56, %v4361_v15  ;;  %v4488_v15 = vld [vmem:[%s13012_s18 + $0x28] sm:$0xff]  ;;  %v5254_v56 = vld [vmem:[%s13013_s23 + $0x10] sm:$0xff] }
 0x7db   : > { %9759 = vmatpush3.bf16.msra.mxu1 %v11909_v45  ;;  %8996 = vmatprep.mubr.f32.mxu1 %v8073_v59  ;;  %v10354_v45 = vpop.permute.xlu0 %10353  ;;  %v4364_v59 = vld [vmem:[%s13010_s16 + $0x18] sm:$0xff] }
 0x7dc   : > { %9761 = vmatprep.subr.bf16.mxu1 %v11912_v25  ;;  %v10355_v47 = vunpack.i.l.bf16 %v10354_v45  ;;  %9821 = vmatprep.subr.bf16.mxu0 %v9820_v16 }
 0x7dd   : > { %9823 = vmatpush3.bf16.msra.mxu0 %v9820_v16  ;;  %v4490_v16 = vld [vmem:[%s13012_s18 + $0x38] sm:$0xff] }
 0x7de   : > { %8997 = vmatmul.mubr.f32.gmra.mrb[18].mxu1 %v8074_v27 }
 0x7df   : > { %9763 = vmatpush3.bf16.msra.mxu1 %v11912_v25  ;;  %9031 = vmatprep.mubr.f32.mxu1 %v3843_v42  ;;  %v10356_v25 = vunpack.i.h.bf16 %v10354_v45  ;;  %v10364_v10 = vpop.permute.xlu0 %10363 }
 0x7e0   : > { %9765 = vmatprep.subr.bf16.mxu1 %v11915_v22  ;;  %v10366_v0 = vunpack.i.h.bf16 %v10364_v10  ;;  %v10365_v38 = vunpack.i.l.bf16 %v10364_v10 }
 0x7e2   : > { %v9796_v54 = vpack.c.bf16 %v10366_v0, %v10365_v38  ;;  %v4365_v0 = vld [vmem:[%s13010_s16 + $0x20] sm:$0x3] }
 0x7e3   : > { %9767 = vmatpush3.bf16.msra.mxu1 %v11915_v22  ;;  %v10359_v22 = vpop.permute.xlu1 %10358  ;;  %v10374_v24 = vpop.permute.xlu0 %10373 }
 0x7e4   : > { %9769 = vmatprep.subr.bf16.mxu1 %v11918_v63  ;;  %v10360_v1 = vunpack.i.l.bf16 %v10359_v22  ;;  %v10375_v44 = vunpack.i.l.bf16 %v10374_v24 }
 0x7e7   : > { %9771 = vmatpush3.bf16.msra.mxu1 %v11918_v63  ;;  %v10361_v63 = vunpack.i.h.bf16 %v10359_v22  ;;  %v10369_v20 = vpop.permute.xlu1 %10368  ;;  %v10384_v34 = vpop.permute.xlu0 %10383 }
 0x7e8   : > { %9773 = vmatprep.subr.bf16.mxu1 %v11921_v28  ;;  %v10371_v13 = vunpack.i.h.bf16 %v10369_v20  ;;  %v10370_v40 = vunpack.i.l.bf16 %v10369_v20  ;;  %v10386_v52 = vunpack.i.h.bf16 %v10384_v34  ;;  %v10385_v35 = vunpack.i.l.bf16 %v10384_v34 }
 0x7e9   : > { %v9792_v41 = vpack.c.bf16 %v10361_v63, %v10360_v1 }
 0x7ea   : > { %v9800_v31 = vpack.c.bf16 %v10371_v13, %v10370_v40  ;;  %v9812_v30 = vpack.c.bf16 %v10386_v52, %v10385_v35 }
 0x7eb   : > { %9775 = vmatpush3.bf16.msra.mxu1 %v11921_v28  ;;  %v9788_v28 = vpack.c.bf16 %v10356_v25, %v10355_v47  ;;  %v10379_v32 = vpop.permute.xlu1 %10378  ;;  %v9824_v47 = vpack.c.bf16 %v4364_v59, %v4363_v2  ;;  %v5366_v2 = vld [vmem:[%s13014_s22 + $0x10] sm:$0xff]  ;;  %v5256_v59 = vld [vmem:[%s13013_s23 + $0x20] sm:$0xff] }
 0x7ec   : > { %9777 = vmatprep.subr.bf16.mxu1 %v11924_v55  ;;  %v10381_v58 = vunpack.i.h.bf16 %v10379_v32  ;;  %v10380_v17 = vunpack.i.l.bf16 %v10379_v32 }
 0x7ed   : > { %9825 = vmatprep.subr.bf16.mxu0 %v9824_v47 }
 0x7ee   : > { %v9808_v39 = vpack.c.bf16 %v10381_v58, %v10380_v17  ;;  %v4235_v49 = vpop.permute.xlu0 %4234  ;;  %9827 = vmatpush3.bf16.msra.mxu0 %v9824_v47  ;;  %v4492_v47 = vld [vmem:[%s13012_s18 + $0x48] sm:$0xff] }
 0x7ef   : > { %9779 = vmatpush3.bf16.msra.mxu1 %v11924_v55  ;;  %v3845_v55 = vld [vmem:[%s10683_s24 + $0x10] sm:$0xff]  ;;  %v10389_v46 = vpop.permute.xlu1 %10388  ;;  %9083 = vmatprep.subr.msk.mxu0 %vm3694_vm4, %v4365_v0 }
 0x7f0   : > { %9781 = vmatprep.subr.bf16.mxu1 %v11927_v14  ;;  %v10391_v4 = vunpack.i.h.bf16 %v10389_v46  ;;  %v10390_v36 = vunpack.i.l.bf16 %v10389_v46 }
 0x7f2   : > { %v9816_v61 = vpack.c.bf16 %v10391_v4, %v10390_v36  ;;  %v4245_v11 = vpop.permute.xlu0 %4244  ;;  %9084 = vmatpush3.msk.msra.mxu0 %vm3694_vm4, %v4365_v0  ;;  %v5372_v0 = vld [vmem:[%s13014_s22 + $0x40] sm:$0xff] }
 0x7f3   : > { %9783 = vmatpush3.bf16.msra.mxu1 %v11927_v14  ;;  %v3846_v14 = vld [vmem:[%s10683_s24 + $0x18] sm:$0xff]  ;;  %v4240_v8 = vpop.permute.xlu1 %4239 }
 0x7f4   : > { %9785 = vmatprep.subr.bf16.mxu1 %v11931_v57 }
 0x7f6   : > { %v4250_v9 = vpop.permute.xlu0 %4249 }
 0x7f7   : > { %9787 = vmatpush3.bf16.msra.mxu1 %v11931_v57  ;;  %v10376_v57 = vunpack.i.h.bf16 %v10374_v24  ;;  %v4267_v5 = vpop.permute.xlu1 %4266 }
 0x7f8   : > { %9789 = vmatprep.subr.bf16.mxu1 %v9788_v28 }
 0x7f9   : > { %v9804_v12 = vpack.c.bf16 %v10376_v57, %v10375_v44 }
 0x7fa   : > { %9032 = vmatmul.mubr.f32.vlgmr.msra.gmra.mrb[16].mxu1 %v3844_v62  ;;  %v4295_v26 = vpop.permute.xlu0 %4294 }
 0x7fb   : > { %9791 = vmatpush3.bf16.msra.mxu1 %v9788_v28  ;;  %9034 = vmatprep.mubr.f32.mxu1 %v3845_v55  ;;  %v4272_v48 = vpop.permute.xlu1 %4271 }
 0x7fc   : > { %9793 = vmatprep.subr.bf16.mxu1 %v9792_v41 }
 0x7fe   : > { %9035 = vmatmul.mubr.f32.gmra.mrb[18].mxu1 %v3846_v14  ;;  %v4277_v27 = vpop.permute.xlu0 %4276 }
 0x7ff   : > { %9795 = vmatpush3.bf16.msra.mxu1 %v9792_v41  ;;  %9069 = vmatprep.mubr.f32.mxu1 %v8075_v6  ;;  %v4300_v18 = vpop.permute.xlu1 %4299 }
 0x800   : > { %9797 = vmatprep.subr.bf16.mxu1 %v9796_v54 }
 0x802   : > { %v4305_v20 = vpop.permute.xlu0 %4304 }
 0x803   : > { %9799 = vmatpush3.bf16.msra.mxu1 %v9796_v54  ;;  %v4282_v21 = vpop.permute.xlu1 %4281 }
 0x804   : > { %9801 = vmatprep.subr.bf16.mxu1 %v9800_v31 }
 0x807   : > { %9803 = vmatpush3.bf16.msra.mxu1 %v9800_v31  ;;  %v4310_v38 = vpop.permute.xlu1 %4309 }
 0x808   : > { %9805 = vmatprep.subr.bf16.mxu1 %v9804_v12 }
 0x80b   : > { %9807 = vmatpush3.bf16.msra.mxu1 %v9804_v12 }
 0x80c   : > { %9809 = vmatprep.subr.bf16.mxu1 %v9808_v39 }
 0x80f   : > { %9811 = vmatpush3.bf16.msra.mxu1 %v9808_v39 }
 0x810   : > { %9813 = vmatprep.subr.bf16.mxu1 %v9812_v30 }
 0x813   : > { %9815 = vmatpush3.bf16.msra.mxu1 %v9812_v30 }
 0x814   : > { %9817 = vmatprep.subr.bf16.mxu1 %v9816_v61 }
 0x817   : > { %9819 = vmatpush3.bf16.msra.mxu1 %v9816_v61 }
 0x81a   : > { %9070 = vmatmul.mubr.f32.vlgmr.msra.gmra.mrb[16].mxu1 %v8076_v23 }
 0x81b   : > { %9072 = vmatprep.mubr.f32.mxu1 %v8077_v37 }
 0x81e   : > { %9073 = vmatmul.mubr.f32.gmra.mrb[18].mxu1 %v8078_v53  ;;  %v8084_v53 = vld [vmem:[%s13011_s15 + $0x80] sm:$0xff] }
 0x8ed   : > { %v9071_v60 = vpop.f32.mrb[16].mxu1 }
 0x8ee   : > { %v4253_v51 = vadd.f32 %v9071_v60, %v4240_v8  ;;  %v4205_v29 = vpop.f32.mrb[17].mxu1  ;;  %v5252_v60 = vld [vmem:[%s13013_s23] sm:$0xff] }
 0x8ef   : > { %v4252_v19 = vadd.f32 %v4235_v49, %v4205_v29  ;;  %v5253_v29 = vld [vmem:[%s13013_s23 + $0x8] sm:$0xff] }
 0x8f0   : > { %v4257_v43 = vmax.f32 %v4253_v51, 0.0  ;;  %v5364_v51 = vld [vmem:[%s13014_s22] sm:$0xff] }
 0x8f1   : > { %v4256_v7 = vmax.f32 %v4252_v19, 0.0  ;;  %v9074_v3 = vpop.f32.mrb[18].mxu1  ;;  %v4487_v19 = vld [vmem:[%s13012_s18 + $0x20] sm:$0xff] }
 0x8f2   : > { %v4285_v42 = vmul.f32 %v4272_v48, %v4257_v43  ;;  %v4255_v45 = vadd.f32 %v9074_v3, %v4250_v9  ;;  %v4215_v25 = vpop.f32.mrb[19].mxu1  ;;  %v4483_v48 = vld [vmem:[%s13012_s18] sm:$0xff]  ;;  %v4485_v9 = vld [vmem:[%s13012_s18 + $0x10] sm:$0xff]  ;;  %v5365_v43 = vld [vmem:[%s13014_s22 + $0x8] sm:$0xff] }
 0x8f3   : > { %v4284_v22 = vmul.f32 %v4267_v5, %v4256_v7  ;;  %v4254_v63 = vadd.f32 %v4245_v11, %v4215_v25  ;;  %v4489_v7 = vld [vmem:[%s13012_s18 + $0x30] sm:$0xff]  ;;  %v5367_v3 = vld [vmem:[%s13014_s22 + $0x18] sm:$0xff]  ;;  %v5369_v25 = vld [vmem:[%s13014_s22 + $0x28] sm:$0xff] }
 0x8f4   : > { %v4313_v1 = vadd.f32 %v4300_v18, %v4285_v42  ;;  %v4259_v28 = vmax.f32 %v4255_v45, 0.0  ;;  %v4484_v18 = vld [vmem:[%s13012_s18 + $0x8] sm:$0xff]  ;;  %v4491_v45 = vld [vmem:[%s13012_s18 + $0x40] sm:$0xff] }
 0x8f5   : > { %v4312_v10 = vadd.f32 %v4295_v26, %v4284_v22  ;;  %v4258_v62 = vmax.f32 %v4254_v63, 0.0  ;;  %v4486_v26 = vld [vmem:[%s13012_s18 + $0x18] sm:$0xff]  ;;  %v5257_v42 = vld [vmem:[%s13013_s23 + $0x28] sm:$0xff]  ;;  %v5258_v22 = vld [vmem:[%s13013_s23 + $0x30] sm:$0xff] }
 0x8f6   : > { %v4287_v55 = vmul.f32 %v4282_v21, %v4259_v28  ;;  %4322 = vrot.lane.b32.xlu1 %v4313_v1, %s10615_s7  ;;  %v5255_v21 = vld [vmem:[%s13013_s23 + $0x18] sm:$0xff]  ;;  %v5370_v63 = vld [vmem:[%s13014_s22 + $0x30] sm:$0xff] }
 0x8f7   : > { %v4286_v41 = vmul.f32 %v4277_v27, %v4258_v62  ;;  %4320 = vrot.lane.b32.xlu0 %v4312_v10, %s10615_s7  ;;  %v5368_v27 = vld [vmem:[%s13014_s22 + $0x20] sm:$0xff]  ;;  %v5259_v1 = vld [vmem:[%s13013_s23 + $0x38] sm:$0xff]  ;;  %v4493_v28 = vld [vmem:[%s13012_s18 + $0x50] sm:$0xff] }
 0x8f8   : > { %v4315_v14 = vadd.f32 %v4310_v38, %v4287_v55  ;;  %v5371_v10 = vld [vmem:[%s13014_s22 + $0x38] sm:$0xff]  ;;  %v5260_v55 = vld [vmem:[%s13013_s23 + $0x40] sm:$0xff]  ;;  %v5261_v38 = vld [vmem:[%s13013_s23 + $0x48] sm:$0xff] }
 0x8f9   : > { %v4314_v6 = vadd.f32 %v4305_v20, %v4286_v41  ;;  %v4494_v62 = vld [vmem:[%s13012_s18 + $0x58] sm:$0xff]  ;;  %v4495_v41 = vld [vmem:[%s13012_s18 + $0x60] sm:$0xff]  ;;  %v5373_v20 = vld [vmem:[%s13014_s22 + $0x48] sm:$0xff] }
 0x8fa   : > { %4326 = vrot.lane.b32.xlu1 %v4315_v14, %s10615_s7  ;;  %v4496_v14 = vld [vmem:[%s13012_s18 + $0x68] sm:$0xff] }
 0x8fb   : > { %4324 = vrot.lane.b32.xlu0 %v4314_v6, %s10615_s7  ;;  %v5262_v6 = vld [vmem:[%s13013_s23 + $0x50] sm:$0xff]  ;;  %s13039_s7 = sld [smem:[#allocation12_spill]] }
 0x968   : > { %v4323_v13 = vpop.permute.xlu1 %4322 }
 0x969   : > { %v4333_v40 = vsel %vm2072_vm2, -1e+30, %v4323_v13  ;;  %v4321_v54 = vpop.permute.xlu0 %4320  ;;  %v5374_v13 = vld [vmem:[%s13014_s22 + $0x50] sm:$0xff] }
 0x96a   : > { %v4338_v24 = vsel %vm4336_vm6, %v4333_v40, -1e+30  ;;  %v4332_v57 = vsel %vm2072_vm2, -1e+30, %v4321_v54  ;;  %v5263_v40 = vld [vmem:[%s13013_s23 + $0x58] sm:$0xff]  ;;  %v4497_v54 = vld [vmem:[%s13012_s18 + $0x70] sm:$0xff] }
 0x96b   : > { %v4337_v44 = vsel %vm4336_vm6, %v4332_v57, -1e+30  ;;  %4347 = vrot.lane.b32.xlu1 %v4338_v24, %s12980_s2  ;;  %v4498_v57 = vld [vmem:[%s13012_s18 + $0x78] sm:$0xff] }
 0x96c   : > { %v4327_v31 = vpop.permute.xlu1 %4326  ;;  %4345 = vrot.lane.b32.xlu0 %v4337_v44, %s12980_s2 }
 0x96d   : > { %v4335_v32 = vsel %vm2072_vm2, -1e+30, %v4327_v31  ;;  %v4325_v58 = vpop.permute.xlu0 %4324  ;;  %v5376_v31 = vld [vmem:[%s13014_s22 + $0x60] sm:$0xff] }
 0x96e   : > { %v4340_v17 = vsel %vm4336_vm6, %v4335_v32, -1e+30  ;;  %v4334_v12 = vsel %vm2072_vm2, -1e+30, %v4325_v58  ;;  %v5265_v32 = vld [vmem:[%s13013_s23 + $0x68] sm:$0xff]  ;;  %v5266_v58 = vld [vmem:[%s13013_s23 + $0x70] sm:$0xff] }
 0x96f   : > { %v4339_v34 = vsel %vm4336_vm6, %v4334_v12, -1e+30  ;;  %4351 = vrot.lane.b32.xlu1 %v4340_v17, %s12980_s2  ;;  %v5378_v12 = vld [vmem:[%s13014_s22 + $0x70] sm:$0xff] }
 0x970   : > { %4349 = vrot.lane.b32.xlu0 %v4339_v34, %s12980_s2 }
 0x9dd   : > { %v4348_v52 = vpop.permute.xlu1 %4347 }
 0x9de   : > { %v4346_v35 = vpop.permute.xlu0 %4345  ;;  %v4358_v46 = vmax.f32 %v4338_v24, %v4348_v52  ;;  %v5375_v24 = vld [vmem:[%s13014_s22 + $0x58] sm:$0xff] }
 0x9df   : > { %v4357_v39 = vmax.f32 %v4337_v44, %v4346_v35  ;;  %v5264_v44 = vld [vmem:[%s13013_s23 + $0x60] sm:$0xff]  ;;  %v5379_v52 = vld [vmem:[%s13014_s22 + $0x78] sm:$0xff] }
 0x9e1   : > { %v4352_v4 = vpop.permute.xlu1 %4351  ;;  %9085 = vmatprep.mubr.msk.f32.mxu0 %vm4336_vm6, %v4357_v39 }
 0x9e2   : > { %9086 = vmatmul.mubr.msk.f32.vlgmr.msra.gmra.mrb[48].mxu0 %vm4336_vm6, %v4358_v46  ;;  %v4350_v36 = vpop.permute.xlu0 %4349  ;;  %v4360_v61 = vmax.f32 %v4340_v17, %v4352_v4  ;;  %v5377_v17 = vld [vmem:[%s13014_s22 + $0x68] sm:$0xff] }
 0x9e3   : > { %v4359_v30 = vmax.f32 %v4339_v34, %v4350_v36  ;;  %v5267_v34 = vld [vmem:[%s13013_s23 + $0x78] sm:$0xff] }
 0x9e5   : > { %9088 = vmatprep.mubr.msk.f32.mxu0 %vm4336_vm6, %v4359_v30 }
 0x9e6   : > { %9089 = vmatmul.mubr.msk.f32.gmra.mrb[50].mxu0 %vm4336_vm6, %v4360_v61 }
 0x9e7   : > { %9099 = vmatprep.mubr.msk.f32.mxu0 %vm4595_vm7, %v8084_v53  ;;  %v8085_v53 = vld [vmem:[%s13011_s15 + $0x88] sm:$0xff] }
 0xab5   : > { %v9087_v23 = vpop.f32.mrb[48].mxu0 }
 0xab6   : > { %v4447_v37 = vpop.f32.mrb[49].mxu0 }
 0xab7   : > { %v10402_v8 = vpack.i.bf16 %v9087_v23, %v4447_v37 }
 0xab9   : > { %10393 = vrot.lane.b32.xlu0 %v10402_v8, %s12980_s2  ;;  %v9090_v49 = vpop.f32.mrb[50].mxu0 }
 0xaba   : > { %v4457_v5 = vpop.f32.mrb[51].mxu0 }
 0xabb   : > { %v10407_v11 = vpack.i.bf16 %v9090_v49, %v4457_v5 }
 0xabd   : > { %10403 = vrot.lane.b32.xlu0 %v10402_v8, %s12978_s10  ;;  %10398 = vrot.lane.b32.xlu1 %v10407_v11, %s12980_s2  ;;  %v8086_v8 = vld [vmem:[%s13011_s15 + $0x90] sm:$0xff] }
 0xac1   : > { %4501 = vperm.xlu0 %10230, %v4483_v48   ;;  %10408 = vrot.lane.b32.xlu1 %v10407_v11, %s12978_s10  ;;  %v8087_v11 = vld [vmem:[%s13011_s15 + $0x98] sm:$0xff]  ;;  %v8088_v48 = vld [vmem:[%s13011_s15 + $0xa0] sm:$0xff] }
 0xac5   : > { %4511 = vperm.xlu0 %10230, %v4485_v9   ;;  %4506 = vperm.xlu1 %10231, %v4484_v18   ;;  %v8089_v18 = vld [vmem:[%s13011_s15 + $0xa8] sm:$0xff] }
 0xac9   : > { %4516 = vperm.xlu0 %10230, %v4486_v26   ;;  %5270 = vperm.xlu1 %10231, %v5252_v60   ;;  %v8090_v26 = vld [vmem:[%s13011_s15 + $0xb0] sm:$0xff]  ;;  %v8091_v60 = vld [vmem:[%s13011_s15 + $0xb8] sm:$0xff] }
 0xacd   : > { %5382 = vperm.xlu0 %10230, %v5364_v51   ;;  %5275 = vperm.xlu1 %10231, %v5253_v29   ;;  %v8092_v51 = vld [vmem:[%s13011_s15 + $0xc0] sm:$0xff]  ;;  %v8093_v29 = vld [vmem:[%s13011_s15 + $0xc8] sm:$0xff] }
 0xad1   : > { %4521 = vperm.xlu0 %10230, %v4487_v19   ;;  %5387 = vperm.xlu1 %10231, %v5365_v43   ;;  %v8094_v19 = vld [vmem:[%s13011_s15 + $0xd0] sm:$0xff]  ;;  %v8095_v43 = vld [vmem:[%s13011_s15 + $0xd8] sm:$0xff] }
 0xad5   : > { %4526 = vperm.xlu0 %10230, %v4488_v15   ;;  %5280 = vperm.xlu1 %10231, %v5254_v56   ;;  %v8096_v15 = vld [vmem:[%s13011_s15 + $0xe0] sm:$0xff]  ;;  %v8097_v56 = vld [vmem:[%s13011_s15 + $0xe8] sm:$0xff] }
 0xad9   : > { %5392 = vperm.xlu0 %10230, %v5366_v2   ;;  %5285 = vperm.xlu1 %10231, %v5255_v21   ;;  %v8098_v2 = vld [vmem:[%s13011_s15 + $0xf0] sm:$0xff] }
 0xadd   : > { %4531 = vperm.xlu0 %10230, %v4489_v7   ;;  %5397 = vperm.xlu1 %10231, %v5367_v3   ;;  %v8099_v7 = vld [vmem:[%s13011_s15 + $0xf8] sm:$0xff]  ;;  %v8116_v3 = vld [vmem:[%s13011_s15 + $0x100] sm:$0xff] }
 0xae1   : > { %4536 = vperm.xlu0 %10230, %v4490_v16   ;;  %5290 = vperm.xlu1 %10231, %v5256_v59  }
 0xae5   : > { %5402 = vperm.xlu0 %10230, %v5368_v27   ;;  %5295 = vperm.xlu1 %10231, %v5257_v42   ;;  %v8117_v27 = vld [vmem:[%s13011_s15 + $0x108] sm:$0xff]  ;;  %v8118_v42 = vld [vmem:[%s13011_s15 + $0x110] sm:$0xff] }
 0xae9   : > { %4541 = vperm.xlu0 %10230, %v4491_v45   ;;  %5407 = vperm.xlu1 %10231, %v5369_v25   ;;  %v8119_v25 = vld [vmem:[%s13011_s15 + $0x118] sm:$0xff] }
 0xaed   : > { %4546 = vperm.xlu0 %10230, %v4492_v47   ;;  %5300 = vperm.xlu1 %10231, %v5258_v22   ;;  %v8120_v47 = vld [vmem:[%s13011_s15 + $0x120] sm:$0xff]  ;;  %v8121_v22 = vld [vmem:[%s13011_s15 + $0x128] sm:$0xff] }
 0xaf1   : > { %5412 = vperm.xlu0 %10230, %v5370_v63   ;;  %5305 = vperm.xlu1 %10231, %v5259_v1   ;;  %v8122_v63 = vld [vmem:[%s13011_s15 + $0x130] sm:$0xff]  ;;  %v8123_v1 = vld [vmem:[%s13011_s15 + $0x138] sm:$0xff] }
 0xaf5   : > { %4551 = vperm.xlu0 %10230, %v4493_v28   ;;  %5417 = vperm.xlu1 %10231, %v5371_v10   ;;  %v8124_v28 = vld [vmem:[%s13011_s15 + $0x140] sm:$0xff]  ;;  %v8125_v10 = vld [vmem:[%s13011_s15 + $0x148] sm:$0xff] }
 0xaf9   : > { %4556 = vperm.xlu0 %10230, %v4494_v62   ;;  %5310 = vperm.xlu1 %10231, %v5260_v55   ;;  %v8126_v62 = vld [vmem:[%s13011_s15 + $0x150] sm:$0xff]  ;;  %v8127_v55 = vld [vmem:[%s13011_s15 + $0x158] sm:$0xff] }
 0xafd   : > { %5422 = vperm.xlu0 %10230, %v5372_v0   ;;  %5315 = vperm.xlu1 %10231, %v5261_v38   ;;  %v8128_v0 = vld [vmem:[%s13011_s15 + $0x160] sm:$0xff]  ;;  %v8129_v38 = vld [vmem:[%s13011_s15 + $0x168] sm:$0xff] }
 0xb01   : > { %4561 = vperm.xlu0 %10230, %v4495_v41   ;;  %5427 = vperm.xlu1 %10231, %v5373_v20   ;;  %v8130_v41 = vld [vmem:[%s13011_s15 + $0x170] sm:$0xff]  ;;  %v8131_v20 = vld [vmem:[%s13011_s15 + $0x178] sm:$0xff] }
 0xb05   : > { %4566 = vperm.xlu0 %10230, %v4496_v14   ;;  %5320 = vperm.xlu1 %10231, %v5262_v6   ;;  %v4789_v14 = vld [vmem:[%s13011_s15] sm:$0xff]  ;;  %v4790_v6 = vld [vmem:[%s13011_s15 + $0x8] sm:$0xff] }
 0xb09   : > { %5432 = vperm.xlu0 %10230, %v5374_v13   ;;  %5325 = vperm.xlu1 %10231, %v5263_v40   ;;  %v4791_v13 = vld [vmem:[%s13011_s15 + $0x10] sm:$0xff]  ;;  %v4792_v40 = vld [vmem:[%s13011_s15 + $0x18] sm:$0xff] }
 0xb0d   : > { %4571 = vperm.xlu0 %10230, %v4497_v54   ;;  %5437 = vperm.xlu1 %10231, %v5375_v24   ;;  %v4793_v54 = vld [vmem:[%s13011_s15 + $0x20] sm:$0xff]  ;;  %v4794_v24 = vld [vmem:[%s13011_s15 + $0x28] sm:$0xff] }
 0xb11   : > { %4576 = vperm.xlu0 %10230, %v4498_v57   ;;  %5330 = vperm.xlu1 %10231, %v5264_v44   ;;  %v4795_v57 = vld [vmem:[%s13011_s15 + $0x30] sm:$0xff]  ;;  %v4796_v44 = vld [vmem:[%s13011_s15 + $0x38] sm:$0xff] }
 0xb15   : > { %5442 = vperm.xlu0 %10230, %v5376_v31   ;;  %5335 = vperm.xlu1 %10231, %v5265_v32   ;;  %v4797_v31 = vld [vmem:[%s13011_s15 + $0x40] sm:$0xff]  ;;  %v4798_v32 = vld [vmem:[%s13011_s15 + $0x48] sm:$0xff] }
 0xb19   : > { %5340 = vperm.xlu0 %10230, %v5266_v58   ;;  %5447 = vperm.xlu1 %10231, %v5377_v17   ;;  %v4799_v58 = vld [vmem:[%s13011_s15 + $0x50] sm:$0xff]  ;;  %v4800_v17 = vld [vmem:[%s13011_s15 + $0x58] sm:$0xff] }
 0xb1d   : > { %5452 = vperm.xlu0 %10230, %v5378_v12   ;;  %5345 = vperm.xlu1 %10231, %v5267_v34   ;;  %v4801_v12 = vld [vmem:[%s13011_s15 + $0x60] sm:$0xff]  ;;  %v4802_v34 = vld [vmem:[%s13011_s15 + $0x68] sm:$0xff] }
 0xb21   : > { %5457 = vperm.xlu1 %10231, %v5379_v52   ;;  %v4803_v52 = vld [vmem:[%s13011_s15 + $0x70] sm:$0xff] }
 0xb2b   : > { %v10394_v35 = vpop.permute.xlu0 %10393 }
 0xb2c   : > { %v10396_v39 = vunpack.i.h.bf16 %v10394_v35  ;;  %v10395_v46 = vunpack.i.l.bf16 %v10394_v35  ;;  %v4804_v35 = vld [vmem:[%s13011_s15 + $0x78] sm:$0xff] }
 0xb2e   : > { %v9828_v4 = vpack.c.bf16 %v10396_v39, %v10395_v46  ;;  %v5527_v39 = vld [vmem:[%s13015_s26] sm:$0xff]  ;;  %v5528_v46 = vld [vmem:[%s13015_s26 + $0x8] sm:$0xff] }
 0xb2f   : > { %v10399_v36 = vpop.permute.xlu1 %10398  ;;  %v10404_v37 = vpop.permute.xlu0 %10403 }
 0xb30   : > { %v10401_v30 = vunpack.i.h.bf16 %v10399_v36  ;;  %v10400_v61 = vunpack.i.l.bf16 %v10399_v36  ;;  %9829 = vmatprep.subr.bf16.mxu0 %v9828_v4  ;;  %v10406_v49 = vunpack.i.h.bf16 %v10404_v37  ;;  %v10405_v5 = vunpack.i.l.bf16 %v10404_v37  ;;  %v5529_v36 = vld [vmem:[%s13015_s26 + $0x10] sm:$0x1] }
 0xb31   : > { %9831 = vmatpush3.bf16.msra.mxu0 %v9828_v4 }
 0xb32   : > { %v9832_v23 = vpack.c.bf16 %v10401_v30, %v10400_v61  ;;  %v9844_v9 = vpack.c.bf16 %v10406_v49, %v10405_v5  ;;  %v5524_v30 = vld [vmem:[%s13016_s4] sm:$0xff]  ;;  %v5525_v61 = vld [vmem:[%s13016_s4 + $0x8] sm:$0xff] }
 0xb33   : > { %v10409_v21 = vpop.permute.xlu1 %10408 }
 0xb34   : > { %9833 = vmatprep.subr.bf16.mxu0 %v9832_v23  ;;  %v10411_v16 = vunpack.i.h.bf16 %v10409_v21  ;;  %v10410_v59 = vunpack.i.l.bf16 %v10409_v21 }
 0xb35   : > { %9835 = vmatpush3.bf16.msra.mxu0 %v9832_v23 }
 0xb36   : > { %9837 = vmatprep.subr.bf16.mxu0 %v9828_v4  ;;  %v9848_v45 = vpack.c.bf16 %v10411_v16, %v10410_v59 }
 0xb38   : > { %9100 = vmatmul.mubr.msk.f32.vlgmr.msra.gmra.mrb[52].mxu0 %vm4595_vm7, %v8085_v53 }
 0xb39   : > { %9839 = vmatpush3.bf16.msra.mxu0 %v9828_v4  ;;  %9102 = vmatprep.mubr.msk.f32.mxu0 %vm4595_vm7, %v8086_v8  ;;  %v9852_v4 = vpack.c.bf16 %v5528_v46, %v5527_v39 }
 0xb3a   : > { %9841 = vmatprep.subr.bf16.mxu0 %v9832_v23 }
 0xb3b   : > { %9853 = vmatprep.subr.bf16.mxu1 %v9852_v4 }
 0xb3c   : > { %9103 = vmatmul.mubr.msk.f32.gmra.mrb[54].mxu0 %vm4595_vm7, %v8087_v11  ;;  %9855 = vmatpush3.bf16.msra.mxu1 %v9852_v4 }
 0xb3d   : > { %9843 = vmatpush3.bf16.msra.mxu0 %v9832_v23  ;;  %9105 = vmatprep.mubr.msk.f32.mxu0 %vm4595_vm7, %v8088_v48  ;;  %v12163_v23 = vpack.c.bf16 %v5525_v61, %v5524_v30 }
 0xb3e   : > { %9845 = vmatprep.subr.bf16.mxu0 %v9844_v9  ;;  %9191 = vmatprep.subr.msk.mxu1 %vm2346_vm3, %v5529_v36 }
 0xb40   : > { %9106 = vmatmul.mubr.msk.f32.gmra.mrb[56].mxu0 %vm4595_vm7, %v8089_v18  ;;  %9192 = vmatpush3.msk.msra.mxu1 %vm2346_vm3, %v5529_v36  ;;  %v12166_v37 = vpop.permute.xlu0 %4501 }
 0xb41   : > { %9108 = vmatprep.mubr.msk.f32.mxu0 %vm4595_vm7, %v8090_v26  ;;  %9857 = vmatprep.subr.bf16.mxu1 %v12163_v23 }
 0xb44   : > { %9109 = vmatmul.mubr.msk.f32.gmra.mrb[58].mxu0 %vm4595_vm7, %v8091_v60  ;;  %v12168_v53 = vpop.permute.xlu1 %4506  ;;  %v12170_v8 = vpop.permute.xlu0 %4511 }
 0xb45   : > { %9111 = vmatprep.mubr.msk.f32.mxu0 %vm4595_vm7, %v8092_v51 }
 0xb48   : > { %9112 = vmatmul.mubr.msk.f32.gmra.mrb[60].mxu0 %vm4595_vm7, %v8093_v29  ;;  %v12172_v49 = vpop.permute.xlu1 %5270  ;;  %v12174_v5 = vpop.permute.xlu0 %4516 }
 0xb49   : > { %9114 = vmatprep.mubr.msk.f32.mxu0 %vm4595_vm7, %v8094_v19 }
 0xb4c   : > { %9115 = vmatmul.mubr.msk.f32.gmra.mrb[62].mxu0 %vm4595_vm7, %v8095_v43  ;;  %v12176_v11 = vpop.permute.xlu1 %5275  ;;  %v12178_v48 = vpop.permute.xlu0 %5382 }
 0xb4d   : > { %9117 = vmatprep.mubr.msk.f32.mxu0 %vm4595_vm7, %v8096_v15 }
 0xb50   : > { %9118 = vmatmul.mubr.msk.f32.gmra.mrb[64].mxu0 %vm4595_vm7, %v8097_v56  ;;  %v12182_v18 = vpop.permute.xlu0 %4521 }
 0xb51   : > { %9120 = vmatprep.mubr.msk.f32.mxu0 %vm4595_vm7, %v8098_v2 }
 0xb54   : > { %9121 = vmatmul.mubr.msk.f32.gmra.mrb[66].mxu0 %vm4595_vm7, %v8099_v7  ;;  %v12186_v60 = vpop.permute.xlu0 %4526 }
 0xb55   : > { %9131 = vmatprep.mubr.msk.f32.mxu0 %vm4595_vm7, %v8116_v3 }
 0xb58   : > { %9132 = vmatmul.mubr.msk.f32.vlgmr.msra.gmra.mrb[68].mxu0 %vm4595_vm7, %v8117_v27  ;;  %v12190_v29 = vpop.permute.xlu0 %5392 }
 0xb59   : > { %9847 = vmatpush3.bf16.msra.mxu0 %v9844_v9  ;;  %9134 = vmatprep.mubr.msk.f32.mxu0 %vm4595_vm7, %v8118_v42  ;;  %v12180_v9 = vpop.permute.xlu1 %5387 }
 0xb5a   : > { %9849 = vmatprep.subr.bf16.mxu0 %v9848_v45 }
 0xb5c   : > { %9135 = vmatmul.mubr.msk.f32.gmra.mrb[70].mxu0 %vm4595_vm7, %v8119_v25  ;;  %v12198_v56 = vpop.permute.xlu0 %4531 }
 0xb5d   : > { %9851 = vmatpush3.bf16.msra.mxu0 %v9848_v45  ;;  %9137 = vmatprep.mubr.msk.f32.mxu0 %vm4595_vm7, %v8120_v47  ;;  %v12184_v26 = vpop.permute.xlu1 %5280 }
 0xb60   : > { %9138 = vmatmul.mubr.msk.f32.gmra.mrb[72].mxu0 %vm4595_vm7, %v8121_v22  ;;  %v12208_v16 = vpop.permute.xlu0 %4536 }
 0xb61   : > { %9140 = vmatprep.mubr.msk.f32.mxu0 %vm4595_vm7, %v8122_v63  ;;  %v12188_v51 = vpop.permute.xlu1 %5285 }
 0xb64   : > { %9141 = vmatmul.mubr.msk.f32.gmra.mrb[74].mxu0 %vm4595_vm7, %v8123_v1  ;;  %v12218_v25 = vpop.permute.xlu0 %5402 }
 0xb65   : > { %9143 = vmatprep.mubr.msk.f32.mxu0 %vm4595_vm7, %v8124_v28  ;;  %v12192_v19 = vpop.permute.xlu1 %5397 }
 0xb66   : > { %13017 = vst [vmem:[#allocation20_spill] sm:$0xff] %v12192_v19 }
 0xb68   : > { %9144 = vmatmul.mubr.msk.f32.gmra.mrb[76].mxu0 %vm4595_vm7, %v8125_v10  ;;  %v12228_v28 = vpop.permute.xlu0 %4541 }
 0xb69   : > { %9146 = vmatprep.mubr.msk.f32.mxu0 %vm4595_vm7, %v8126_v62  ;;  %v12200_v2 = vpop.permute.xlu1 %5290 }
 0xb6c   : > { %9147 = vmatmul.mubr.msk.f32.gmra.mrb[78].mxu0 %vm4595_vm7, %v8127_v55 }
 0xb6d   : > { %9149 = vmatprep.mubr.msk.f32.mxu0 %vm4595_vm7, %v8128_v0  ;;  %v12212_v27 = vpop.permute.xlu1 %5295 }
 0xb6e   : > { %13018 = vst [vmem:[#allocation21_spill] sm:$0xff] %v12212_v27 }
 0xb70   : > { %9150 = vmatmul.mubr.msk.f32.gmra.mrb[80].mxu0 %vm4595_vm7, %v8129_v38  ;;  %v12238_v38 = vpop.permute.xlu0 %4546 }
 0xb71   : > { %9152 = vmatprep.mubr.msk.f32.mxu0 %vm4595_vm7, %v8130_v41  ;;  %v12220_v47 = vpop.permute.xlu1 %5407 }
 0xb74   : > { %9153 = vmatmul.mubr.msk.f32.gmra.mrb[82].mxu0 %vm4595_vm7, %v8131_v20 }
 0xb75   : > { %9163 = vmatprep.mubr.msk.f32.mxu0 %vm4595_vm7, %v4789_v14  ;;  %v12232_v62 = vpop.permute.xlu1 %5300 }
 0xb78   : > { %9164 = vmatmul.mubr.msk.f32.vlgmr.msra.gmra.mrb[68].mxu0 %vm4595_vm7, %v4790_v6  ;;  %v12246_v6 = vpop.permute.xlu0 %5412 }
 0xb79   : > { %9166 = vmatprep.mubr.msk.f32.mxu0 %vm4595_vm7, %v4791_v13  ;;  %v12240_v41 = vpop.permute.xlu1 %5305 }
 0xb7a   : > { %13024 = vst [vmem:[#allocation27_spill] sm:$0xff] %v12240_v41 }
 0xb7c   : > { %9167 = vmatmul.mubr.msk.f32.gmra.mrb[70].mxu0 %vm4595_vm7, %v4792_v40  ;;  %v12250_v40 = vpop.permute.xlu0 %4551 }
 0xb7d   : > { %9169 = vmatprep.mubr.msk.f32.mxu0 %vm4595_vm7, %v4793_v54  ;;  %v12248_v13 = vpop.permute.xlu1 %5417 }
 0xb80   : > { %9170 = vmatmul.mubr.msk.f32.gmra.mrb[72].mxu0 %vm4595_vm7, %v4794_v24  ;;  %v12254_v24 = vpop.permute.xlu0 %4556 }
 0xb81   : > { %9172 = vmatprep.mubr.msk.f32.mxu0 %vm4595_vm7, %v4795_v57  ;;  %v12252_v54 = vpop.permute.xlu1 %5310 }
 0xb84   : > { %9173 = vmatmul.mubr.msk.f32.gmra.mrb[74].mxu0 %vm4595_vm7, %v4796_v44  ;;  %v12258_v44 = vpop.permute.xlu0 %5422 }
 0xb85   : > { %9175 = vmatprep.mubr.msk.f32.mxu0 %vm4595_vm7, %v4797_v31  ;;  %v12256_v57 = vpop.permute.xlu1 %5315 }
 0xb86   : > { %13027 = vst [vmem:[#allocation30_spill] sm:$0xff] %v12256_v57 }
 0xb88   : > { %9176 = vmatmul.mubr.msk.f32.gmra.mrb[76].mxu0 %vm4595_vm7, %v4798_v32  ;;  %v12262_v32 = vpop.permute.xlu0 %4561 }
 0xb89   : > { %9178 = vmatprep.mubr.msk.f32.mxu0 %vm4595_vm7, %v4799_v58  ;;  %v12260_v31 = vpop.permute.xlu1 %5427 }
 0xb8c   : > { %9179 = vmatmul.mubr.msk.f32.gmra.mrb[78].mxu0 %vm4595_vm7, %v4800_v17  ;;  %v12266_v17 = vpop.permute.xlu0 %4566 }
 0xb8d   : > { %9181 = vmatprep.mubr.msk.f32.mxu0 %vm4595_vm7, %v4801_v12  ;;  %v12264_v58 = vpop.permute.xlu1 %5320 }
 0xb90   : > { %9182 = vmatmul.mubr.msk.f32.gmra.mrb[80].mxu0 %vm4595_vm7, %v4802_v34  ;;  %v12272_v30 = vpop.permute.xlu0 %5432 }
 0xb91   : > { %9184 = vmatprep.mubr.msk.f32.mxu0 %vm4595_vm7, %v4803_v52  ;;  %v12268_v12 = vpop.permute.xlu1 %5325 }
 0xb94   : > { %9185 = vmatmul.mubr.msk.f32.gmra.mrb[82].mxu0 %vm4595_vm7, %v4804_v35 }
 0xc0b   : > { %v12194_v43 = vpop.f32.mrb[52].mxu0 }
 0xc0c   : > { %v12196_v15 = vpop.f32.mrb[53].mxu0 }
 0xc0f   : > { %v12202_v21 = vpop.f32.mrb[54].mxu0 }
 0xc10   : > { %v12204_v7 = vpop.f32.mrb[55].mxu0 }
 0xc13   : > { %v12206_v3 = vpop.f32.mrb[56].mxu0 }
 0xc14   : > { %v12210_v59 = vpop.f32.mrb[57].mxu0 }
 0xc17   : > { %v12214_v42 = vpop.f32.mrb[58].mxu0 }
 0xc18   : > { %v12216_v45 = vpop.f32.mrb[59].mxu0 }
 0xc1b   : > { %v12222_v22 = vpop.f32.mrb[60].mxu0 }
 0xc1c   : > { %13019 = vst [vmem:[#allocation22_spill] sm:$0xff] %v12222_v22  ;;  %v12224_v63 = vpop.f32.mrb[61].mxu0 }
 0xc1f   : > { %v12226_v1 = vpop.f32.mrb[62].mxu0 }
 0xc20   : > { %13020 = vst [vmem:[#allocation23_spill] sm:$0xff] %v12226_v1  ;;  %v12230_v10 = vpop.f32.mrb[63].mxu0 }
 0xc21   : > { %13021 = vst [vmem:[#allocation24_spill] sm:$0xff] %v12230_v10 }
 0xc23   : > { %v12234_v55 = vpop.f32.mrb[64].mxu0 }
 0xc24   : > { %13022 = vst [vmem:[#allocation25_spill] sm:$0xff] %v12234_v55  ;;  %v12236_v0 = vpop.f32.mrb[65].mxu0 }
 0xc25   : > { %13023 = vst [vmem:[#allocation26_spill] sm:$0xff] %v12236_v0 }
 0xc27   : > { %v12242_v20 = vpop.f32.mrb[66].mxu0 }
 0xc28   : > { %13025 = vst [vmem:[#allocation28_spill] sm:$0xff] %v12242_v20  ;;  %v12244_v14 = vpop.f32.mrb[67].mxu0  ;;  %v12276_v20 = vpop.permute.xlu1 %5437 }
 0xc29   : > { %13026 = vst [vmem:[#allocation29_spill] sm:$0xff] %v12244_v14 }
 0xc4b   : > { %v9165_v34 = vpop.f32.mrb[68].mxu0 }
 0xc4c   : > { %v5221_v52 = vadd.f32 %v9165_v34, %v12168_v53  ;;  %v5141_v35 = vpop.f32.mrb[69].mxu0 }
 0xc4d   : > { %v5220_v39 = vadd.f32 %v5141_v35, %v12166_v37 }
 0xc4e   : > { %v5477_v46 = vmax.f32 %v5221_v52, 0.0 }
 0xc4f   : > { %v5476_v4 = vmax.f32 %v5220_v39, 0.0  ;;  %v9168_v36 = vpop.f32.mrb[70].mxu0 }
 0xc50   : > { %v5493_v61 = vmul.f32 %v5477_v46, %v12176_v11  ;;  %v5223_v50 = vadd.f32 %v9168_v36, %v12174_v5  ;;  %v5151_v33 = vpop.f32.mrb[71].mxu0 }
 0xc51   : > { %v5492_v14 = vmul.f32 %v5476_v4, %v12172_v49  ;;  %v5222_v34 = vadd.f32 %v5151_v33, %v12170_v8  ;;  %v5526_v33 = vld [vmem:[%s13016_s4 + $0x10] sm:$0x1]  ;;  %s13042_s4 = sld [smem:[#allocation15_spill]] }
 0xc52   : > { %v5479_v55 = vmax.f32 %v5223_v50, 0.0  ;;  %v5509_v0 = vadd.f32 %v5493_v61, %v12180_v9  ;;  %v12288_v50 = vpop.permute.xlu0 %4571 }
 0xc53   : > { %v5508_v52 = vadd.f32 %v5492_v14, %v12178_v48  ;;  %v5478_v35 = vmax.f32 %v5222_v34, 0.0  ;;  %v9171_v39 = vpop.f32.mrb[72].mxu0  ;;  %v12291_v14 = vpop.permute.xlu1 %5330 }
 0xc54   : > { %v5495_v46 = vmul.f32 %v5479_v55, %v12188_v51  ;;  %v5225_v36 = vadd.f32 %v9171_v39, %v12186_v60  ;;  %v5161_v1 = vpop.f32.mrb[73].mxu0 }
 0xc55   : > { %v5494_v10 = vmul.f32 %v5478_v35, %v12184_v26  ;;  %v5224_v22 = vadd.f32 %v5161_v1, %v12182_v18  ;;  %9193 = vmatprep.mubr.msk.f32.mxu1 %vm5530_vm8, %v5508_v52 }
 0xc56   : > { %v5481_v4 = vmax.f32 %v5225_v36, 0.0  ;;  %9194 = vmatmul.mubr.msk.f32.vlgmr.msra.gmra.mrb[20].mxu1 %vm5530_vm8, %v5509_v0  ;;  %v5511_v35 = vadd.f32 %v5495_v46, %v12192_v19 }
 0xc57   : > { %v5510_v61 = vadd.f32 %v5494_v10, %v12190_v29  ;;  %v5480_v55 = vmax.f32 %v5224_v22, 0.0  ;;  %v9174_v34 = vpop.f32.mrb[74].mxu0  ;;  %9859 = vmatpush3.bf16.msra.mxu1 %v12163_v23  ;;  %v12310_v19 = vpop.permute.xlu1 %5335 }
 0xc58   : > { %v5497_v1 = vmul.f32 %v5481_v4, %v12212_v27  ;;  %v5227_v52 = vadd.f32 %v9174_v34, %v12208_v16  ;;  %v5171_v39 = vpop.f32.mrb[75].mxu0  ;;  %9221 = vmatprep.subr.msk.mxu1 %vm2346_vm3, %v5526_v33  ;;  %v12305_v4 = vpop.permute.xlu0 %4576 }
 0xc59   : > { %v5496_v36 = vmul.f32 %v5480_v55, %v12200_v2  ;;  %v5226_v0 = vadd.f32 %v5171_v39, %v12198_v56  ;;  %9196 = vmatprep.mubr.msk.f32.mxu1 %vm5530_vm8, %v5510_v61 }
 0xc5a   : > { %v5483_v10 = vmax.f32 %v5227_v52, 0.0  ;;  %9197 = vmatmul.mubr.msk.f32.gmra.mrb[22].mxu1 %vm5530_vm8, %v5511_v35  ;;  %v5513_v34 = vadd.f32 %v5497_v1, %v12220_v47 }
 0xc5b   : > { %v5512_v23 = vadd.f32 %v5496_v36, %v12218_v25  ;;  %v5482_v22 = vmax.f32 %v5226_v0, 0.0  ;;  %v9177_v46 = vpop.f32.mrb[76].mxu0  ;;  %9222 = vmatpush3.msk.msra.mxu1 %vm2346_vm3, %v5526_v33 }
 0xc5c   : > { %v5499_v27 = vmul.f32 %v5483_v10, %v12240_v41  ;;  %v5229_v55 = vadd.f32 %v9177_v46, %v12238_v38  ;;  %v5181_v39 = vpop.f32.mrb[77].mxu0 }
 0xc5d   : > { %v5498_v61 = vmul.f32 %v5482_v22, %v12232_v62  ;;  %v5228_v35 = vadd.f32 %v5181_v39, %v12228_v28  ;;  %9199 = vmatprep.mubr.msk.f32.mxu1 %vm5530_vm8, %v5512_v23  ;;  %v12323_v23 = vpop.permute.xlu0 %5442 }
 0xc5e   : > { %v5485_v52 = vmax.f32 %v5229_v55, 0.0  ;;  %9200 = vmatmul.mubr.msk.f32.gmra.mrb[24].mxu1 %vm5530_vm8, %v5513_v34  ;;  %v5515_v0 = vadd.f32 %v5499_v27, %v12248_v13  ;;  %v12326_v55 = vpop.permute.xlu1 %5447 }
 0xc5f   : > { %v5514_v33 = vadd.f32 %v5498_v61, %v12246_v6  ;;  %v5484_v36 = vmax.f32 %v5228_v35, 0.0  ;;  %v9180_v1 = vpop.f32.mrb[78].mxu0 }
 0xc60   : > { %v5501_v10 = vmul.f32 %v5485_v52, %v12256_v57  ;;  %v5231_v46 = vadd.f32 %v9180_v1, %v12254_v24  ;;  %v5191_v41 = vpop.f32.mrb[79].mxu0 }
 0xc61   : > { %v5500_v22 = vmul.f32 %v5484_v36, %v12252_v54  ;;  %v5230_v39 = vadd.f32 %v5191_v41, %v12250_v40  ;;  %9202 = vmatprep.mubr.msk.f32.mxu1 %vm5530_vm8, %v5514_v33  ;;  %v4711_v33 = vadd.f32 %v12196_v15, %v12166_v37 }
 0xc62   : > { %v5487_v34 = vmax.f32 %v5231_v46, 0.0  ;;  %9203 = vmatmul.mubr.msk.f32.gmra.mrb[26].mxu1 %vm5530_vm8, %v5515_v0  ;;  %v5517_v52 = vadd.f32 %v5501_v10, %v12260_v31 }
 0xc63   : > { %v5516_v27 = vadd.f32 %v5500_v22, %v12258_v44  ;;  %v5486_v61 = vmax.f32 %v5230_v39, 0.0  ;;  %v9183_v35 = vpop.f32.mrb[80].mxu0 }
 0xc64   : > { %v5503_v1 = vmul.f32 %v5487_v34, %v12268_v12  ;;  %v5233_v36 = vadd.f32 %v9183_v35, %v12266_v17  ;;  %v5201_v41 = vpop.f32.mrb[81].mxu0  ;;  %v12339_v34 = vpop.permute.xlu0 %5340  ;;  %v4716_v35 = vadd.f32 %v12194_v43, %v12168_v53 }
 0xc65   : > { %v5502_v46 = vmul.f32 %v5486_v61, %v12264_v58  ;;  %v5232_v0 = vadd.f32 %v5201_v41, %v12262_v32  ;;  %9205 = vmatprep.mubr.msk.f32.mxu1 %vm5530_vm8, %v5516_v27  ;;  %v12346_v27 = vpop.permute.xlu1 %5345 }
 0xc66   : > { %v5489_v57 = vmax.f32 %v5233_v36, 0.0  ;;  %9206 = vmatmul.mubr.msk.f32.gmra.mrb[28].mxu1 %vm5530_vm8, %v5517_v52  ;;  %v5519_v37 = vadd.f32 %v5503_v1, %v12276_v20  ;;  %v5236_v36 = vmax.f32 %v4711_v33, 0.0  ;;  %v4721_v52 = vadd.f32 %v12204_v7, %v12170_v8 }
 0xc67   : > { %v5518_v22 = vadd.f32 %v5502_v46, %v12272_v30  ;;  %v5488_v10 = vmax.f32 %v5232_v0, 0.0  ;;  %v9186_v39 = vpop.f32.mrb[82].mxu0  ;;  %v5237_v1 = vmax.f32 %v4716_v35, 0.0 }
 0xc68   : > { %v5505_v15 = vmul.f32 %v5489_v57, %v12310_v19  ;;  %v5235_v61 = vadd.f32 %v9186_v39, %v12305_v4  ;;  %v5211_v41 = vpop.f32.mrb[83].mxu0  ;;  %v4726_v39 = vadd.f32 %v12202_v21, %v12174_v5  ;;  %v5348_v7 = vmul.f32 %v12172_v49, %v5236_v36 }
 0xc69   : > { %v5504_v46 = vmul.f32 %v5488_v10, %v12291_v14  ;;  %v5234_v0 = vadd.f32 %v5211_v41, %v12288_v50  ;;  %9208 = vmatprep.mubr.msk.f32.mxu1 %vm5530_vm8, %v5518_v22  ;;  %v5238_v10 = vmax.f32 %v4721_v52, 0.0  ;;  %v4731_v22 = vadd.f32 %v12210_v59, %v12182_v18  ;;  %v12367_v35 = vpop.permute.xlu1 %5457 }
 0xc6a   : > { %v5491_v53 = vmax.f32 %v5235_v61, 0.0  ;;  %9209 = vmatmul.mubr.msk.f32.gmra.mrb[30].mxu1 %vm5530_vm8, %v5519_v37  ;;  %v5521_v33 = vadd.f32 %v5505_v15, %v12326_v55  ;;  %v12364_v37 = vpop.permute.xlu0 %5452  ;;  %v5349_v21 = vmul.f32 %v12176_v11, %v5237_v1  ;;  %v5239_v15 = vmax.f32 %v4726_v39, 0.0  ;;  %v13031_v1 = vld [vmem:[#allocation24_spill] sm:$0xff]  ;;  %v13032_v39 = vld [vmem:[#allocation27_spill] sm:$0xff] }
 0xc6b   : > { %v5520_v43 = vadd.f32 %v5504_v46, %v12323_v23  ;;  %v5490_v57 = vmax.f32 %v5234_v0, 0.0  ;;  %v4736_v49 = vadd.f32 %v12206_v3, %v12186_v60  ;;  %v5460_v59 = vadd.f32 %v12178_v48, %v5348_v7  ;;  %v13033_v7 = vld [vmem:[#allocation23_spill] sm:$0xff] }
 0xc6c   : > { %v5507_v8 = vmul.f32 %v5491_v53, %v12346_v27  ;;  %v5350_v41 = vmul.f32 %v12184_v26, %v5238_v10  ;;  %v5240_v36 = vmax.f32 %v4731_v22, 0.0  ;;  %v4741_v52 = vadd.f32 %v12216_v45, %v12198_v56  ;;  %v13028_v45 = vld [vmem:[#allocation20_spill] sm:$0xff]  ;;  %v13029_v53 = vld [vmem:[#allocation21_spill] sm:$0xff]  ;;  %v13034_v22 = vld [vmem:[#allocation26_spill] sm:$0xff] }
 0xc6d   : > { %v5506_v61 = vmul.f32 %v5490_v57, %v12339_v34  ;;  %9211 = vmatprep.mubr.msk.f32.mxu1 %vm5530_vm8, %v5520_v43  ;;  %v5461_v11 = vadd.f32 %v12180_v9, %v5349_v21  ;;  %v5351_v60 = vmul.f32 %v12188_v51, %v5239_v15  ;;  %v5241_v3 = vmax.f32 %v4736_v49, 0.0  ;;  %v13030_v57 = vld [vmem:[#allocation22_spill] sm:$0xff]  ;;  %v13036_v15 = vld [vmem:[#allocation25_spill] sm:$0xff] }
 0xc6e   : > { %9212 = vmatmul.mubr.msk.f32.gmra.mrb[32].mxu1 %vm5530_vm8, %v5521_v33  ;;  %v5523_v18 = vadd.f32 %v5507_v8, %v12367_v35  ;;  %v4746_v48 = vadd.f32 %v12214_v42, %v12208_v16  ;;  %v5462_v26 = vadd.f32 %v12190_v29, %v5350_v41  ;;  %v5352_v46 = vmul.f32 %v12200_v2, %v5240_v36  ;;  %v13038_v36 = vld [vmem:[#allocation28_spill] sm:$0xff] }
 0xc6f   : > { %v5522_v5 = vadd.f32 %v5506_v61, %v12364_v37  ;;  %v5242_v0 = vmax.f32 %v4741_v52, 0.0  ;;  %v4751_v56 = vadd.f32 %v12224_v63, %v12228_v28  ;;  %v5463_v9 = vadd.f32 %v13028_v45, %v5351_v60  ;;  %v13035_v61 = vld [vmem:[#allocation30_spill] sm:$0xff] }
 0xc70   : > { %v5353_v51 = vmul.f32 %v13029_v53, %v5241_v3  ;;  %v5243_v43 = vmax.f32 %v4746_v48, 0.0  ;;  %v4756_v16 = vadd.f32 %v13030_v57, %v12238_v38  ;;  %v5464_v29 = vadd.f32 %v12218_v25, %v5352_v46 }
 0xc71   : > { %9214 = vmatprep.mubr.msk.f32.mxu1 %vm5530_vm8, %v5522_v5  ;;  %v5354_v2 = vmul.f32 %v12232_v62, %v5242_v0  ;;  %v5244_v42 = vmax.f32 %v4751_v56, 0.0  ;;  %v4761_v63 = vadd.f32 %v13031_v1, %v12250_v40  ;;  %v4766_v38 = vadd.f32 %v13033_v7, %v12254_v24  ;;  %v5943_v7 = vld [vmem:[%s13040_s0 + $0x18] sm:$0xff] }
 0xc72   : > { %9215 = vmatmul.mubr.msk.f32.gmra.mrb[34].mxu1 %vm5530_vm8, %v5523_v18  ;;  %v5465_v28 = vadd.f32 %v12220_v47, %v5353_v51  ;;  %v5355_v33 = vmul.f32 %v13032_v39, %v5243_v43  ;;  %v5245_v8 = vmax.f32 %v4756_v16, 0.0  ;;  %v4771_v40 = vadd.f32 %v13034_v22, %v12262_v32  ;;  %v13037_v18 = vld [vmem:[#allocation29_spill] sm:$0xff]  ;;  %v5940_v39 = vld [vmem:[%s13040_s0] sm:$0xff]  ;;  %v6761_v22 = vld [vmem:[%s13042_s4 + $0x8] sm:$0xff] }
 0xc73   : > { %9223 = vmatprep.mubr.msk.f32.mxu1 %vm5530_vm8, %v5460_v59  ;;  %v5466_v25 = vadd.f32 %v12246_v6, %v5354_v2  ;;  %v5356_v62 = vmul.f32 %v12252_v54, %v5244_v42  ;;  %v5246_v10 = vmax.f32 %v4761_v63, 0.0  ;;  %v5247_v21 = vmax.f32 %v4766_v38, 0.0  ;;  %v8214_v2 = vld [vmem:[%s13039_s7 + $0x100] sm:$0xff] }
 0xc74   : > { %v5467_v47 = vadd.f32 %v12248_v13, %v5355_v33  ;;  %v5357_v5 = vmul.f32 %v13035_v61, %v5245_v8  ;;  %v4776_v24 = vadd.f32 %v13036_v15, %v12266_v17  ;;  %v5248_v49 = vmax.f32 %v4771_v40, 0.0  ;;  %v5942_v33 = vld [vmem:[%s13040_s0 + $0x10] sm:$0xff]  ;;  %v5941_v8 = vld [vmem:[%s13040_s0 + $0x8] sm:$0xff]  ;;  %v6648_v38 = vld [vmem:[%s13041_s3] sm:$0xff] }
 0xc75   : > { %v5468_v6 = vadd.f32 %v12258_v44, %v5356_v62  ;;  %v5358_v54 = vmul.f32 %v12264_v58, %v5246_v10  ;;  %v4781_v32 = vadd.f32 %v13037_v18, %v12288_v50  ;;  %v5359_v59 = vmul.f32 %v12268_v12, %v5247_v21  ;;  %v6649_v62 = vld [vmem:[%s13041_s3 + $0x8] sm:$0xff]  ;;  %v5944_v10 = vld [vmem:[%s13040_s0 + $0x20] sm:$0xff]  ;;  %v6762_v61 = vld [vmem:[%s13042_s4 + $0x10] sm:$0xff] }
 0xc76   : > { %9224 = vmatmul.mubr.msk.f32.vlgmr.msra.gmra.mrb[20].mxu1 %vm5530_vm8, %v5461_v11  ;;  %v5469_v13 = vadd.f32 %v12260_v31, %v5357_v5  ;;  %v5249_v41 = vmax.f32 %v4776_v24, 0.0  ;;  %v4786_v17 = vadd.f32 %v13038_v36, %v12305_v4  ;;  %v5360_v58 = vmul.f32 %v12291_v14, %v5248_v49  ;;  %v5945_v40 = vld [vmem:[%s13040_s0 + $0x28] sm:$0xff]  ;;  %v6651_v5 = vld [vmem:[%s13041_s3 + $0x18] sm:$0xff]  ;;  %v5946_v21 = vld [vmem:[%s13040_s0 + $0x30] sm:$0xff] }
 0xc77   : > { %9226 = vmatprep.mubr.msk.f32.mxu1 %vm5530_vm8, %v5462_v26  ;;  %v5470_v44 = vadd.f32 %v12272_v30, %v5358_v54  ;;  %v5250_v52 = vmax.f32 %v4781_v32, 0.0  ;;  %v5471_v50 = vadd.f32 %v12276_v20, %v5359_v59  ;;  %v6763_v15 = vld [vmem:[%s13042_s4 + $0x18] sm:$0xff]  ;;  %v6764_v54 = vld [vmem:[%s13042_s4 + $0x20] sm:$0xff]  ;;  %v6653_v49 = vld [vmem:[%s13041_s3 + $0x28] sm:$0xff] }
 0xc78   : > { %v5361_v11 = vmul.f32 %v12310_v19, %v5249_v41  ;;  %v5251_v31 = vmax.f32 %v4786_v17, 0.0  ;;  %v5472_v12 = vadd.f32 %v12323_v23, %v5360_v58  ;;  %v5947_v24 = vld [vmem:[%s13040_s0 + $0x38] sm:$0xff]  ;;  %v5948_v18 = vld [vmem:[%s13040_s0 + $0x40] sm:$0xff]  ;;  %v6765_v32 = vld [vmem:[%s13042_s4 + $0x28] sm:$0xff] }
 0xc79   : > { %v5362_v60 = vmul.f32 %v12339_v34, %v5250_v52  ;;  %v6654_v59 = vld [vmem:[%s13041_s3 + $0x30] sm:$0xff]  ;;  %v6655_v36 = vld [vmem:[%s13041_s3 + $0x38] sm:$0xff]  ;;  %v6656_v52 = vld [vmem:[%s13041_s3 + $0x40] sm:$0xff] }
 0xc7a   : > { %9227 = vmatmul.mubr.msk.f32.gmra.mrb[22].mxu1 %vm5530_vm8, %v5463_v9  ;;  %v5473_v30 = vadd.f32 %v12326_v55, %v5361_v11  ;;  %v5363_v14 = vmul.f32 %v12346_v27, %v5251_v31  ;;  %v6766_v41 = vld [vmem:[%s13042_s4 + $0x30] sm:$0xff]  ;;  %v5951_v58 = vld [vmem:[%s13040_s0 + $0x58] sm:$0xff]  ;;  %v6657_v11 = vld [vmem:[%s13041_s3 + $0x48] sm:$0xff] }
 0xc7b   : > { %9229 = vmatprep.mubr.msk.f32.mxu1 %vm5530_vm8, %v5464_v29  ;;  %v5474_v4 = vadd.f32 %v12364_v37, %v5362_v60  ;;  %v8198_v29 = vld [vmem:[%s13039_s7 + $0x80] sm:$0xff]  ;;  %v5950_v17 = vld [vmem:[%s13040_s0 + $0x50] sm:$0xff]  ;;  %v5953_v60 = vld [vmem:[%s13040_s0 + $0x68] sm:$0xff] }
 0xc7c   : > { %v5475_v19 = vadd.f32 %v12367_v35, %v5363_v14  ;;  %9279 = vmatprep.mubr.f32.mxu0 %v8198_v29  ;;  %v5952_v31 = vld [vmem:[%s13040_s0 + $0x60] sm:$0xff]  ;;  %v6770_v14 = vld [vmem:[%s13042_s4 + $0x50] sm:$0xff] }
 0xc7e   : > { %9230 = vmatmul.mubr.msk.f32.gmra.mrb[24].mxu1 %vm5530_vm8, %v5465_v28 }
 0xc7f   : > { %9232 = vmatprep.mubr.msk.f32.mxu1 %vm5530_vm8, %v5466_v25  ;;  %v6760_v25 = vld [vmem:[%s13042_s4] sm:$0xff] }
 0xc82   : > { %9233 = vmatmul.mubr.msk.f32.gmra.mrb[26].mxu1 %vm5530_vm8, %v5467_v47  ;;  %v6650_v47 = vld [vmem:[%s13041_s3 + $0x10] sm:$0xff] }
 0xc83   : > { %9235 = vmatprep.mubr.msk.f32.mxu1 %vm5530_vm8, %v5468_v6  ;;  %v6652_v6 = vld [vmem:[%s13041_s3 + $0x20] sm:$0xff] }
 0xc86   : > { %9236 = vmatmul.mubr.msk.f32.gmra.mrb[28].mxu1 %vm5530_vm8, %v5469_v13  ;;  %v5949_v13 = vld [vmem:[%s13040_s0 + $0x48] sm:$0xff] }
 0xc87   : > { %9238 = vmatprep.mubr.msk.f32.mxu1 %vm5530_vm8, %v5470_v44  ;;  %v6767_v44 = vld [vmem:[%s13042_s4 + $0x38] sm:$0xff] }
 0xc8a   : > { %9239 = vmatmul.mubr.msk.f32.gmra.mrb[30].mxu1 %vm5530_vm8, %v5471_v50  ;;  %v6768_v50 = vld [vmem:[%s13042_s4 + $0x40] sm:$0xff] }
 0xc8b   : > { %9241 = vmatprep.mubr.msk.f32.mxu1 %vm5530_vm8, %v5472_v12  ;;  %v6769_v12 = vld [vmem:[%s13042_s4 + $0x48] sm:$0xff] }
 0xc8e   : > { %9242 = vmatmul.mubr.msk.f32.gmra.mrb[32].mxu1 %vm5530_vm8, %v5473_v30  ;;  %v6658_v30 = vld [vmem:[%s13041_s3 + $0x50] sm:$0xff] }
 0xc8f   : > { %9244 = vmatprep.mubr.msk.f32.mxu1 %vm5530_vm8, %v5474_v4  ;;  %v6659_v4 = vld [vmem:[%s13041_s3 + $0x58] sm:$0xff] }
 0xc92   : > { %9245 = vmatmul.mubr.msk.f32.gmra.mrb[34].mxu1 %vm5530_vm8, %v5475_v19 }
 0xc93   : > { %9335 = vmatprep.mubr.f32.mxu1 %v8214_v2 }
 0xd49   : > { %v9225_v20 = vpop.f32.mrb[20].mxu1 }
 0xd4a   : > { %v5844_v23 = vpop.f32.mrb[21].mxu1 }
 0xd4b   : > { %v10452_v34 = vpack.i.bf16 %v9225_v20, %v5844_v23 }
 0xd4d   : > { %10413 = vrot.lane.b32.xlu0 %v10452_v34, %s12980_s2  ;;  %v9228_v3 = vpop.f32.mrb[22].mxu1 }
 0xd4e   : > { %v5854_v48 = vpop.f32.mrb[23].mxu1 }
 0xd4f   : > { %v10457_v55 = vpack.i.bf16 %v9228_v3, %v5854_v48  ;;  %v5954_v48 = vld [vmem:[%s13040_s0 + $0x70] sm:$0xff] }
 0xd51   : > { %10418 = vrot.lane.b32.xlu1 %v10457_v55, %s12980_s2  ;;  %v9231_v27 = vpop.f32.mrb[24].mxu1 }
 0xd52   : > { %v5864_v37 = vpop.f32.mrb[25].mxu1 }
 0xd53   : > { %v10462_v26 = vpack.i.bf16 %v9231_v27, %v5864_v37 }
 0xd55   : > { %10423 = vrot.lane.b32.xlu0 %v10462_v26, %s12980_s2  ;;  %v9234_v35 = vpop.f32.mrb[26].mxu1 }
 0xd56   : > { %v5874_v46 = vpop.f32.mrb[27].mxu1 }
 0xd57   : > { %v10467_v0 = vpack.i.bf16 %v9234_v35, %v5874_v46  ;;  %v5955_v46 = vld [vmem:[%s13040_s0 + $0x78] sm:$0xff]  ;;  %s13066_s0 = smov 127  }
 0xd59   : > { %10428 = vrot.lane.b32.xlu1 %v10467_v0, %s12980_s2  ;;  %v9237_v56 = vpop.f32.mrb[28].mxu1 }
 0xd5a   : > { %v5884_v45 = vpop.f32.mrb[29].mxu1 }
 0xd5b   : > { %v10472_v9 = vpack.i.bf16 %v9237_v56, %v5884_v45 }
 0xd5d   : > { %10433 = vrot.lane.b32.xlu0 %v10472_v9, %s12980_s2  ;;  %v9240_v53 = vpop.f32.mrb[30].mxu1 }
 0xd5e   : > { %v5894_v51 = vpop.f32.mrb[31].mxu1 }
 0xd5f   : > { %v10477_v43 = vpack.i.bf16 %v9240_v53, %v5894_v51  ;;  %v6772_v51 = vld [vmem:[%s13042_s4 + $0x60] sm:$0xff] }
 0xd61   : > { %10438 = vrot.lane.b32.xlu1 %v10477_v43, %s12980_s2  ;;  %v9243_v57 = vpop.f32.mrb[32].mxu1 }
 0xd62   : > { %v5904_v16 = vpop.f32.mrb[33].mxu1 }
 0xd63   : > { %v10482_v42 = vpack.i.bf16 %v9243_v57, %v5904_v16 }
 0xd65   : > { %10443 = vrot.lane.b32.xlu0 %v10482_v42, %s12980_s2  ;;  %v9246_v1 = vpop.f32.mrb[34].mxu1 }
 0xd66   : > { %v5914_v63 = vpop.f32.mrb[35].mxu1 }
 0xd67   : > { %v10487_v28 = vpack.i.bf16 %v9246_v1, %v5914_v63  ;;  %v6773_v1 = vld [vmem:[%s13042_s4 + $0x68] sm:$0xff] }
 0xd69   : > { %10453 = vrot.lane.b32.xlu0 %v10452_v34, %s12978_s10  ;;  %10448 = vrot.lane.b32.xlu1 %v10487_v28, %s12980_s2  ;;  %s13045_s2 = sld [smem:[#allocation16_spill]] }
 0xd6d   : > { %10463 = vrot.lane.b32.xlu0 %v10462_v26, %s12978_s10  ;;  %10458 = vrot.lane.b32.xlu1 %v10457_v55, %s12978_s10  ;;  %v6771_v55 = vld [vmem:[%s13042_s4 + $0x58] sm:$0xff] }
 0xd71   : > { %10473 = vrot.lane.b32.xlu0 %v10472_v9, %s12978_s10  ;;  %10468 = vrot.lane.b32.xlu1 %v10467_v0, %s12978_s10  ;;  %v6660_v0 = vld [vmem:[%s13041_s3 + $0x60] sm:$0xff] }
 0xd75   : > { %10483 = vrot.lane.b32.xlu0 %v10482_v42, %s12978_s10  ;;  %10478 = vrot.lane.b32.xlu1 %v10477_v43, %s12978_s10  ;;  %v6661_v43 = vld [vmem:[%s13041_s3 + $0x68] sm:$0xff]  ;;  %v6662_v42 = vld [vmem:[%s13041_s3 + $0x70] sm:$0xff] }
 0xd79   : > { %5958 = vperm.xlu0 %10230, %v5940_v39   ;;  %10488 = vrot.lane.b32.xlu1 %v10487_v28, %s12978_s10  ;;  %s13044_s10 = sld [smem:[#allocation17_spill]] }
 0xd7d   : > { %5968 = vperm.xlu0 %10230, %v5942_v33   ;;  %5963 = vperm.xlu1 %10231, %v5941_v8   ;;  %v6774_v8 = vld [vmem:[%s13042_s4 + $0x70] sm:$0xff] }
 0xd81   : > { %5973 = vperm.xlu0 %10230, %v5943_v7   ;;  %6666 = vperm.xlu1 %10231, %v6648_v38   ;;  %v6663_v7 = vld [vmem:[%s13041_s3 + $0x78] sm:$0xff] }
 0xd85   : > { %6778 = vperm.xlu0 %10230, %v6760_v25   ;;  %6671 = vperm.xlu1 %10231, %v6649_v62  }
 0xd89   : > { %5978 = vperm.xlu0 %10230, %v5944_v10   ;;  %6783 = vperm.xlu1 %10231, %v6761_v22   ;;  %v6775_v22 = vld [vmem:[%s13042_s4 + $0x78] sm:$0xff] }
 0xd8d   : > { %5983 = vperm.xlu0 %10230, %v5945_v40   ;;  %6676 = vperm.xlu1 %10231, %v6650_v47  }
 0xd91   : > { %6788 = vperm.xlu0 %10230, %v6762_v61   ;;  %6681 = vperm.xlu1 %10231, %v6651_v5  }
 0xd95   : > { %5988 = vperm.xlu0 %10230, %v5946_v21   ;;  %6793 = vperm.xlu1 %10231, %v6763_v15  }
 0xd99   : > { %5993 = vperm.xlu0 %10230, %v5947_v24   ;;  %6686 = vperm.xlu1 %10231, %v6652_v6  }
 0xd9d   : > { %6798 = vperm.xlu0 %10230, %v6764_v54   ;;  %6691 = vperm.xlu1 %10231, %v6653_v49  }
 0xda1   : > { %5998 = vperm.xlu0 %10230, %v5948_v18   ;;  %6803 = vperm.xlu1 %10231, %v6765_v32  }
 0xda5   : > { %6003 = vperm.xlu0 %10230, %v5949_v13   ;;  %6696 = vperm.xlu1 %10231, %v6654_v59  }
 0xda9   : > { %6808 = vperm.xlu0 %10230, %v6766_v41   ;;  %6701 = vperm.xlu1 %10231, %v6655_v36   ;;  %v8199_v36 = vld [vmem:[%s13039_s7 + $0x88] sm:$0xff] }
 0xdad   : > { %6008 = vperm.xlu0 %10230, %v5950_v17   ;;  %6813 = vperm.xlu1 %10231, %v6767_v44   ;;  %v8215_v17 = vld [vmem:[%s13039_s7 + $0x108] sm:$0xff]  ;;  %v8200_v44 = vld [vmem:[%s13039_s7 + $0x90] sm:$0xff] }
 0xdb1   : > { %6013 = vperm.xlu0 %10230, %v5951_v58   ;;  %6706 = vperm.xlu1 %10231, %v6656_v52   ;;  %v8216_v58 = vld [vmem:[%s13039_s7 + $0x110] sm:$0xff] }
 0xdb5   : > { %6818 = vperm.xlu0 %10230, %v6768_v50   ;;  %6711 = vperm.xlu1 %10231, %v6657_v11  }
 0xdb9   : > { %6018 = vperm.xlu0 %10230, %v5952_v31   ;;  %6823 = vperm.xlu1 %10231, %v6769_v12   ;;  %v8201_v12 = vld [vmem:[%s13039_s7 + $0x98] sm:$0xff] }
 0xdbd   : > { %6023 = vperm.xlu0 %10230, %v5953_v60   ;;  %6716 = vperm.xlu1 %10231, %v6658_v30   ;;  %v8217_v60 = vld [vmem:[%s13039_s7 + $0x118] sm:$0xff]  ;;  %v8202_v30 = vld [vmem:[%s13039_s7 + $0xa0] sm:$0xff] }
 0xdbf   : > { %v10414_v19 = vpop.permute.xlu0 %10413 }
 0xdc0   : > { %v10416_v20 = vunpack.i.h.bf16 %v10414_v19  ;;  %v10415_v23 = vunpack.i.l.bf16 %v10414_v19 }
 0xdc1   : > { %6828 = vperm.xlu0 %10230, %v6770_v14   ;;  %6721 = vperm.xlu1 %10231, %v6659_v4   ;;  %v8218_v14 = vld [vmem:[%s13039_s7 + $0x120] sm:$0xff] }
 0xdc2   : > { %v9860_v34 = vpack.c.bf16 %v10416_v20, %v10415_v23 }
 0xdc3   : > { %v10419_v3 = vpop.permute.xlu1 %10418 }
 0xdc4   : > { %v10421_v27 = vunpack.i.h.bf16 %v10419_v3  ;;  %v10420_v37 = vunpack.i.l.bf16 %v10419_v3  ;;  %9861 = vmatprep.subr.bf16.mxu0 %v9860_v34  ;;  %9893 = vmatprep.subr.bf16.mxu1 %v9860_v34  ;;  %v8219_v3 = vld [vmem:[%s13039_s7 + $0x128] sm:$0xff] }
 0xdc5   : > { %9863 = vmatpush3.bf16.msra.mxu0 %v9860_v34  ;;  %9895 = vmatpush3.bf16.msra.mxu1 %v9860_v34  ;;  %v8203_v34 = vld [vmem:[%s13039_s7 + $0xa8] sm:$0xff] }
 0xdc6   : > { %v9864_v26 = vpack.c.bf16 %v10421_v27, %v10420_v37  ;;  %6028 = vperm.xlu0 %10230, %v5954_v48   ;;  %6833 = vperm.xlu1 %10231, %v6771_v55   ;;  %v8204_v48 = vld [vmem:[%s13039_s7 + $0xb0] sm:$0xff] }
 0xdc7   : > { %v10424_v35 = vpop.permute.xlu0 %10423  ;;  %v8220_v55 = vld [vmem:[%s13039_s7 + $0x130] sm:$0xff] }
 0xdc8   : > { %v10426_v56 = vunpack.i.h.bf16 %v10424_v35  ;;  %v10425_v45 = vunpack.i.l.bf16 %v10424_v35  ;;  %9865 = vmatprep.subr.bf16.mxu0 %v9864_v26  ;;  %9897 = vmatprep.subr.bf16.mxu1 %v9864_v26 }
 0xdc9   : > { %9867 = vmatpush3.bf16.msra.mxu0 %v9864_v26  ;;  %9899 = vmatpush3.bf16.msra.mxu1 %v9864_v26 }
 0xdca   : > { %v9868_v9 = vpack.c.bf16 %v10426_v56, %v10425_v45  ;;  %6033 = vperm.xlu0 %10230, %v5955_v46   ;;  %6726 = vperm.xlu1 %10231, %v6660_v0   ;;  %v8205_v46 = vld [vmem:[%s13039_s7 + $0xb8] sm:$0xff]  ;;  %v8206_v56 = vld [vmem:[%s13039_s7 + $0xc0] sm:$0xff] }
 0xdcb   : > { %v10429_v53 = vpop.permute.xlu1 %10428  ;;  %v8221_v0 = vld [vmem:[%s13039_s7 + $0x138] sm:$0xff]  ;;  %v8222_v45 = vld [vmem:[%s13039_s7 + $0x140] sm:$0xff] }
 0xdcc   : > { %v10431_v57 = vunpack.i.h.bf16 %v10429_v53  ;;  %v10430_v16 = vunpack.i.l.bf16 %v10429_v53  ;;  %9869 = vmatprep.subr.bf16.mxu0 %v9868_v9  ;;  %9901 = vmatprep.subr.bf16.mxu1 %v9868_v9 }
 0xdcd   : > { %9871 = vmatpush3.bf16.msra.mxu0 %v9868_v9  ;;  %9903 = vmatpush3.bf16.msra.mxu1 %v9868_v9 }
 0xdce   : > { %v9872_v29 = vpack.c.bf16 %v10431_v57, %v10430_v16  ;;  %6838 = vperm.xlu0 %10230, %v6772_v51   ;;  %6731 = vperm.xlu1 %10231, %v6661_v43   ;;  %v8207_v57 = vld [vmem:[%s13039_s7 + $0xc8] sm:$0xff] }
 0xdcf   : > { %v10434_v2 = vpop.permute.xlu0 %10433  ;;  %v8223_v16 = vld [vmem:[%s13039_s7 + $0x148] sm:$0xff] }
 0xdd0   : > { %v10436_v63 = vunpack.i.h.bf16 %v10434_v2  ;;  %v10435_v28 = vunpack.i.l.bf16 %v10434_v2  ;;  %9873 = vmatprep.subr.bf16.mxu0 %v9872_v29  ;;  %9905 = vmatprep.subr.bf16.mxu1 %v9872_v29  ;;  %v8224_v2 = vld [vmem:[%s13039_s7 + $0x150] sm:$0xff] }
 0xdd1   : > { %9875 = vmatpush3.bf16.msra.mxu0 %v9872_v29  ;;  %9907 = vmatpush3.bf16.msra.mxu1 %v9872_v29  ;;  %v8208_v29 = vld [vmem:[%s13039_s7 + $0xd0] sm:$0xff] }
 0xdd2   : > { %v9876_v39 = vpack.c.bf16 %v10436_v63, %v10435_v28  ;;  %6736 = vperm.xlu0 %10230, %v6662_v42   ;;  %6843 = vperm.xlu1 %10231, %v6773_v1  }
 0xdd3   : > { %v10439_v33 = vpop.permute.xlu1 %10438 }
 0xdd4   : > { %v10441_v38 = vunpack.i.h.bf16 %v10439_v33  ;;  %v10440_v25 = vunpack.i.l.bf16 %v10439_v33  ;;  %9877 = vmatprep.subr.bf16.mxu0 %v9876_v39  ;;  %9909 = vmatprep.subr.bf16.mxu1 %v9876_v39  ;;  %v8225_v33 = vld [vmem:[%s13039_s7 + $0x158] sm:$0xff] }
 0xdd5   : > { %9879 = vmatpush3.bf16.msra.mxu0 %v9876_v39  ;;  %9911 = vmatpush3.bf16.msra.mxu1 %v9876_v39  ;;  %v8209_v39 = vld [vmem:[%s13039_s7 + $0xd8] sm:$0xff] }
 0xdd6   : > { %v9880_v62 = vpack.c.bf16 %v10441_v38, %v10440_v25  ;;  %6848 = vperm.xlu0 %10230, %v6774_v8   ;;  %6741 = vperm.xlu1 %10231, %v6663_v7   ;;  %v8210_v8 = vld [vmem:[%s13039_s7 + $0xe0] sm:$0xff] }
 0xdd7   : > { %v10444_v10 = vpop.permute.xlu0 %10443  ;;  %v8226_v7 = vld [vmem:[%s13039_s7 + $0x160] sm:$0xff] }
 0xdd8   : > { %v10446_v40 = vunpack.i.h.bf16 %v10444_v10  ;;  %v10445_v47 = vunpack.i.l.bf16 %v10444_v10  ;;  %9881 = vmatprep.subr.bf16.mxu0 %v9880_v62  ;;  %9913 = vmatprep.subr.bf16.mxu1 %v9880_v62  ;;  %v8211_v10 = vld [vmem:[%s13039_s7 + $0xe8] sm:$0xff] }
 0xdd9   : > { %9883 = vmatpush3.bf16.msra.mxu0 %v9880_v62  ;;  %9915 = vmatpush3.bf16.msra.mxu1 %v9880_v62 }
 0xdda   : > { %v9884_v61 = vpack.c.bf16 %v10446_v40, %v10445_v47  ;;  %6853 = vperm.xlu1 %10231, %v6775_v22   ;;  %v8227_v22 = vld [vmem:[%s13039_s7 + $0x168] sm:$0xff]  ;;  %v8212_v40 = vld [vmem:[%s13039_s7 + $0xf0] sm:$0xff] }
 0xddb   : > { %v10454_v5 = vpop.permute.xlu0 %10453  ;;  %v10449_v21 = vpop.permute.xlu1 %10448  ;;  %v8228_v47 = vld [vmem:[%s13039_s7 + $0x170] sm:$0xff] }
 0xddc   : > { %v10456_v15 = vunpack.i.h.bf16 %v10454_v5  ;;  %v10455_v24 = vunpack.i.l.bf16 %v10454_v5  ;;  %v10451_v6 = vunpack.i.h.bf16 %v10449_v21  ;;  %v10450_v54 = vunpack.i.l.bf16 %v10449_v21  ;;  %9885 = vmatprep.subr.bf16.mxu0 %v9884_v61  ;;  %9917 = vmatprep.subr.bf16.mxu1 %v9884_v61  ;;  %v8213_v5 = vld [vmem:[%s13039_s7 + $0xf8] sm:$0xff] }
 0xddd   : > { %9887 = vmatpush3.bf16.msra.mxu0 %v9884_v61  ;;  %9919 = vmatpush3.bf16.msra.mxu1 %v9884_v61  ;;  %v8229_v21 = vld [vmem:[%s13039_s7 + $0x178] sm:$0xff] }
 0xdde   : > { %v9888_v49 = vpack.c.bf16 %v10451_v6, %v10450_v54  ;;  %v9924_v32 = vpack.c.bf16 %v10456_v15, %v10455_v24  ;;  %v6245_v15 = vld [vmem:[%s13039_s7] sm:$0xff]  ;;  %v6246_v24 = vld [vmem:[%s13039_s7 + $0x8] sm:$0xff]  ;;  %v6247_v6 = vld [vmem:[%s13039_s7 + $0x10] sm:$0xff]  ;;  %v13043_v54 = vmov 0.0|0.0  }
 0xddf   : > { %v10459_v18 = vpop.permute.xlu1 %10458  ;;  %v10464_v41 = vpop.permute.xlu0 %10463 }
 0xde0   : > { %v10461_v13 = vunpack.i.h.bf16 %v10459_v18  ;;  %v10460_v59 = vunpack.i.l.bf16 %v10459_v18  ;;  %9889 = vmatprep.subr.bf16.mxu0 %v9888_v49  ;;  %9921 = vmatprep.subr.bf16.mxu1 %v9888_v49  ;;  %v10466_v52 = vunpack.i.h.bf16 %v10464_v41  ;;  %v10465_v50 = vunpack.i.l.bf16 %v10464_v41  ;;  %v6249_v18 = vld [vmem:[%s13039_s7 + $0x20] sm:$0xff] }
 0xde1   : > { %9891 = vmatpush3.bf16.msra.mxu0 %v9888_v49  ;;  %9923 = vmatpush3.bf16.msra.mxu1 %v9888_v49  ;;  %v6248_v49 = vld [vmem:[%s13039_s7 + $0x18] sm:$0xff]  ;;  %v6253_v41 = vld [vmem:[%s13039_s7 + $0x40] sm:$0xff] }
 0xde2   : > { %9925 = vmatprep.subr.bf16.mxu1 %v9924_v32  ;;  %v9928_v11 = vpack.c.bf16 %v10461_v13, %v10460_v59  ;;  %v9932_v4 = vpack.c.bf16 %v10466_v52, %v10465_v50  ;;  %v6251_v13 = vld [vmem:[%s13039_s7 + $0x30] sm:$0xff]  ;;  %v6252_v59 = vld [vmem:[%s13039_s7 + $0x38] sm:$0xff]  ;;  %v6258_v52 = vld [vmem:[%s13039_s7 + $0x68] sm:$0xff] }
 0xde3   : > { %v10469_v31 = vpop.permute.xlu1 %10468  ;;  %v10474_v23 = vpop.permute.xlu0 %10473  ;;  %v6259_v50 = vld [vmem:[%s13039_s7 + $0x70] sm:$0xff] }
 0xde4   : > { %9280 = vmatmul.mubr.f32.vlgmr.msra.gmra.mrb[84].mxu0 %v8199_v36  ;;  %9336 = vmatmul.mubr.f32.vlgmr.msra.gmra.mrb[36].mxu1 %v8215_v17  ;;  %v10471_v19 = vunpack.i.h.bf16 %v10469_v31  ;;  %v10470_v20 = vunpack.i.l.bf16 %v10469_v31  ;;  %v10476_v27 = vunpack.i.h.bf16 %v10474_v23  ;;  %v10475_v37 = vunpack.i.l.bf16 %v10474_v23  ;;  %v6254_v36 = vld [vmem:[%s13039_s7 + $0x48] sm:$0xff]  ;;  %v6255_v17 = vld [vmem:[%s13039_s7 + $0x50] sm:$0xff]  ;;  %v6925_v31 = vld [vmem:[%s13044_s10] sm:$0xff] }
 0xde5   : > { %9927 = vmatpush3.bf16.msra.mxu1 %v9924_v32  ;;  %9282 = vmatprep.mubr.f32.mxu0 %v8200_v44  ;;  %v6250_v32 = vld [vmem:[%s13039_s7 + $0x28] sm:$0xff]  ;;  %v6256_v44 = vld [vmem:[%s13039_s7 + $0x58] sm:$0xff] }
 0xde6   : > { %9929 = vmatprep.subr.bf16.mxu1 %v9928_v11  ;;  %9338 = vmatprep.mubr.f32.mxu1 %v8216_v58  ;;  %v9936_v26 = vpack.c.bf16 %v10471_v19, %v10470_v20  ;;  %v9940_v9 = vpack.c.bf16 %v10476_v27, %v10475_v37  ;;  %v6257_v58 = vld [vmem:[%s13039_s7 + $0x60] sm:$0xff]  ;;  %v6921_v23 = vld [vmem:[%s13045_s2 + $0x8] sm:$0xff] }
 0xde7   : > { %v10479_v35 = vpop.permute.xlu1 %10478  ;;  %v10484_v43 = vpop.permute.xlu0 %10483  ;;  %v6929_v19 = vld [vmem:[%s13044_s10 + $0x20] sm:$0x3] }
 0xde8   : > { %9283 = vmatmul.mubr.f32.gmra.mrb[86].mxu0 %v8201_v12  ;;  %9339 = vmatmul.mubr.f32.gmra.mrb[38].mxu1 %v8217_v60  ;;  %v10481_v53 = vunpack.i.h.bf16 %v10479_v35  ;;  %v10480_v51 = vunpack.i.l.bf16 %v10479_v35  ;;  %v10486_v42 = vunpack.i.h.bf16 %v10484_v43  ;;  %v10485_v1 = vunpack.i.l.bf16 %v10484_v43  ;;  %v6926_v12 = vld [vmem:[%s13044_s10 + $0x8] sm:$0xff]  ;;  %v6920_v20 = vld [vmem:[%s13045_s2] sm:$0xff] }
 0xde9   : > { %9931 = vmatpush3.bf16.msra.mxu1 %v9928_v11  ;;  %9285 = vmatprep.mubr.f32.mxu0 %v8202_v30  ;;  %v6260_v11 = vld [vmem:[%s13039_s7 + $0x78] sm:$0xff]  ;;  %v9956_v60 = vpack.c.bf16 %v6926_v12, %v6925_v31  ;;  %v6927_v30 = vld [vmem:[%s13044_s10 + $0x10] sm:$0xff] }
 0xdea   : > { %9933 = vmatprep.subr.bf16.mxu1 %v9932_v4  ;;  %9341 = vmatprep.mubr.f32.mxu1 %v8218_v14  ;;  %v9944_v63 = vpack.c.bf16 %v10481_v53, %v10480_v51  ;;  %v9948_v38 = vpack.c.bf16 %v10486_v42, %v10485_v1  ;;  %v6928_v14 = vld [vmem:[%s13044_s10 + $0x18] sm:$0xff] }
 0xdeb   : > { %v10489_v28 = vpop.permute.xlu1 %10488  ;;  %9957 = vmatprep.subr.bf16.mxu0 %v9956_v60 }
 0xdec   : > { %9286 = vmatmul.mubr.f32.gmra.mrb[88].mxu0 %v8203_v34  ;;  %9342 = vmatmul.mubr.f32.gmra.mrb[40].mxu1 %v8219_v3  ;;  %v10491_v25 = vunpack.i.h.bf16 %v10489_v28  ;;  %v10490_v62 = vunpack.i.l.bf16 %v10489_v28  ;;  %v12564_v34 = vpack.c.bf16 %v6921_v23, %v6920_v20 }
 0xded   : > { %9935 = vmatpush3.bf16.msra.mxu1 %v9932_v4  ;;  %9288 = vmatprep.mubr.f32.mxu0 %v8204_v48  ;;  %v9960_v4 = vpack.c.bf16 %v6928_v14, %v6927_v30 }
 0xdee   : > { %9937 = vmatprep.subr.bf16.mxu1 %v9936_v26  ;;  %9344 = vmatprep.mubr.f32.mxu1 %v8220_v55  ;;  %v9952_v61 = vpack.c.bf16 %v10491_v25, %v10490_v62 }
 0xdef   : > { %9959 = vmatpush3.bf16.msra.mxu0 %v9956_v60 }
 0xdf0   : > { %9289 = vmatmul.mubr.f32.gmra.mrb[90].mxu0 %v8205_v46  ;;  %9345 = vmatmul.mubr.f32.gmra.mrb[42].mxu1 %v8221_v0 }
 0xdf1   : > { %9939 = vmatpush3.bf16.msra.mxu1 %v9936_v26  ;;  %9291 = vmatprep.mubr.f32.mxu0 %v8206_v56 }
 0xdf2   : > { %9941 = vmatprep.subr.bf16.mxu1 %v9940_v9  ;;  %9347 = vmatprep.mubr.f32.mxu1 %v8222_v45 }
 0xdf3   : > { %9961 = vmatprep.subr.bf16.mxu0 %v9960_v4 }
 0xdf4   : > { %9292 = vmatmul.mubr.f32.gmra.mrb[92].mxu0 %v8207_v57  ;;  %9348 = vmatmul.mubr.f32.gmra.mrb[44].mxu1 %v8223_v16 }
 0xdf5   : > { %9943 = vmatpush3.bf16.msra.mxu1 %v9940_v9  ;;  %9294 = vmatprep.mubr.f32.mxu0 %v8208_v29 }
 0xdf6   : > { %9945 = vmatprep.subr.bf16.mxu1 %v9944_v63  ;;  %9350 = vmatprep.mubr.f32.mxu1 %v8224_v2 }
 0xdf7   : > { %9963 = vmatpush3.bf16.msra.mxu0 %v9960_v4 }
 0xdf8   : > { %9295 = vmatmul.mubr.f32.gmra.mrb[94].mxu0 %v8209_v39  ;;  %9351 = vmatmul.mubr.f32.gmra.mrb[46].mxu1 %v8225_v33  ;;  %v12567_v3 = vpop.permute.xlu0 %5958 }
 0xdf9   : > { %9947 = vmatpush3.bf16.msra.mxu1 %v9944_v63  ;;  %9297 = vmatprep.mubr.f32.mxu0 %v8210_v8 }
 0xdfa   : > { %9949 = vmatprep.subr.bf16.mxu1 %v9948_v38  ;;  %9353 = vmatprep.mubr.f32.mxu1 %v8226_v7 }
 0xdfb   : > { %9423 = vmatprep.subr.msk.mxu0 %vm3694_vm4, %v6929_v19 }
 0xdfc   : > { %9298 = vmatmul.mubr.f32.gmra.mrb[96].mxu0 %v8211_v10  ;;  %9354 = vmatmul.mubr.f32.gmra.mrb[48].mxu1 %v8227_v22  ;;  %v12569_v48 = vpop.permute.xlu1 %5963  ;;  %v12571_v55 = vpop.permute.xlu0 %5968 }
 0xdfd   : > { %9951 = vmatpush3.bf16.msra.mxu1 %v9948_v38  ;;  %9300 = vmatprep.mubr.f32.mxu0 %v8212_v40 }
 0xdfe   : > { %9953 = vmatprep.subr.bf16.mxu1 %v9952_v61  ;;  %9356 = vmatprep.mubr.f32.mxu1 %v8228_v47 }
 0xdff   : > { %9424 = vmatpush3.msk.msra.mxu0 %vm3694_vm4, %v6929_v19 }
 0xe00   : > { %9301 = vmatmul.mubr.f32.gmra.mrb[98].mxu0 %v8213_v5  ;;  %9357 = vmatmul.mubr.f32.gmra.mrb[50].mxu1 %v8229_v21  ;;  %v12573_v27 = vpop.permute.xlu1 %6666  ;;  %v12575_v37 = vpop.permute.xlu0 %5973 }
 0xe01   : > { %9955 = vmatpush3.bf16.msra.mxu1 %v9952_v61  ;;  %9391 = vmatprep.mubr.f32.mxu1 %v6245_v15 }
 0xe02   : > { %9972 = vmatprep.subr.bf16.mxu1 %v13043_v54  ;;  %9965 = vmatprep.subr.bf16.mxu0 %v12564_v34 }
 0xe04   : > { %9392 = vmatmul.mubr.f32.vlgmr.msra.gmra.mrb[36].mxu1 %v6246_v24  ;;  %v12577_v26 = vpop.permute.xlu1 %6671  ;;  %v12579_v35 = vpop.permute.xlu0 %6778 }
 0xe05   : > { %9394 = vmatprep.mubr.f32.mxu1 %v6247_v6 }
 0xe08   : > { %9395 = vmatmul.mubr.f32.gmra.mrb[38].mxu1 %v6248_v49  ;;  %v12581_v46 = vpop.permute.xlu1 %6783  ;;  %v12583_v0 = vpop.permute.xlu0 %5978 }
 0xe09   : > { %9397 = vmatprep.mubr.f32.mxu1 %v6249_v18 }
 0xe0c   : > { %9398 = vmatmul.mubr.f32.gmra.mrb[40].mxu1 %v6250_v32  ;;  %v12585_v56 = vpop.permute.xlu1 %6676  ;;  %v12587_v45 = vpop.permute.xlu0 %5983 }
 0xe0d   : > { %9400 = vmatprep.mubr.f32.mxu1 %v6251_v13 }
 0xe10   : > { %9401 = vmatmul.mubr.f32.gmra.mrb[42].mxu1 %v6252_v59  ;;  %v12589_v9 = vpop.permute.xlu1 %6681  ;;  %v12591_v53 = vpop.permute.xlu0 %6788 }
 0xe11   : > { %9403 = vmatprep.mubr.f32.mxu1 %v6253_v41 }
 0xe14   : > { %9404 = vmatmul.mubr.f32.gmra.mrb[44].mxu1 %v6254_v36  ;;  %v12593_v51 = vpop.permute.xlu1 %6793  ;;  %v12595_v43 = vpop.permute.xlu0 %5988 }
 0xe15   : > { %9406 = vmatprep.mubr.f32.mxu1 %v6255_v17 }
 0xe18   : > { %9407 = vmatmul.mubr.f32.gmra.mrb[46].mxu1 %v6256_v44  ;;  %v12597_v57 = vpop.permute.xlu1 %6686  ;;  %v12599_v16 = vpop.permute.xlu0 %5993 }
 0xe19   : > { %9409 = vmatprep.mubr.f32.mxu1 %v6257_v58 }
 0xe1c   : > { %9410 = vmatmul.mubr.f32.gmra.mrb[48].mxu1 %v6258_v52  ;;  %v12601_v29 = vpop.permute.xlu1 %6691  ;;  %v12603_v2 = vpop.permute.xlu0 %6798 }
 0xe1d   : > { %9412 = vmatprep.mubr.f32.mxu1 %v6259_v50 }
 0xe20   : > { %9413 = vmatmul.mubr.f32.gmra.mrb[50].mxu1 %v6260_v11  ;;  %v12605_v42 = vpop.permute.xlu1 %6803  ;;  %v12607_v1 = vpop.permute.xlu0 %5998 }
 0xe24   : > { %v12609_v63 = vpop.permute.xlu1 %6696  ;;  %v12611_v28 = vpop.permute.xlu0 %6003 }
 0xe28   : > { %v12613_v39 = vpop.permute.xlu1 %6701  ;;  %v12617_v8 = vpop.permute.xlu0 %6808 }
 0xe2c   : > { %v12621_v38 = vpop.permute.xlu1 %6813  ;;  %v12627_v10 = vpop.permute.xlu0 %6008 }
 0xe30   : > { %v12629_v22 = vpop.permute.xlu1 %6706  ;;  %v12636_v15 = vpop.permute.xlu0 %6013 }
 0xe34   : > { %v12640_v6 = vpop.permute.xlu1 %6711  ;;  %v12651_v41 = vpop.permute.xlu0 %6818 }
 0xe38   : > { %v12653_v36 = vpop.permute.xlu1 %6823  ;;  %v12661_v52 = vpop.permute.xlu0 %6018 }
 0xe3c   : > { %v12665_v11 = vpop.permute.xlu1 %6716  ;;  %v12671_v60 = vpop.permute.xlu0 %6023 }
 0xe40   : > { %v12673_v30 = vpop.permute.xlu1 %6721 }
 0xeb7   : > { %v12615_v33 = vpop.f32.mrb[84].mxu0 }
 0xeb8   : > { %v12619_v7 = vpop.f32.mrb[85].mxu0 }
 0xebb   : > { %v12623_v25 = vpop.f32.mrb[86].mxu0 }
 0xebc   : > { %v12625_v62 = vpop.f32.mrb[87].mxu0 }
 0xebf   : > { %v12631_v40 = vpop.f32.mrb[88].mxu0 }
 0xec0   : > { %v6186_v47 = vpop.f32.mrb[89].mxu0 }
 0xec1   : > { %v6187_v61 = vadd.f32 %v6186_v47, %v12583_v0 }
 0xec3   : > { %v6636_v5 = vmax.f32 %v6187_v61, 0.0  ;;  %v12634_v21 = vpop.f32.mrb[90].mxu0 }
 0xec4   : > { %13046 = vst [vmem:[#allocation20_spill] sm:$0xff] %v12634_v21  ;;  %v12638_v24 = vpop.f32.mrb[91].mxu0 }
 0xec5   : > { %v6748_v49 = vmul.f32 %v12597_v57, %v6636_v5  ;;  %v12677_v5 = vpop.permute.xlu0 %6828 }
 0xec7   : > { %v12644_v18 = vadd.f32 %v12603_v2, %v6748_v49  ;;  %v12646_v32 = vpop.f32.mrb[92].mxu0 }
 0xec8   : > { %13048 = vst [vmem:[#allocation22_spill] sm:$0xff] %v12646_v32  ;;  %v6206_v13 = vpop.f32.mrb[93].mxu0 }
 0xec9   : > { %13047 = vst [vmem:[#allocation21_spill] sm:$0xff] %v12644_v18  ;;  %v12649_v59 = vadd.f32 %v6206_v13, %v12607_v1 }
 0xecb   : > { %13049 = vst [vmem:[#allocation24_spill] sm:$0xff] %v12649_v59  ;;  %v12655_v17 = vpop.f32.mrb[94].mxu0 }
 0xecc   : > { %13050 = vst [vmem:[#allocation27_spill] sm:$0xff] %v12655_v17  ;;  %v12657_v44 = vpop.f32.mrb[95].mxu0  ;;  %v6923_v17 = vld [vmem:[%s13045_s2 + $0x18] sm:$0xff] }
 0xecd   : > { %13051 = vst [vmem:[#allocation23_spill] sm:$0xff] %v12657_v44 }
 0xecf   : > { %v12659_v58 = vpop.f32.mrb[96].mxu0 }
 0xed0   : > { %13052 = vst [vmem:[#allocation26_spill] sm:$0xff] %v12659_v58  ;;  %v12663_v50 = vpop.f32.mrb[97].mxu0 }
 0xed1   : > { %13053 = vst [vmem:[#allocation30_spill] sm:$0xff] %v12663_v50 }
 0xed3   : > { %v12667_v31 = vpop.f32.mrb[98].mxu0 }
 0xed4   : > { %13054 = vst [vmem:[#allocation25_spill] sm:$0xff] %v12667_v31  ;;  %v12669_v12 = vpop.f32.mrb[99].mxu0 }
 0xed5   : > { %13055 = vst [vmem:[#allocation29_spill] sm:$0xff] %v12669_v12  ;;  %v12681_v12 = vpop.permute.xlu1 %6833 }
 0xed7   : > { %v9393_v14 = vpop.f32.mrb[36].mxu1 }
 0xed8   : > { %v6617_v4 = vadd.f32 %v9393_v14, %v12569_v48  ;;  %v6537_v19 = vpop.f32.mrb[37].mxu1  ;;  %v6922_v14 = vld [vmem:[%s13045_s2 + $0x10] sm:$0xff] }
 0xed9   : > { %v6616_v20 = vadd.f32 %v6537_v19, %v12567_v3  ;;  %v9968_v32 = vpack.c.bf16 %v6923_v17, %v6922_v14 }
 0xeda   : > { %v6873_v23 = vmax.f32 %v6617_v4, 0.0 }
 0xedb   : > { %v6872_v47 = vmax.f32 %v6616_v20, 0.0  ;;  %v9396_v61 = vpop.f32.mrb[38].mxu1 }
 0xedc   : > { %v6889_v49 = vmul.f32 %v6873_v23, %v12577_v26  ;;  %v6619_v13 = vadd.f32 %v9396_v61, %v12575_v37  ;;  %v6547_v31 = vpop.f32.mrb[39].mxu1 }
 0xedd   : > { %v6888_v58 = vmul.f32 %v6872_v47, %v12573_v27  ;;  %v6618_v50 = vadd.f32 %v6547_v31, %v12571_v55  ;;  %v12694_v31 = vpop.permute.xlu0 %6028 }
 0xede   : > { %v6875_v18 = vmax.f32 %v6619_v13, 0.0  ;;  %v6905_v44 = vadd.f32 %v6889_v49, %v12581_v46 }
 0xedf   : > { %v6904_v4 = vadd.f32 %v6888_v58, %v12579_v35  ;;  %v6874_v19 = vmax.f32 %v6618_v50, 0.0  ;;  %v9399_v20 = vpop.f32.mrb[40].mxu1  ;;  %v12697_v50 = vpop.permute.xlu1 %6726 }
 0xee0   : > { %v6891_v23 = vmul.f32 %v6875_v18, %v12589_v9  ;;  %v6621_v61 = vadd.f32 %v9399_v20, %v12587_v45  ;;  %v6557_v59 = vpop.f32.mrb[41].mxu1 }
 0xee1   : > { %v6890_v21 = vmul.f32 %v6874_v19, %v12585_v56  ;;  %v6620_v47 = vadd.f32 %v6557_v59, %v12583_v0  ;;  %9425 = vmatprep.mubr.msk.f32.mxu0 %vm4336_vm6, %v6904_v4  ;;  %v6924_v19 = vld [vmem:[%s13045_s2 + $0x20] sm:$0x3]  ;;  %s13068_s2 = smov 126  }
 0xee2   : > { %v6877_v58 = vmax.f32 %v6621_v61, 0.0  ;;  %9426 = vmatmul.mubr.msk.f32.vlgmr.msra.gmra.mrb[100].mxu0 %vm4336_vm6, %v6905_v44  ;;  %v6907_v17 = vadd.f32 %v6891_v23, %v12593_v51  ;;  %v12710_v61 = vpop.permute.xlu0 %6033 }
 0xee3   : > { %v6906_v18 = vadd.f32 %v6890_v21, %v12591_v53  ;;  %v6876_v49 = vmax.f32 %v6620_v47, 0.0  ;;  %v9402_v13 = vpop.f32.mrb[42].mxu1  ;;  %9967 = vmatpush3.bf16.msra.mxu0 %v12564_v34 }
 0xee4   : > { %v6893_v0 = vmul.f32 %v6877_v58, %v12601_v29  ;;  %v6623_v59 = vadd.f32 %v9402_v13, %v12599_v16  ;;  %v6567_v14 = vpop.f32.mrb[43].mxu1  ;;  %9969 = vmatprep.subr.bf16.mxu0 %v9968_v32 }
 0xee5   : > { %v6892_v4 = vmul.f32 %v6876_v49, %v12597_v57  ;;  %v6622_v44 = vadd.f32 %v6567_v14, %v12595_v43  ;;  %9428 = vmatprep.mubr.msk.f32.mxu0 %vm4336_vm6, %v6906_v18  ;;  %v12716_v18 = vpop.permute.xlu1 %6731 }
 0xee6   : > { %v6879_v21 = vmax.f32 %v6623_v59, 0.0  ;;  %9429 = vmatmul.mubr.msk.f32.gmra.mrb[102].mxu0 %vm4336_vm6, %v6907_v17  ;;  %v6909_v47 = vadd.f32 %v6893_v0, %v12605_v42 }
 0xee7   : > { %v6908_v34 = vadd.f32 %v6892_v4, %v12603_v2  ;;  %v6878_v20 = vmax.f32 %v6622_v44, 0.0  ;;  %v9405_v23 = vpop.f32.mrb[44].mxu1  ;;  %9971 = vmatpush3.bf16.msra.mxu0 %v9968_v32 }
 0xee8   : > { %v6895_v58 = vmul.f32 %v6879_v21, %v12613_v39  ;;  %v6625_v57 = vadd.f32 %v9405_v23, %v12611_v28  ;;  %v6577_v49 = vpop.f32.mrb[45].mxu1  ;;  %9457 = vmatprep.subr.msk.mxu0 %vm3694_vm4, %v6924_v19 }
 0xee9   : > { %v6894_v13 = vmul.f32 %v6878_v20, %v12609_v63  ;;  %v6624_v2 = vadd.f32 %v6577_v49, %v12607_v1  ;;  %9431 = vmatprep.mubr.msk.f32.mxu0 %vm4336_vm6, %v6908_v34  ;;  %v12731_v20 = vpop.permute.xlu0 %6838 }
 0xeea   : > { %v6881_v32 = vmax.f32 %v6625_v57, 0.0  ;;  %9432 = vmatmul.mubr.msk.f32.gmra.mrb[104].mxu0 %vm4336_vm6, %v6909_v47  ;;  %v6911_v14 = vadd.f32 %v6895_v58, %v12621_v38 }
 0xeeb   : > { %v6910_v17 = vadd.f32 %v6894_v13, %v12617_v8  ;;  %v6880_v0 = vmax.f32 %v6624_v2, 0.0  ;;  %v9408_v59 = vpop.f32.mrb[46].mxu1  ;;  %9458 = vmatpush3.msk.msra.mxu0 %vm3694_vm4, %v6924_v19  ;;  %v12734_v19 = vpop.permute.xlu1 %6843 }
 0xeec   : > { %v6897_v4 = vmul.f32 %v6881_v32, %v12640_v6  ;;  %v6627_v44 = vadd.f32 %v9408_v59, %v12636_v15  ;;  %v6587_v21 = vpop.f32.mrb[47].mxu1  ;;  %9996 = vmatprep.subr.bf16.mxu0 %v13043_v54 }
 0xeed   : > { %v6896_v1 = vmul.f32 %v6880_v0, %v12629_v22  ;;  %v6626_v34 = vadd.f32 %v6587_v21, %v12627_v10  ;;  %9434 = vmatprep.mubr.msk.f32.mxu0 %vm4336_vm6, %v6910_v17  ;;  %v6167_v17 = vadd.f32 %v12619_v7, %v12567_v3 }
 0xeee   : > { %v6883_v23 = vmax.f32 %v6627_v44, 0.0  ;;  %9435 = vmatmul.mubr.msk.f32.gmra.mrb[106].mxu0 %vm4336_vm6, %v6911_v14  ;;  %v6913_v49 = vadd.f32 %v6897_v4, %v12653_v36 }
 0xeef   : > { %v6912_v47 = vadd.f32 %v6896_v1, %v12651_v41  ;;  %v6882_v58 = vmax.f32 %v6626_v34, 0.0  ;;  %v9411_v57 = vpop.f32.mrb[48].mxu1  ;;  %v12747_v1 = vpop.permute.xlu0 %6736  ;;  %v6172_v34 = vadd.f32 %v12615_v33, %v12569_v48 }
 0xef0   : > { %v6899_v13 = vmul.f32 %v6883_v23, %v12673_v30  ;;  %v6629_v2 = vadd.f32 %v9411_v57, %v12671_v60  ;;  %v6597_v32 = vpop.f32.mrb[49].mxu1  ;;  %v6632_v57 = vmax.f32 %v6167_v17, 0.0 }
 0xef1   : > { %v6898_v0 = vmul.f32 %v6882_v58, %v12665_v11  ;;  %v6628_v59 = vadd.f32 %v6597_v32, %v12661_v52  ;;  %9437 = vmatprep.mubr.msk.f32.mxu0 %vm4336_vm6, %v6912_v47  ;;  %v12754_v47 = vpop.permute.xlu1 %6741 }
 0xef2   : > { %v6885_v14 = vmax.f32 %v6629_v2, 0.0  ;;  %9438 = vmatmul.mubr.msk.f32.gmra.mrb[108].mxu0 %vm4336_vm6, %v6913_v49  ;;  %v6915_v3 = vadd.f32 %v6899_v13, %v12681_v12  ;;  %v6177_v49 = vadd.f32 %v12625_v62, %v12571_v55  ;;  %v6744_v62 = vmul.f32 %v12573_v27, %v6632_v57 }
 0xef3   : > { %v6914_v44 = vadd.f32 %v6898_v0, %v12677_v5  ;;  %v6884_v4 = vmax.f32 %v6628_v59, 0.0  ;;  %v9414_v21 = vpop.f32.mrb[50].mxu1  ;;  %v6633_v0 = vmax.f32 %v6172_v34, 0.0  ;;  %v6182_v59 = vadd.f32 %v12623_v25, %v12575_v37 }
 0xef4   : > { %v6901_v7 = vmul.f32 %v6885_v14, %v12716_v18  ;;  %v6631_v23 = vadd.f32 %v9414_v21, %v12710_v61  ;;  %v6607_v58 = vpop.f32.mrb[51].mxu1  ;;  %v6634_v14 = vmax.f32 %v6177_v49, 0.0 }
 0xef5   : > { %v6900_v2 = vmul.f32 %v6884_v4, %v12697_v50  ;;  %v6630_v32 = vadd.f32 %v6607_v58, %v12694_v31  ;;  %9440 = vmatprep.mubr.msk.f32.mxu0 %vm4336_vm6, %v6914_v44  ;;  %v12770_v44 = vpop.permute.xlu0 %6848  ;;  %v12773_v21 = vpop.permute.xlu1 %6853  ;;  %v6745_v37 = vmul.f32 %v12577_v26, %v6633_v0  ;;  %v6635_v25 = vmax.f32 %v6182_v59, 0.0  ;;  %v13061_v59 = vld [vmem:[#allocation27_spill] sm:$0xff] }
 0xef6   : > { %v6887_v48 = vmax.f32 %v6631_v23, 0.0  ;;  %9441 = vmatmul.mubr.msk.f32.gmra.mrb[110].mxu0 %vm4336_vm6, %v6915_v3  ;;  %v6917_v17 = vadd.f32 %v6901_v7, %v12734_v19  ;;  %v6192_v3 = vadd.f32 %v12631_v40, %v12587_v45  ;;  %v6856_v7 = vadd.f32 %v12579_v35, %v6744_v62  ;;  %v13056_v40 = vld [vmem:[#allocation20_spill] sm:$0xff] }
 0xef7   : > { %v6916_v33 = vadd.f32 %v6900_v2, %v12731_v20  ;;  %v6886_v13 = vmax.f32 %v6630_v32, 0.0  ;;  %v6746_v23 = vmul.f32 %v12585_v56, %v6634_v14  ;;  %v6197_v58 = vadd.f32 %v12638_v24, %v12595_v43 }
 0xef8   : > { %v6903_v55 = vmul.f32 %v6887_v48, %v12754_v47  ;;  %v6857_v26 = vadd.f32 %v12581_v46, %v6745_v37  ;;  %v6747_v57 = vmul.f32 %v12589_v9, %v6635_v25  ;;  %v6637_v45 = vmax.f32 %v6192_v3, 0.0  ;;  %v13057_v46 = vld [vmem:[#allocation22_spill] sm:$0xff]  ;;  %v13058_v48 = vld [vmem:[#allocation24_spill] sm:$0xff]  ;;  %v13064_v37 = vld [vmem:[#allocation29_spill] sm:$0xff] }
 0xef9   : > { %v6902_v4 = vmul.f32 %v6886_v13, %v12747_v1  ;;  %9443 = vmatprep.mubr.msk.f32.mxu0 %vm4336_vm6, %v6916_v33  ;;  %v6202_v49 = vadd.f32 %v13056_v40, %v12599_v16  ;;  %v6858_v35 = vadd.f32 %v12591_v53, %v6746_v23  ;;  %v6638_v56 = vmax.f32 %v6197_v58, 0.0  ;;  %v13059_v16 = vld [vmem:[#allocation23_spill] sm:$0xff]  ;;  %v13060_v13 = vld [vmem:[#allocation21_spill] sm:$0xff] }
 0xefa   : > { %9444 = vmatmul.mubr.msk.f32.gmra.mrb[112].mxu0 %vm4336_vm6, %v6917_v17  ;;  %v6919_v27 = vadd.f32 %v6903_v55, %v12773_v21  ;;  %v6859_v43 = vadd.f32 %v12593_v51, %v6747_v57  ;;  %v6749_v24 = vmul.f32 %v12601_v29, %v6637_v45  ;;  %v6212_v32 = vadd.f32 %v13057_v46, %v12611_v28  ;;  %v13065_v3 = vld [vmem:[#allocation25_spill] sm:$0xff] }
 0xefb   : > { %v6918_v34 = vadd.f32 %v6902_v4, %v12770_v44  ;;  %v6639_v2 = vmax.f32 %v6202_v49, 0.0  ;;  %v6750_v9 = vmul.f32 %v12609_v63, %v6638_v56  ;;  %v6640_v33 = vmax.f32 %v13058_v48, 0.0  ;;  %v13063_v4 = vld [vmem:[#allocation26_spill] sm:$0xff] }
 0xefc   : > { %v6217_v53 = vadd.f32 %v13059_v16, %v12627_v10  ;;  %v6861_v51 = vadd.f32 %v12605_v42, %v6749_v24  ;;  %v6641_v0 = vmax.f32 %v6212_v32, 0.0  ;;  %v6222_v28 = vadd.f32 %v13061_v59, %v12636_v15  ;;  %v13062_v10 = vld [vmem:[#allocation30_spill] sm:$0xff] }
 0xefd   : > { %9446 = vmatprep.mubr.msk.f32.mxu0 %vm4336_vm6, %v6918_v34  ;;  %v6751_v29 = vmul.f32 %v12613_v39, %v6639_v2  ;;  %v6862_v63 = vadd.f32 %v12617_v8, %v6750_v9  ;;  %v6752_v17 = vmul.f32 %v12629_v22, %v6640_v33  ;;  %v6227_v62 = vadd.f32 %v13062_v10, %v12661_v52 }
 0xefe   : > { %9447 = vmatmul.mubr.msk.f32.gmra.mrb[114].mxu0 %vm4336_vm6, %v6919_v27  ;;  %v6642_v55 = vmax.f32 %v6217_v53, 0.0  ;;  %v6753_v39 = vmul.f32 %v12640_v6, %v6641_v0  ;;  %v6643_v14 = vmax.f32 %v6222_v28, 0.0  ;;  %v6232_v15 = vadd.f32 %v13063_v4, %v12671_v60 }
 0xeff   : > { %9459 = vmatprep.mubr.msk.f32.mxu0 %vm4336_vm6, %v6856_v7  ;;  %v6863_v42 = vadd.f32 %v12621_v38, %v6751_v29  ;;  %v6864_v8 = vadd.f32 %v12651_v41, %v6752_v17  ;;  %v6644_v34 = vmax.f32 %v6227_v62, 0.0  ;;  %v6237_v52 = vadd.f32 %v13064_v37, %v12694_v31 }
 0xf00   : > { %v6754_v22 = vmul.f32 %v12665_v11, %v6642_v55  ;;  %v6865_v38 = vadd.f32 %v12653_v36, %v6753_v39  ;;  %v6755_v6 = vmul.f32 %v12673_v30, %v6643_v14  ;;  %v6645_v25 = vmax.f32 %v6232_v15, 0.0 }
 0xf01   : > { %v6242_v60 = vadd.f32 %v13065_v3, %v12710_v61  ;;  %v6756_v11 = vmul.f32 %v12697_v50, %v6644_v34  ;;  %v6646_v27 = vmax.f32 %v6237_v52, 0.0  ;;  %v13067_v48 = vmov 0.0  }
 0xf02   : > { %9460 = vmatmul.mubr.msk.f32.vlgmr.msra.gmra.mrb[100].mxu0 %vm4336_vm6, %v6857_v26  ;;  %v6866_v41 = vadd.f32 %v12677_v5, %v6754_v22  ;;  %v6867_v31 = vadd.f32 %v12681_v12, %v6755_v6  ;;  %v6757_v7 = vmul.f32 %v12716_v18, %v6645_v25  ;;  %9515 = vmatprep.mubr.msk.f32.mxu1 %vm10618_vm9, %v13067_v48 }
 0xf03   : > { %9462 = vmatprep.mubr.msk.f32.mxu0 %vm4336_vm6, %v6858_v35  ;;  %v6647_v36 = vmax.f32 %v6242_v60, 0.0  ;;  %v6868_v30 = vadd.f32 %v12731_v20, %v6756_v11  ;;  %v6758_v23 = vmul.f32 %v12747_v1, %v6646_v27 }
 0xf04   : > { %v6869_v5 = vadd.f32 %v12734_v19, %v6757_v7 }
 0xf05   : > { %v6759_v50 = vmul.f32 %v12754_v47, %v6647_v36  ;;  %v6870_v61 = vadd.f32 %v12770_v44, %v6758_v23 }
 0xf06   : > { %9463 = vmatmul.mubr.msk.f32.gmra.mrb[102].mxu0 %vm4336_vm6, %v6859_v43 }
 0xf07   : > { %9465 = vmatprep.mubr.msk.f32.mxu0 %vm4336_vm6, %v13060_v13  ;;  %v6871_v12 = vadd.f32 %v12773_v21, %v6759_v50  ;;  %v7324_v13 = vld [vmem:[#allocation2] sm:$0x1] }
 0xf0a   : > { %9466 = vmatmul.mubr.msk.f32.gmra.mrb[104].mxu0 %vm4336_vm6, %v6861_v51 }
 0xf0b   : > { %9468 = vmatprep.mubr.msk.f32.mxu0 %vm4336_vm6, %v6862_v63 }
 0xf0e   : > { %9469 = vmatmul.mubr.msk.f32.gmra.mrb[106].mxu0 %vm4336_vm6, %v6863_v42 }
 0xf0f   : > { %9471 = vmatprep.mubr.msk.f32.mxu0 %vm4336_vm6, %v6864_v8 }
 0xf12   : > { %9472 = vmatmul.mubr.msk.f32.gmra.mrb[108].mxu0 %vm4336_vm6, %v6865_v38 }
 0xf13   : > { %9474 = vmatprep.mubr.msk.f32.mxu0 %vm4336_vm6, %v6866_v41 }
 0xf16   : > { %9475 = vmatmul.mubr.msk.f32.gmra.mrb[110].mxu0 %vm4336_vm6, %v6867_v31 }
 0xf17   : > { %9477 = vmatprep.mubr.msk.f32.mxu0 %vm4336_vm6, %v6868_v30 }
 0xf1a   : > { %9478 = vmatmul.mubr.msk.f32.gmra.mrb[112].mxu0 %vm4336_vm6, %v6869_v5 }
 0xf1b   : > { %9480 = vmatprep.mubr.msk.f32.mxu0 %vm4336_vm6, %v6870_v61 }
 0xf1e   : > { %9481 = vmatmul.mubr.msk.f32.gmra.mrb[114].mxu0 %vm4336_vm6, %v6871_v12 }
 0xf1f   : > { %9550 = vmatprep.mubr.msk.f32.mxu0 %vm10618_vm9, %v13067_v48 }
 0xfd5   : > { %v9461_v18 = vpop.f32.mrb[100].mxu0 }
 0xfd6   : > { %v7243_v20 = vpop.f32.mrb[101].mxu0 }
 0xfd7   : > { %v10532_v1 = vpack.i.bf16 %v9461_v18, %v7243_v20 }
 0xfd9   : > { %10493 = vrot.lane.b32.xlu0 %v10532_v1, %s13066_s0  ;;  %v9464_v58 = vpop.f32.mrb[102].mxu0 }
 0xfda   : > { %v7253_v26 = vpop.f32.mrb[103].mxu0 }
 0xfdb   : > { %v10537_v19 = vpack.i.bf16 %v9464_v58, %v7253_v26 }
 0xfdd   : > { %10498 = vrot.lane.b32.xlu1 %v10537_v19, %s13066_s0  ;;  %v9467_v47 = vpop.f32.mrb[104].mxu0 }
 0xfde   : > { %v7263_v44 = vpop.f32.mrb[105].mxu0 }
 0xfdf   : > { %v10542_v57 = vpack.i.bf16 %v9467_v47, %v7263_v44 }
 0xfe1   : > { %10503 = vrot.lane.b32.xlu0 %v10542_v57, %s13066_s0  ;;  %v9470_v45 = vpop.f32.mrb[106].mxu0 }
 0xfe2   : > { %v7273_v40 = vpop.f32.mrb[107].mxu0 }
 0xfe3   : > { %v10547_v21 = vpack.i.bf16 %v9470_v45, %v7273_v40 }
 0xfe5   : > { %10508 = vrot.lane.b32.xlu1 %v10547_v21, %s13066_s0  ;;  %v9473_v49 = vpop.f32.mrb[108].mxu0 }
 0xfe6   : > { %v7283_v35 = vpop.f32.mrb[109].mxu0 }
 0xfe7   : > { %v10552_v56 = vpack.i.bf16 %v9473_v49, %v7283_v35 }
 0xfe9   : > { %10513 = vrot.lane.b32.xlu0 %v10552_v56, %s13066_s0  ;;  %v9476_v43 = vpop.f32.mrb[110].mxu0 }
 0xfea   : > { %v7293_v24 = vpop.f32.mrb[111].mxu0 }
 0xfeb   : > { %v10557_v2 = vpack.i.bf16 %v9476_v43, %v7293_v24 }
 0xfed   : > { %10518 = vrot.lane.b32.xlu1 %v10557_v2, %s13066_s0  ;;  %v9479_v46 = vpop.f32.mrb[112].mxu0 }
 0xfee   : > { %v7303_v32 = vpop.f32.mrb[113].mxu0 }
 0xfef   : > { %v10562_v9 = vpack.i.bf16 %v9479_v46, %v7303_v32 }
 0xff1   : > { %10523 = vrot.lane.b32.xlu0 %v10562_v9, %s13066_s0  ;;  %v9482_v33 = vpop.f32.mrb[114].mxu0 }
 0xff2   : > { %v7313_v16 = vpop.f32.mrb[115].mxu0 }
 0xff3   : > { %v10567_v53 = vpack.i.bf16 %v9482_v33, %v7313_v16 }
 0xff5   : > { %10533 = vrot.lane.b32.xlu0 %v10532_v1, %s13068_s2  ;;  %10528 = vrot.lane.b32.xlu1 %v10567_v53, %s13066_s0  ;;  %s13069_s0 = sld [smem:[#allocation18_spill]] }
 0xff9   : > { %10543 = vrot.lane.b32.xlu0 %v10542_v57, %s13068_s2  ;;  %10538 = vrot.lane.b32.xlu1 %v10537_v19, %s13068_s2 }
 0xffb   : > { %v8264_v12 = vld [vmem:[%s13069_s0 + $0x1] sm:$0x1]  ;;  %v8265_v18 = vld [vmem:[%s13069_s0 + $0x2] sm:$0x1] }
 0xffd   : > { %10553 = vrot.lane.b32.xlu0 %v10552_v56, %s13068_s2  ;;  %10548 = vrot.lane.b32.xlu1 %v10547_v21, %s13068_s2 }
0x1001   : > { %10563 = vrot.lane.b32.xlu0 %v10562_v9, %s13068_s2  ;;  %10558 = vrot.lane.b32.xlu1 %v10557_v2, %s13068_s2 }
0x1005   : > { %7327 = vperm.xlu0 %10230, %v7324_v13   ;;  %10568 = vrot.lane.b32.xlu1 %v10567_v53, %s13068_s2  ;;  %s13072_s2 = sshll.u32 %s13075_s1, 1 }
0x104b   : > { %v10494_v51 = vpop.permute.xlu0 %10493 }
0x104c   : > { %v10496_v29 = vunpack.i.h.bf16 %v10494_v51  ;;  %v10495_v0 = vunpack.i.l.bf16 %v10494_v51 }
0x104e   : > { %v9973_v59 = vpack.c.bf16 %v10496_v29, %v10495_v0 }
0x104f   : > { %v10499_v28 = vpop.permute.xlu1 %10498 }
0x1050   : > { %v10501_v63 = vunpack.i.h.bf16 %v10499_v28  ;;  %v10500_v17 = vunpack.i.l.bf16 %v10499_v28  ;;  %9974 = vmatpush3.bf16.msra.mxu1 %v9973_v59  ;;  %9998 = vmatpush3.bf16.msra.mxu0 %v9973_v59  ;;  %v7468_v28 = vld [vmem:[%s13069_s0] sm:$0x1]  ;;  %s983_s0 = scalar_lea.vmem %s10786_s27, %s13072_s2 }
0x1051   : > { %9975 = vmatprep.subr.bf16.mxu1 %v13043_v54  ;;  %9999 = vmatprep.subr.bf16.mxu0 %v13043_v54 }
0x1052   : > { %v9976_v55 = vpack.c.bf16 %v10501_v63, %v10500_v17  ;;  %v7679_v63 = vld [vmem:[%s10781_s20 + $0x8] sm:$0xff]  ;;  %v7681_v17 = vld [vmem:[%s10781_s20 + $0x18] sm:$0xff] }
0x1053   : > { %v10504_v10 = vpop.permute.xlu0 %10503 }
0x1054   : > { %v10506_v62 = vunpack.i.h.bf16 %v10504_v10  ;;  %v10505_v42 = vunpack.i.l.bf16 %v10504_v10  ;;  %9977 = vmatpush3.bf16.msra.mxu1 %v9976_v55  ;;  %10001 = vmatpush3.bf16.msra.mxu0 %v9976_v55  ;;  %v7678_v55 = vld [vmem:[%s10781_s20] sm:$0xff]  ;;  %v10044_v10 = vpack.c.bf16 %v7681_v17, %v7679_v63  ;;  %v10619_v17 = vmov 1966171168  }
0x1055   : > { %9978 = vmatprep.subr.bf16.mxu1 %v13043_v54  ;;  %10002 = vmatprep.subr.bf16.mxu0 %v13043_v54 }
0x1056   : > { %v9979_v39 = vpack.c.bf16 %v10506_v62, %v10505_v42  ;;  %v7680_v62 = vld [vmem:[%s10781_s20 + $0x10] sm:$0xff]  ;;  %v7683_v42 = vld [vmem:[%s10781_s20 + $0x28] sm:$0xff] }
0x1057   : > { %v10509_v14 = vpop.permute.xlu1 %10508 }
0x1058   : > { %v10511_v4 = vunpack.i.h.bf16 %v10509_v14  ;;  %v10510_v15 = vunpack.i.l.bf16 %v10509_v14  ;;  %9980 = vmatpush3.bf16.msra.mxu1 %v9979_v39  ;;  %10004 = vmatpush3.bf16.msra.mxu0 %v9979_v39  ;;  %v7685_v39 = vld [vmem:[%s10781_s20 + $0x38] sm:$0xff]  ;;  %v10046_v14 = vpack.c.bf16 %v7680_v62, %v7678_v55  ;;  %v7862_v55 = vunpack.c.l.s4 %v10619_v17 }
0x1059   : > { %9981 = vmatprep.subr.bf16.mxu1 %v13043_v54  ;;  %10005 = vmatprep.subr.bf16.mxu0 %v13043_v54 }
0x105a   : > { %v9982_v8 = vpack.c.bf16 %v10511_v4, %v10510_v15  ;;  %v10048_v4 = vpack.c.bf16 %v7685_v39, %v7683_v42  ;;  %v7684_v15 = vld [vmem:[%s10781_s20 + $0x30] sm:$0xff] }
0x105b   : > { %v10514_v22 = vpop.permute.xlu0 %10513 }
0x105c   : > { %v10516_v34 = vunpack.i.h.bf16 %v10514_v22  ;;  %v10515_v37 = vunpack.i.l.bf16 %v10514_v22  ;;  %9983 = vmatpush3.bf16.msra.mxu1 %v9982_v8  ;;  %10007 = vmatpush3.bf16.msra.mxu0 %v9982_v8  ;;  %v7687_v8 = vld [vmem:[%s10781_s20 + $0x48] sm:$0xff]  ;;  %v7689_v22 = vld [vmem:[%s10781_s20 + $0x58] sm:$0xff] }
0x105d   : > { %9984 = vmatprep.subr.bf16.mxu1 %v13043_v54  ;;  %10008 = vmatprep.subr.bf16.mxu0 %v13043_v54 }
0x105e   : > { %v9985_v52 = vpack.c.bf16 %v10516_v34, %v10515_v37  ;;  %v10052_v37 = vpack.c.bf16 %v7689_v22, %v7687_v8 }
0x105f   : > { %v10519_v38 = vpop.permute.xlu1 %10518 }
0x1060   : > { %v10521_v6 = vunpack.i.h.bf16 %v10519_v38  ;;  %v10520_v25 = vunpack.i.l.bf16 %v10519_v38  ;;  %9986 = vmatpush3.bf16.msra.mxu1 %v9985_v52  ;;  %10010 = vmatpush3.bf16.msra.mxu0 %v9985_v52  ;;  %v7686_v52 = vld [vmem:[%s10781_s20 + $0x40] sm:$0xff]  ;;  %v7688_v38 = vld [vmem:[%s10781_s20 + $0x50] sm:$0xff] }
0x1061   : > { %9987 = vmatprep.subr.bf16.mxu1 %v13043_v54  ;;  %10011 = vmatprep.subr.bf16.mxu0 %v13043_v54 }
0x1062   : > { %v9988_v3 = vpack.c.bf16 %v10521_v6, %v10520_v25  ;;  %v7691_v6 = vld [vmem:[%s10781_s20 + $0x68] sm:$0xff]  ;;  %v7693_v25 = vld [vmem:[%s10781_s20 + $0x78] sm:$0xff] }
0x1063   : > { %v10524_v60 = vpop.permute.xlu0 %10523 }
0x1064   : > { %v10526_v41 = vunpack.i.h.bf16 %v10524_v60  ;;  %v10525_v11 = vunpack.i.l.bf16 %v10524_v60  ;;  %9989 = vmatpush3.bf16.msra.mxu1 %v9988_v3  ;;  %10013 = vmatpush3.bf16.msra.mxu0 %v9988_v3  ;;  %v10054_v3 = vpack.c.bf16 %v7688_v38, %v7686_v52  ;;  %v10056_v60 = vpack.c.bf16 %v7693_v25, %v7691_v6 }
0x1065   : > { %9990 = vmatprep.subr.bf16.mxu1 %v13043_v54  ;;  %10014 = vmatprep.subr.bf16.mxu0 %v13043_v54 }
0x1066   : > { %v9991_v27 = vpack.c.bf16 %v10526_v41, %v10525_v11  ;;  %v7690_v41 = vld [vmem:[%s10781_s20 + $0x60] sm:$0xff]  ;;  %v7692_v11 = vld [vmem:[%s10781_s20 + $0x70] sm:$0xff] }
0x1067   : > { %v10534_v31 = vpop.permute.xlu0 %10533  ;;  %v10529_v7 = vpop.permute.xlu1 %10528 }
0x1068   : > { %v10531_v36 = vunpack.i.h.bf16 %v10529_v7  ;;  %v10530_v30 = vunpack.i.l.bf16 %v10529_v7  ;;  %9992 = vmatpush3.bf16.msra.mxu1 %v9991_v27  ;;  %10016 = vmatpush3.bf16.msra.mxu0 %v9991_v27  ;;  %v10536_v23 = vunpack.i.h.bf16 %v10534_v31  ;;  %v10535_v5 = vunpack.i.l.bf16 %v10534_v31  ;;  %v7695_v31 = vld [vmem:[%s10781_s20 + $0x88] sm:$0xf] }
0x1069   : > { %9993 = vmatprep.subr.bf16.mxu1 %v13043_v54  ;;  %10017 = vmatprep.subr.bf16.mxu0 %v13043_v54  ;;  %v10058_v27 = vpack.c.bf16 %v7692_v11, %v7690_v41  ;;  %v7661_v7 = vld [vmem:[%s10776_s12 + $0x8] sm:$0xff] }
0x106a   : > { %v9994_v50 = vpack.c.bf16 %v10531_v36, %v10530_v30  ;;  %v10021_v20 = vpack.c.bf16 %v10536_v23, %v10535_v5  ;;  %v7663_v36 = vld [vmem:[%s10776_s12 + $0x18] sm:$0xff]  ;;  %v7694_v30 = vld [vmem:[%s10781_s20 + $0x80] sm:$0xf] }
0x106b   : > { %v10539_v61 = vpop.permute.xlu1 %10538  ;;  %v10544_v26 = vpop.permute.xlu0 %10543  ;;  %v10060_v23 = vpack.c.bf16 %v7663_v36, %v7661_v7 }
0x106c   : > { %9995 = vmatpush3.bf16.msra.mxu1 %v9994_v50  ;;  %10019 = vmatpush3.bf16.msra.mxu0 %v9994_v50  ;;  %v10541_v1 = vunpack.i.h.bf16 %v10539_v61  ;;  %v10540_v58 = vunpack.i.l.bf16 %v10539_v61  ;;  %v10546_v19 = vunpack.i.h.bf16 %v10544_v26  ;;  %v10545_v47 = vunpack.i.l.bf16 %v10544_v26  ;;  %v7665_v26 = vld [vmem:[%s10776_s12 + $0x28] sm:$0xff] }
0x106d   : > { %10020 = vmatprep.subr.bf16.mxu1 %v13043_v54  ;;  %10045 = vmatprep.subr.bf16.mxu0 %v10044_v10  ;;  %v7863_v10 = vunpack.c.0.s8 %v7862_v55 }
0x106e   : > { %v10024_v44 = vpack.c.bf16 %v10541_v1, %v10540_v58  ;;  %v10027_v45 = vpack.c.bf16 %v10546_v19, %v10545_v47  ;;  %v7662_v1 = vld [vmem:[%s10776_s12 + $0x10] sm:$0xff]  ;;  %v7667_v19 = vld [vmem:[%s10776_s12 + $0x38] sm:$0xff]  ;;  %v13070_v47 = vld [vmem:[#allocation19_spill] sm:$0xff] }
0x106f   : > { %9516 = vmatmul.mubr.f32.vlgmr.msra.gmra.mrb[52].mxu1 %v8264_v12  ;;  %9551 = vmatmul.mubr.f32.vlgmr.msra.gmra.mrb[116].mxu0 %v8265_v18  ;;  %v10549_v57 = vpop.permute.xlu1 %10548  ;;  %v10554_v49 = vpop.permute.xlu0 %10553  ;;  %v7866_v42 = vsub.s32 %v7863_v10, %v13070_v47 }
0x1070   : > { %10022 = vmatpush3.bf16.msra.mxu1 %v10021_v20  ;;  %9585 = vmatprep.mubr.msk.f32.mxu1 %vm10618_vm9, %v13067_v48  ;;  %v10551_v40 = vunpack.i.h.bf16 %v10549_v57  ;;  %v10550_v21 = vunpack.i.l.bf16 %v10549_v57  ;;  %v10556_v35 = vunpack.i.h.bf16 %v10554_v49  ;;  %v10555_v56 = vunpack.i.l.bf16 %v10554_v49  ;;  %v7660_v20 = vld [vmem:[%s10776_s12] sm:$0xff] }
0x1071   : > { %10023 = vmatprep.subr.bf16.mxu1 %v13043_v54  ;;  %7771 = vmatprep.mubr.f32.mxu0 %v13067_v48 }
0x1072   : > { %v10030_v43 = vpack.c.bf16 %v10551_v40, %v10550_v21  ;;  %v10033_v2 = vpack.c.bf16 %v10556_v35, %v10555_v56  ;;  %10047 = vmatpush1.bf16.msra.mxu0 %v10046_v14  ;;  %v10062_v21 = vpack.c.bf16 %v7662_v1, %v7660_v20  ;;  %v10064_v35 = vpack.c.bf16 %v7667_v19, %v7665_v26  ;;  %v7664_v56 = vld [vmem:[%s10776_s12 + $0x20] sm:$0xff] }
0x1073   : > { %v10559_v24 = vpop.permute.xlu1 %10558  ;;  %v10564_v9 = vpop.permute.xlu0 %10563  ;;  %10049 = vmatprep.subr.bf16.mxu0 %v10048_v4 }
0x1074   : > { %10025 = vmatpush3.bf16.msra.mxu1 %v10024_v44  ;;  %v10561_v46 = vunpack.i.h.bf16 %v10559_v24  ;;  %v10560_v32 = vunpack.i.l.bf16 %v10559_v24  ;;  %v10566_v33 = vunpack.i.h.bf16 %v10564_v9  ;;  %v10565_v16 = vunpack.i.l.bf16 %v10564_v9  ;;  %v7669_v24 = vld [vmem:[%s10776_s12 + $0x48] sm:$0xff]  ;;  %v7668_v9 = vld [vmem:[%s10776_s12 + $0x40] sm:$0xff] }
0x1075   : > { %10026 = vmatprep.subr.bf16.mxu1 %v13043_v54  ;;  %v13071_v44 = vsub.s32 0, %v13070_v47 }
0x1076   : > { %v10036_v53 = vpack.c.bf16 %v10561_v46, %v10560_v32  ;;  %v10039_v51 = vpack.c.bf16 %v10566_v33, %v10565_v16  ;;  %v7670_v33 = vld [vmem:[%s10776_s12 + $0x50] sm:$0xff]  ;;  %v7673_v16 = vld [vmem:[%s10776_s12 + $0x68] sm:$0xff] }
0x1077   : > { %v10569_v13 = vpop.permute.xlu1 %10568 }
0x1078   : > { %10028 = vmatpush3.bf16.msra.mxu1 %v10027_v45  ;;  %v10571_v29 = vunpack.i.h.bf16 %v10569_v13  ;;  %v10570_v0 = vunpack.i.l.bf16 %v10569_v13  ;;  %v10070_v13 = vpack.c.bf16 %v7670_v33, %v7668_v9 }
0x1079   : > { %10029 = vmatprep.subr.bf16.mxu1 %v13043_v54 }
0x107a   : > { %v10042_v59 = vpack.c.bf16 %v10571_v29, %v10570_v0  ;;  %v7672_v29 = vld [vmem:[%s10776_s12 + $0x60] sm:$0xff]  ;;  %v7674_v0 = vld [vmem:[%s10776_s12 + $0x70] sm:$0xff] }
0x107c   : > { %10031 = vmatpush3.bf16.msra.mxu1 %v10030_v43  ;;  %v7666_v43 = vld [vmem:[%s10776_s12 + $0x30] sm:$0xff] }
0x107d   : > { %10032 = vmatprep.subr.bf16.mxu1 %v13043_v54  ;;  %v10066_v46 = vpack.c.bf16 %v7666_v43, %v7664_v56 }
0x1080   : > { %10034 = vmatpush3.bf16.msra.mxu1 %v10033_v2  ;;  %v7671_v2 = vld [vmem:[%s10776_s12 + $0x58] sm:$0xff] }
0x1081   : > { %10035 = vmatprep.subr.bf16.mxu1 %v13043_v54  ;;  %v10068_v32 = vpack.c.bf16 %v7671_v2, %v7669_v24 }
0x1084   : > { %10037 = vmatpush3.bf16.msra.mxu1 %v10036_v53  ;;  %v7328_v18 = vpop.permute.xlu0 %7327  ;;  %v7675_v53 = vld [vmem:[%s10776_s12 + $0x78] sm:$0xff] }
0x1085   : > { %10038 = vmatprep.subr.bf16.mxu1 %v13043_v54  ;;  %v7333_v57 = vrot.slane %v7328_v18, %v13071_v44 }
0x1088   : > { %10040 = vmatpush3.bf16.msra.mxu1 %v10039_v51  ;;  %v10072_v51 = vpack.c.bf16 %v7675_v53, %v7673_v16 }
0x1089   : > { %10041 = vmatprep.subr.bf16.mxu1 %v13043_v54  ;;  %v7682_v54 = vld [vmem:[%s10781_s20 + $0x20] sm:$0xff] }
0x108a   : > { %v10050_v34 = vpack.c.bf16 %v7684_v15, %v7682_v54  ;;  %v13073_v54 = vlaneseq }
0x108c   : > { %10043 = vmatpush3.bf16.msra.mxu1 %v10042_v59  ;;  %10051 = vmatpush1.bf16.msra.mxu0 %v10050_v34  ;;  %v10074_v59 = vpack.c.bf16 %v7674_v0, %v7672_v29  ;;  %vm7878_vm12 = vcmp.lt.s32.totalorder %v13073_v54, 136 }
0x108d   : > { %10053 = vmatprep.subr.bf16.mxu0 %v10052_v37 }
0x108f   : > { %9586 = vmatmul.mubr.f32.vlgmr.msra.gmra.mrb[54].mxu1 %v7468_v28  ;;  %v7676_v28 = vld [vmem:[%s10776_s12 + $0x80] sm:$0xf] }
0x1090   : > { %10055 = vmatpush1.bf16.msra.mxu0 %v10054_v3 }
0x1091   : > { %10057 = vmatprep.subr.bf16.mxu0 %v10056_v60 }
0x1094   : > { %10059 = vmatpush1.bf16.msra.mxu0 %v10058_v27 }
0x1095   : > { %8266 = vmatprep.subr.msk.mxu0 %vm7700_vm10, %v7695_v31 }
0x1098   : > { %8267 = vmatpush1.msk.msra.mxu0 %vm7700_vm10, %v7694_v30 }
0x1099   : > { %10061 = vmatprep.subr.bf16.mxu0 %v10060_v23 }
0x1142   : > { %v7464_v5 = vpop.f32.mrb[52].mxu1  ;;  %v7537_v50 = vpop.f32.mrb[116].mxu0 }
0x1143   : > { %v9517_v61 = vpop.f32.mrb[53].mxu1  ;;  %v9552_v12 = vpop.f32.mrb[117].mxu0  ;;  %v7465_v63 = vadd.f32 %v7464_v5, %v7333_v57 }
0x1162   : > { %v7655_v58 = vpop.f32.mrb[54].mxu1 }
0x1163   : > { %v7656_v45 = vadd.f32 %v7655_v58, %v7537_v50  ;;  %v9587_v40 = vpop.f32.mrb[55].mxu1 }
0x1165   : > { %v7659_v49 = vadd.f32 %v7656_v45, %v7333_v57 }
0x1167   : > { %8268 = vmatmul.mubr.msk.f32.vlgmr.msra.gmra.mrb[118].mxu0 %vm7696_vm11, %v7659_v49 }
0x1168   : > { %10063 = vmatpush1.bf16.msra.mxu0 %v10062_v21  ;;  %7851 = vmatprep.mubr.f32.mxu0 %v13067_v48  ;;  %v7677_v48 = vld [vmem:[%s10776_s12 + $0x88] sm:$0xf] }
0x1169   : > { %10065 = vmatprep.subr.bf16.mxu0 %v10064_v35 }
0x116c   : > { %10067 = vmatpush1.bf16.msra.mxu0 %v10066_v46 }
0x116d   : > { %10069 = vmatprep.subr.bf16.mxu0 %v10068_v32 }
0x1170   : > { %10071 = vmatpush1.bf16.msra.mxu0 %v10070_v13 }
0x1171   : > { %10073 = vmatprep.subr.bf16.mxu0 %v10072_v51 }
0x1174   : > { %10075 = vmatpush1.bf16.msra.mxu0 %v10074_v59 }
0x1175   : > { %8269 = vmatprep.subr.msk.mxu0 %vm7700_vm10, %v7677_v48 }
0x1178   : > { %8270 = vmatpush1.msk.msra.mxu0 %vm7700_vm10, %v7676_v28 }
0x1179   : > { %8271 = vmatmul.mubr.msk.f32.vlgmr.msra.gmra.mrb[118].mxu0 %vm7696_vm11, %v7465_v63 }
0x124c   : > { %v7853_v62 = vpop.f32.mrb[118].mxu0 }
0x124d   : > { %v7855_v39 = vpop.f32.mrb[119].mxu0 }
0x124e   : > { %v7860_v14 = vcombine.low %v7853_v62, %v7855_v39 }
0x1250   : > { %v7867_v4 = vrot.slane %v7860_v14, %v7866_v42 }
0x1252   : > { %v7874_v15 = vrot.slane %v7867_v4, %v7866_v42 }
0x1254   : > { %7880 = vst.msk [vmem:[%s983_s0] sm:$0x3] %vm7878_vm12, %v7874_v15 }
0x1255 PF: > { %s77_s28 = sadd.s32 1, %s10578_s28  }
0x1256   : > { %p74_p4 = scmp.ge.s32.totalorder %s77_s28, 4  }
0x1258   :  { %76 = sbr.rel (!%p74_p4) target bundleno = 58 (0x3a), region = 222 }

</bundles_post_ra>
